<compile_context>
chip_gen: v7x
topology: tpu7x:2x2x1
jax: 0.10.0
libtpu: 0.0.40
codegen_flags: <defaults>
</compile_context>

<pallas_src>
import functools
import math

import jax
import jax.numpy as jnp
from jax.experimental import pallas as pl
from jax.experimental.pallas import tpu as pltpu

NEG_BIG = -1e9          # finite stand-in for -inf: no NaN on fully-masked rows
_LANE = 128
_FFN = 1024


def _round_up(x, m):
    return ((x + m - 1) // m) * m


def _pick_tile(dim, cands):
    for c in cands:
        if dim % c == 0:
            return c
    return dim


_VMEM_LIMIT_CACHE = [False, None]


def _vmem_limit_bytes():
    """Generation-aware scoped-VMEM limit: ~3/4 of physical (≈96 MiB v5e/v6e, ≈48 MiB v7x)."""
    if not _VMEM_LIMIT_CACHE[0]:
        try:
            cap = int(pltpu.get_tpu_info().vmem_capacity_bytes)
            _VMEM_LIMIT_CACHE[1] = min((cap * 3) // 4, 100 * 1024 * 1024)
        except Exception:
            _VMEM_LIMIT_CACHE[1] = None      # fall back to the compiler default
        _VMEM_LIMIT_CACHE[0] = True
    return _VMEM_LIMIT_CACHE[1]


def _cparams(dim_sem):
    return pltpu.CompilerParams(dimension_semantics=dim_sem,
                                vmem_limit_bytes=_vmem_limit_bytes())


# ----------------------------- tiled linear (X @ W^T + b) -----------------------------

def _linear_kernel(x_ref, w_ref, b_ref, o_ref, acc_ref, *, relu):
    @pl.when(pl.program_id(2) == 0)
    def _init():
        acc_ref[...] = jnp.zeros_like(acc_ref)

    acc_ref[...] += jnp.dot(x_ref[...], w_ref[...],
                            preferred_element_type=jnp.float32)

    @pl.when(pl.program_id(2) == pl.num_programs(2) - 1)
    def _finalize():
        out = acc_ref[...] + b_ref[...]
        if relu:
            out = jnp.maximum(out, 0.0)
        o_ref[...] = out.astype(o_ref.dtype)


def _linear_add_ln_kernel(x_ref, w_ref, b_ref, res_ref, g_ref, bb_ref, o_ref, acc_ref,
                          *, eps, n_real):
    @pl.when(pl.program_id(2) == 0)
    def _init():
        acc_ref[...] = jnp.zeros_like(acc_ref)

    acc_ref[...] += jnp.dot(x_ref[...], w_ref[...],
                            preferred_element_type=jnp.float32)

    @pl.when(pl.program_id(2) == pl.num_programs(2) - 1)
    def _finalize():
        # residual add + LayerNorm fused into the matmul epilogue.  Padded feature
        # columns of acc/bias/residual are exactly zero, so sum / sum-of-squares over
        # the full padded row equal the sums over the real n_real features.
        y = acc_ref[...] + b_ref[...] + res_ref[...].astype(jnp.float32)
        inv_n = 1.0 / n_real
        mu = jnp.sum(y, axis=-1, keepdims=True) * inv_n
        msq = jnp.sum(y * y, axis=-1, keepdims=True) * inv_n
        var = jnp.maximum(msq - mu * mu, 0.0)
        yn = (y - mu) * jax.lax.rsqrt(var + eps)
        o_ref[...] = (yn * g_ref[...] + bb_ref[...]).astype(o_ref.dtype)


def pack_linear(w, b, k_pad, n_pad=None, scale=1.0):
    """w: (N, K) PyTorch (out, in) layout; b: (N,).  Pre-transpose to (k_pad, n_pad) bf16
    with zero padding; bias stays f32 as (1, n_pad).  `scale` folds e.g. 1/sqrt(dk)."""
    n, k = w.shape
    if n_pad is None:
        n_pad = _round_up(n, _LANE)
    wt = jnp.zeros((k_pad, n_pad), jnp.float32).at[:k, :n].set(w.T * scale)
    bb = jnp.zeros((1, n_pad), jnp.float32).at[0, :n].set(b * scale)
    return {"wt": wt.astype(jnp.bfloat16), "b": bb}


def concat_packed(parts):
    """Concatenate per-projection packed weights along the (lane-padded) output axis."""
    return {"wt": jnp.concatenate([p["wt"] for p in parts], axis=1),
            "b": jnp.concatenate([p["b"] for p in parts], axis=1)}


def linear(x2d, p, relu=False, ln=None):
    """x2d: (M, K_pad) bf16 -> (M, N_pad) bf16.  Optional fused ReLU or fused
    residual-add + LayerNorm (ln = {"res", "g", "b", "n_real"})."""
    wt, bias = p["wt"], p["b"]
    M, K = x2d.shape
    Kw, Np = wt.shape
    assert K == Kw and M % 8 == 0, (K, Kw, M)

    tm = M if M <= 512 else _pick_tile(M, (512, 256, 128))
    tk = K if K <= 1024 else _pick_tile(K, (1024, 512, 256, 128))
    if ln is None:
        tn = Np if Np <= 512 else _pick_tile(Np, (512, 256, 128))
    else:
        tn = Np            # fused LayerNorm needs the full feature row in one tile
        assert ln["res"].shape == (M, Np)
    grid = (M // tm, Np // tn, K // tk)

    x_spec = pl.BlockSpec((tm, tk), lambda i, j, k: (i, k))
    w_spec = pl.BlockSpec((tk, tn), lambda i, j, k: (k, j))
    b_spec = pl.BlockSpec((1, tn), lambda i, j, k: (0, j))
    common = dict(
        grid=grid,
        out_specs=pl.BlockSpec((tm, tn), lambda i, j, k: (i, j)),
        out_shape=jax.ShapeDtypeStruct((M, Np), jnp.bfloat16),
        scratch_shapes=[pltpu.VMEM((tm, tn), jnp.float32)],
        compiler_params=_cparams(("parallel", "parallel", "arbitrary")),
    )

    if ln is None:
        return pl.pallas_call(
            functools.partial(_linear_kernel, relu=relu),
            in_specs=[x_spec, w_spec, b_spec],
            **common,
        )(x2d, wt, bias)

    return pl.pallas_call(
        functools.partial(_linear_add_ln_kernel, eps=ln.get("eps", 1e-5),
                          n_real=ln["n_real"]),
        in_specs=[x_spec, w_spec, b_spec,
                  pl.BlockSpec((tm, tn), lambda i, j, k: (i, j)),
                  pl.BlockSpec((1, tn), lambda i, j, k: (0, j)),
                  pl.BlockSpec((1, tn), lambda i, j, k: (0, j))],
        **common,
    )(x2d, wt, bias, ln["res"], ln["g"], ln["b"])


# ----------------------------- attention (lane-dense head layout) -----------------------------

def _attn_heads_body(q, k, v, pad_add, o_ref, *, heads, dk, causal):
    """q: (Sq, E_pad), k/v: (Sk, E_pad) bf16 with head h in lanes [h*dk, (h+1)*dk).
    Heads are isolated with lane masks + full-width MXU matmuls: no transposes, no
    narrow stores.  1/sqrt(dk) is pre-folded into the Q projection weights."""
    sq, e_pad = q.shape
    sk = k.shape[0]
    lane = jax.lax.broadcasted_iota(jnp.int32, (1, e_pad), 1)
    if causal:
        rows = jax.lax.broadcasted_iota(jnp.int32, (sq, sk), 0)
        cols = jax.lax.broadcasted_iota(jnp.int32, (sq, sk), 1)
    acc = jnp.zeros((sq, e_pad), jnp.float32)
    for h in range(heads):
        hm = jnp.logical_and(lane >= h * dk, lane < (h + 1) * dk)
        qh = jnp.where(hm, q, jnp.zeros_like(q))
        # masked full-width contraction == q_h @ k_h^T
        s = jax.lax.dot_general(qh, k, (((1,), (1,)), ((), ())),
                                preferred_element_type=jnp.float32)
        s = s + pad_add                       # (1, Sk) additive key-padding mask
        if causal:
            s = jnp.where(cols > rows, NEG_BIG, s)
        m = jnp.max(s, axis=-1, keepdims=True)
        e = jnp.exp(s - m)
        p = (e / jnp.sum(e, axis=-1, keepdims=True)).astype(v.dtype)
        vh = jnp.where(hm, v, jnp.zeros_like(v))
        acc = acc + jnp.dot(p, vh, preferred_element_type=jnp.float32)
    o_ref[0] = acc.astype(o_ref.dtype)


def _attn_self_kernel(qkv_ref, pad_ref, o_ref, *, heads, dk, e_pad):
    x = qkv_ref[0]                            # (S, 3*E_pad) bf16, layout [Q|K|V]
    q = x[:, :e_pad]
    k = x[:, e_pad:2 * e_pad]
    v = x[:, 2 * e_pad:3 * e_pad]
    _attn_heads_body(q, k, v, pad_ref[0], o_ref, heads=heads, dk=dk, causal=True)


def _attn_cross_kernel(q_ref, kv_ref, pad_ref, o_ref, *, heads, dk, e_pad):
    q = q_ref[0]                              # (Sq, E_pad)
    kvx = kv_ref[0]                           # (Sk, 2*E_pad), layout [K|V]
    k = kvx[:, :e_pad]
    v = kvx[:, e_pad:2 * e_pad]
    _attn_heads_body(q, k, v, pad_ref[0], o_ref, heads=heads, dk=dk, causal=False)


def attention_self(qkv, pad_add, *, heads, dk):
    """qkv: (B, S, 3*E_pad) bf16, pad_add: (B, 1, S) f32 -> (B, S, E_pad) bf16."""
    B, S, W = qkv.shape
    e_pad = W // 3
    # TODO(synk): flash/Sk-tiled + per-head grid for long sequences / v7x megacore.
    return pl.pallas_call(
        functools.partial(_attn_self_kernel, heads=heads, dk=dk, e_pad=e_pad),
        grid=(B,),
        in_specs=[pl.BlockSpec((1, S, W), lambda b: (b, 0, 0)),
                  pl.BlockSpec((1, 1, S), lambda b: (b, 0, 0))],
        out_specs=pl.BlockSpec((1, S, e_pad), lambda b: (b, 0, 0)),
        out_shape=jax.ShapeDtypeStruct((B, S, e_pad), jnp.bfloat16),
        compiler_params=_cparams(("parallel",)),
    )(qkv, pad_add)


def attention_cross(q, kv, pad_add, *, heads, dk):
    """q: (B, Sq, E_pad), kv: (B, Sk, 2*E_pad) bf16, pad_add: (B, 1, Sk) f32."""
    B, Sq, e_pad = q.shape
    Sk = kv.shape[1]
    return pl.pallas_call(
        functools.partial(_attn_cross_kernel, heads=heads, dk=dk, e_pad=e_pad),
        grid=(B,),
        in_specs=[pl.BlockSpec((1, Sq, e_pad), lambda b: (b, 0, 0)),
                  pl.BlockSpec((1, Sk, 2 * e_pad), lambda b: (b, 0, 0)),
                  pl.BlockSpec((1, 1, Sk), lambda b: (b, 0, 0))],
        out_specs=pl.BlockSpec((1, Sq, e_pad), lambda b: (b, 0, 0)),
        out_shape=jax.ShapeDtypeStruct((B, Sq, e_pad), jnp.bfloat16),
        compiler_params=_cparams(("parallel",)),
    )(q, kv, pad_add)


# ----------------------------- decoder block / stack (glue) -----------------------------

def decoder_block_fwd(pk, x, enc, pad_add_dec, pad_add_enc, *, heads, dk, e_real):
    B, S, e_pad = x.shape
    Se = enc.shape[1]
    M = B * S
    x2 = x.reshape(M, e_pad)

    # --- masked self-attention: fused [Q|K|V] projection, wo with fused residual+LN1 ---
    qkv = linear(x2, pk["wqkv"])
    a1 = attention_self(qkv.reshape(B, S, 3 * e_pad), pad_add_dec, heads=heads, dk=dk)
    out1 = linear(a1.reshape(M, e_pad), pk["wo_self"],
                  ln={"res": x2, "g": pk["ln1_g"], "b": pk["ln1_b"], "n_real": e_real})

    # --- encoder-decoder attention: Q on decoder, fused [K|V] on encoder output ---
    q = linear(out1, pk["wq_ed"])
    kv = linear(enc.reshape(B * Se, e_pad), pk["wkv_ed"])
    a2 = attention_cross(q.reshape(B, S, e_pad), kv.reshape(B, Se, 2 * e_pad),
                         pad_add_enc, heads=heads, dk=dk)
    out2 = linear(a2.reshape(M, e_pad), pk["wo_ed"],
                  ln={"res": out1, "g": pk["ln2_g"], "b": pk["ln2_b"], "n_real": e_real})

    # --- feed-forward: ff1 with fused ReLU, ff2 with fused residual+LN3 ---
    # TODO(synk): nn.Dropout(p=0.1) after the FFN is identity in eval mode.
    h = linear(out2, pk["ff1"], relu=True)
    out = linear(h, pk["ff2"],
                 ln={"res": out2, "g": pk["ln3_g"], "b": pk["ln3_b"], "n_real": e_real})
    return out.reshape(B, S, e_pad)


def decoder_stack_forward(packed, inputs, padding_mask, enc_outputs, padding_mask_enc,
                          *, head_count, e_real):
    B, S, E = inputs.shape
    Se = enc_outputs.shape[1]
    e_pad = _round_up(E, _LANE)
    s_pad = _round_up(S, 8)
    se_pad = _round_up(Se, 8)
    dk = E // head_count

    # One-time pad to lane-dense width / sublane-aligned length + bf16 cast.
    x = jnp.zeros((B, s_pad, e_pad), jnp.bfloat16).at[:, :S, :E].set(
        inputs.astype(jnp.bfloat16))
    enc = jnp.zeros((B, se_pad, e_pad), jnp.bfloat16).at[:, :Se, :E].set(
        enc_outputs.astype(jnp.bfloat16))

    # padding_mask == 1 marks padded key positions; length-padding positions are masked too.
    pm = jnp.ones((B, s_pad), jnp.float32).at[:, :S].set(padding_mask)
    pme = jnp.ones((B, se_pad), jnp.float32).at[:, :Se].set(padding_mask_enc)
    pad_add_dec = jnp.where(pm != 0, NEG_BIG, 0.0)[:, None, :]
    pad_add_enc = jnp.where(pme != 0, NEG_BIG, 0.0)[:, None, :]

    for pk in packed["blocks"]:
        x = decoder_block_fwd(pk, x, enc, pad_add_dec, pad_add_enc,
                              heads=head_count, dk=dk, e_real=e_real)

    out = x[:, :S, :E].astype(jnp.float32)
    # DecoderStack.forward returns the full sequential tuple
    return out, padding_mask, enc_outputs, enc_outputs, padding_mask_enc


# ----------------------------- params: raw init + packing -----------------------------

def _init_linear_raw(key, in_f, out_f, scale=0.05):
    kw, kb = jax.random.split(key)
    w = jax.random.normal(kw, (out_f, in_f), jnp.float32) * scale   # PyTorch (out, in)
    b = jax.random.normal(kb, (out_f,), jnp.float32) * scale
    return w, b


def init_block_raw(key, E, H):
    ks = jax.random.split(key, 10)
    sq, sk, sv, so = (_init_linear_raw(ks[i], E, E) for i in range(4))
    eq, ek, ev, eo = (_init_linear_raw(ks[4 + i], E, E) for i in range(4))
    f1 = _init_linear_raw(ks[8], E, _FFN)
    f2 = _init_linear_raw(ks[9], _FFN, E)
    ones = jnp.ones((E,), jnp.float32)
    zeros = jnp.zeros((E,), jnp.float32)
    return {
        "self": {"wq": sq[0], "bq": sq[1], "wk": sk[0], "bk": sk[1],
                 "wv": sv[0], "bv": sv[1], "wo": so[0], "bo": so[1]},
        "encdec": {"wq": eq[0], "bq": eq[1], "wk": ek[0], "bk": ek[1],
                   "wv": ev[0], "bv": ev[1], "wo": eo[0], "bo": eo[1]},
        "ff1_w": f1[0], "ff1_b": f1[1], "ff2_w": f2[0], "ff2_b": f2[1],
        "ln1_g": ones, "ln1_b": zeros, "ln2_g": ones, "ln2_b": zeros,
        "ln3_g": ones, "ln3_b": zeros,
    }


def _pad_vec(v, n_pad):
    return jnp.zeros((1, n_pad), jnp.float32).at[0, :v.shape[0]].set(v)


def pack_block(raw, E, H):
    e_pad = _round_up(E, _LANE)
    dk = E // H
    inv = 1.0 / math.sqrt(dk)                 # fold 1/sqrt(dk) into Q projections
    s, ed = raw["self"], raw["encdec"]
    return {
        "wqkv": concat_packed([pack_linear(s["wq"], s["bq"], e_pad, e_pad, scale=inv),
                               pack_linear(s["wk"], s["bk"], e_pad, e_pad),
                               pack_linear(s["wv"], s["bv"], e_pad, e_pad)]),
        "wo_self": pack_linear(s["wo"], s["bo"], e_pad, e_pad),
        "wq_ed": pack_linear(ed["wq"], ed["bq"], e_pad, e_pad, scale=inv),
        "wkv_ed": concat_packed([pack_linear(ed["wk"], ed["bk"], e_pad, e_pad),
                                 pack_linear(ed["wv"], ed["bv"], e_pad, e_pad)]),
        "wo_ed": pack_linear(ed["wo"], ed["bo"], e_pad, e_pad),
        "ff1": pack_linear(raw["ff1_w"], raw["ff1_b"], e_pad),
        "ff2": pack_linear(raw["ff2_w"], raw["ff2_b"], _round_up(_FFN, _LANE), e_pad),
        "ln1_g": _pad_vec(raw["ln1_g"], e_pad), "ln1_b": _pad_vec(raw["ln1_b"], e_pad),
        "ln2_g": _pad_vec(raw["ln2_g"], e_pad), "ln2_b": _pad_vec(raw["ln2_b"], e_pad),
        "ln3_g": _pad_vec(raw["ln3_g"], e_pad), "ln3_b": _pad_vec(raw["ln3_b"], e_pad),
    }


# ----------------------------- pure-JAX f32 reference (PyTorch semantics) -----------------------------

def _ref_ln(x, g, b, eps=1e-5):
    mu = x.mean(-1, keepdims=True)
    var = ((x - mu) ** 2).mean(-1, keepdims=True)
    return (x - mu) / jnp.sqrt(var + eps) * g + b


def _ref_mha(p, x, padding_mask, H, kv_inp=None, self_regress=False):
    B, Sq, E = x.shape
    dk = E // H
    kv = x if kv_inp is None else kv_inp
    Sk = kv.shape[1]
    Q = (x @ p["wq"].T + p["bq"]).reshape(B, Sq, H, dk).transpose(0, 2, 1, 3)
    K = (kv @ p["wk"].T + p["bk"]).reshape(B, Sk, H, dk).transpose(0, 2, 1, 3)
    V = (kv @ p["wv"].T + p["bv"]).reshape(B, Sk, H, dk).transpose(0, 2, 1, 3)
    mask = jnp.broadcast_to(
        jnp.where(padding_mask != 0, -jnp.inf, 0.0)[:, None, :], (B, Sq, Sk))
    if self_regress:
        causal = jnp.where(jnp.arange(Sk)[None, :] > jnp.arange(Sq)[:, None], -jnp.inf, 0.0)
        mask = mask + causal[None]
    s = jnp.einsum("bhqd,bhkd->bhqk", Q, K)
    att = jax.nn.softmax((s + mask[:, None]) / math.sqrt(dk), axis=-1)
    o = jnp.einsum("bhqk,bhkd->bhqd", att, V).transpose(0, 2, 1, 3).reshape(B, Sq, E)
    return o @ p["wo"].T + p["bo"]


def _ref_block(raw, x, pm, enc, pme, H):
    out1 = _ref_mha(raw["self"], x, pm, H, self_regress=True)
    out1 = _ref_ln(x + out1, raw["ln1_g"], raw["ln1_b"])
    out2 = _ref_mha(raw["encdec"], out1, pme, H, kv_inp=enc)
    out2 = _ref_ln(out1 + out2, raw["ln2_g"], raw["ln2_b"])
    h = jnp.maximum(out2 @ raw["ff1_w"].T + raw["ff1_b"], 0.0)
    ff = h @ raw["ff2_w"].T + raw["ff2_b"]
    return _ref_ln(out2 + ff, raw["ln3_g"], raw["ln3_b"])


def ref_decoder_stack(raw_params, inputs, pm, enc, pme, H):
    x = inputs
    for rb in raw_params["blocks"]:
        x = _ref_block(rb, x, pm, enc, pme, H)
    return x


# ----------------------------- main -----------------------------

if __name__ == "__main__":
    B, S_dec, S_enc = 2, 8, 8
    E, H, L = 32, 4, 2

    key = jax.random.PRNGKey(0)
    kp, kx, ke = jax.random.split(key, 3)
    bkeys = jax.random.split(kp, L)
    raw_params = {"blocks": [init_block_raw(bkeys[i], E, H) for i in range(L)]}
    packed_params = {"blocks": [pack_block(rb, E, H) for rb in raw_params["blocks"]]}

    dec_in = jax.random.normal(kx, (B, S_dec, E), jnp.float32)
    enc_out = jax.random.normal(ke, (B, S_enc, E), jnp.float32)
    # padding masks: 1.0 marks padded positions (last position of every sequence)
    pad_dec = jnp.zeros((B, S_dec), jnp.float32).at[:, -1].set(1.0)
    pad_enc = jnp.zeros((B, S_enc), jnp.float32).at[:, -1].set(1.0)

    fwd = jax.jit(functools.partial(decoder_stack_forward, head_count=H, e_real=E))
    out, _pm, _k, _v, _pme = fwd(packed_params, dec_in, pad_dec, enc_out, pad_enc)
    out = jax.block_until_ready(out)

    assert out.shape == (B, S_dec, E)
    assert bool(jnp.all(jnp.isfinite(out)))

    # full-stack correctness check against a pure-JAX f32 reference (bf16 tolerance)
    ref = ref_decoder_stack(raw_params, dec_in, pad_dec, enc_out, pad_enc, H)
    max_err = float(jnp.max(jnp.abs(out - ref)))
    assert max_err < 0.15, f"DecoderStack mismatch vs f32 reference: max|err|={max_err}"

    print("KERNEL_OK")
</pallas_src>

<mosaic_0001>
module attributes {stable_mosaic.version = 11 : i64} {
  func.func @_linear_kernel(%arg0: i32, %arg1: i32, %arg2: i32, %arg3: memref<16x128xbf16, #tpu.memory_space<vmem>>, %arg4: memref<128x384xbf16, #tpu.memory_space<vmem>>, %arg5: memref<1x384xf32, #tpu.memory_space<vmem>>, %arg6: memref<16x384xbf16, #tpu.memory_space<vmem>>, %arg7: memref<16x384xf32, #tpu.memory_space<vmem>>) attributes {dimension_semantics = [#tpu.dimension_semantics<parallel>, #tpu.dimension_semantics<parallel>, #tpu.dimension_semantics<arbitrary>], iteration_bounds = array<i64: 1, 1, 1>, scalar_prefetch = 0 : i64, scratch_operands = 1 : i64, tpu.core_type = #tpu.core_type<tc>, window_params = [{transform_indices = @transform_0, window_bounds = array<i64: 16, 128>}, {transform_indices = @transform_1, window_bounds = array<i64: 128, 384>}, {transform_indices = @transform_2, window_bounds = array<i64: 1, 384>}, {transform_indices = @transform_3, window_bounds = array<i64: 16, 384>}]} {
    %c0_i32 = arith.constant 0 : i32
    %0 = arith.cmpi eq, %arg2, %c0_i32 : i32
    %1 = arith.extui %0 : i1 to i32
    %c0_i32_0 = arith.constant 0 : i32
    %2 = arith.cmpi ne, %1, %c0_i32_0 : i32
    scf.if %2 {
      %cst_10 = arith.constant 0.000000e+00 : f32
      %12 = vector.broadcast %cst_10 : f32 to vector<16x384xf32>
      %c0_11 = arith.constant 0 : index
      %c0_12 = arith.constant 0 : index
      %13 = vector.load %arg7[%c0_11, %c0_12] : memref<16x384xf32, #tpu.memory_space<vmem>>, vector<16x384xf32>
      tpu.vector_store %arg7[%c0_11, %c0_12], %12 {strides = array<i32>} : memref<16x384xf32, #tpu.memory_space<vmem>>, vector<16x384xf32>,
    } else {
    }
    %c0 = arith.constant 0 : index
    %c0_1 = arith.constant 0 : index
    %3 = vector.load %arg7[%c0, %c0_1] : memref<16x384xf32, #tpu.memory_space<vmem>>, vector<16x384xf32>
    %c0_2 = arith.constant 0 : index
    %c0_3 = arith.constant 0 : index
    %4 = vector.load %arg3[%c0_2, %c0_3] : memref<16x128xbf16, #tpu.memory_space<vmem>>, vector<16x128xbf16>
    %c0_4 = arith.constant 0 : index
    %c0_5 = arith.constant 0 : index
    %5 = vector.load %arg4[%c0_4, %c0_5] : memref<128x384xbf16, #tpu.memory_space<vmem>>, vector<128x384xbf16>
    %cst = arith.constant dense<0.000000e+00> : vector<16x384xf32>
    %6 = tpu.matmul %4, %5, %cst {dimension_numbers = #tpu.dot_dimension_numbers<[1], [0], [0], [1], [0, 0, 1, 1], [], []>} : vector<16x128xbf16>, vector<128x384xbf16>, vector<16x384xf32> -> vector<16x384xf32>
    %7 = arith.addf %3, %6 : vector<16x384xf32>
    %c0_6 = arith.constant 0 : index
    %c0_7 = arith.constant 0 : index
    %8 = vector.load %arg7[%c0_6, %c0_7] : memref<16x384xf32, #tpu.memory_space<vmem>>, vector<16x384xf32>
    tpu.vector_store %arg7[%c0_6, %c0_7], %7 {strides = array<i32>} : memref<16x384xf32, #tpu.memory_space<vmem>>, vector<16x384xf32>,
    %c0_i32_8 = arith.constant 0 : i32
    %9 = arith.cmpi eq, %arg2, %c0_i32_8 : i32
    %10 = arith.extui %9 : i1 to i32
    %c0_i32_9 = arith.constant 0 : i32
    %11 = arith.cmpi ne, %10, %c0_i32_9 : i32
    scf.if %11 {
      %c0_10 = arith.constant 0 : index
      %c0_11 = arith.constant 0 : index
      %12 = vector.load %arg7[%c0_10, %c0_11] : memref<16x384xf32, #tpu.memory_space<vmem>>, vector<16x384xf32>
      %c0_12 = arith.constant 0 : index
      %c0_13 = arith.constant 0 : index
      %13 = vector.load %arg5[%c0_12, %c0_13] : memref<1x384xf32, #tpu.memory_space<vmem>>, vector<1x384xf32>
      %14 = vector.broadcast %13 : vector<1x384xf32> to vector<16x384xf32>
      %15 = arith.addf %12, %14 : vector<16x384xf32>
      %16 = arith.truncf %15 : vector<16x384xf32> to vector<16x384xbf16>
      %c0_14 = arith.constant 0 : index
      %c0_15 = arith.constant 0 : index
      %17 = vector.load %arg6[%c0_14, %c0_15] : memref<16x384xbf16, #tpu.memory_space<vmem>>, vector<16x384xbf16>
      tpu.vector_store %arg6[%c0_14, %c0_15], %16 {strides = array<i32>} : memref<16x384xbf16, #tpu.memory_space<vmem>>, vector<16x384xbf16>,
    } else {
    }
    return
  }
  func.func @transform_0(%arg0: i32, %arg1: i32, %arg2: i32) -> (i32, i32) {
    %c0_i32 = arith.constant 0 : i32
    return %arg0, %arg2 : i32, i32
  }
  func.func @transform_1(%arg0: i32, %arg1: i32, %arg2: i32) -> (i32, i32) {
    %c0_i32 = arith.constant 0 : i32
    return %arg2, %arg1 : i32, i32
  }
  func.func @transform_2(%arg0: i32, %arg1: i32, %arg2: i32) -> (i32, i32) {
    %c0_i32 = arith.constant 0 : i32
    %c0_i32_0 = arith.constant 0 : i32
    return %c0_i32, %arg1 : i32, i32
  }
  func.func @transform_3(%arg0: i32, %arg1: i32, %arg2: i32) -> (i32, i32) {
    %c0_i32 = arith.constant 0 : i32
    return %arg0, %arg1 : i32, i32
  }
}

module attributes {stable_mosaic.version = 11 : i64} {
  func.func @_linear_add_ln_kernel(%arg0: i32, %arg1: i32, %arg2: i32, %arg3: memref<16x128xbf16, #tpu.memory_space<vmem>>, %arg4: memref<128x128xbf16, #tpu.memory_space<vmem>>, %arg5: memref<1x128xf32, #tpu.memory_space<vmem>>, %arg6: memref<16x128xbf16, #tpu.memory_space<vmem>>, %arg7: memref<1x128xf32, #tpu.memory_space<vmem>>, %arg8: memref<1x128xf32, #tpu.memory_space<vmem>>, %arg9: memref<16x128xbf16, #tpu.memory_space<vmem>>, %arg10: memref<16x128xf32, #tpu.memory_space<vmem>>) attributes {dimension_semantics = [#tpu.dimension_semantics<parallel>, #tpu.dimension_semantics<parallel>, #tpu.dimension_semantics<arbitrary>], iteration_bounds = array<i64: 1, 1, 1>, scalar_prefetch = 0 : i64, scratch_operands = 1 : i64, tpu.core_type = #tpu.core_type<tc>, window_params = [{transform_indices = @transform_0, window_bounds = array<i64: 16, 128>}, {transform_indices = @transform_1, window_bounds = array<i64: 128, 128>}, {transform_indices = @transform_2, window_bounds = array<i64: 1, 128>}, {transform_indices = @transform_3, window_bounds = array<i64: 16, 128>}, {transform_indices = @transform_4, window_bounds = array<i64: 1, 128>}, {transform_indices = @transform_5, window_bounds = array<i64: 1, 128>}, {transform_indices = @transform_6, window_bounds = array<i64: 16, 128>}]} {
    %c0_i32 = arith.constant 0 : i32
    %0 = arith.cmpi eq, %arg2, %c0_i32 : i32
    %1 = arith.extui %0 : i1 to i32
    %c0_i32_0 = arith.constant 0 : i32
    %2 = arith.cmpi ne, %1, %c0_i32_0 : i32
    scf.if %2 {
      %cst_10 = arith.constant 0.000000e+00 : f32
      %12 = vector.broadcast %cst_10 : f32 to vector<16x128xf32>
      %c0_11 = arith.constant 0 : index
      %c0_12 = arith.constant 0 : index
      %13 = vector.load %arg10[%c0_11, %c0_12] : memref<16x128xf32, #tpu.memory_space<vmem>>, vector<16x128xf32>
      tpu.vector_store %arg10[%c0_11, %c0_12], %12 {strides = array<i32>} : memref<16x128xf32, #tpu.memory_space<vmem>>, vector<16x128xf32>,
    } else {
    }
    %c0 = arith.constant 0 : index
    %c0_1 = arith.constant 0 : index
    %3 = vector.load %arg10[%c0, %c0_1] : memref<16x128xf32, #tpu.memory_space<vmem>>, vector<16x128xf32>
    %c0_2 = arith.constant 0 : index
    %c0_3 = arith.constant 0 : index
    %4 = vector.load %arg3[%c0_2, %c0_3] : memref<16x128xbf16, #tpu.memory_space<vmem>>, vector<16x128xbf16>
    %c0_4 = arith.constant 0 : index
    %c0_5 = arith.constant 0 : index
    %5 = vector.load %arg4[%c0_4, %c0_5] : memref<128x128xbf16, #tpu.memory_space<vmem>>, vector<128x128xbf16>
    %cst = arith.constant dense<0.000000e+00> : vector<16x128xf32>
    %6 = tpu.matmul %4, %5, %cst {dimension_numbers = #tpu.dot_dimension_numbers<[1], [0], [0], [1], [0, 0, 1, 1], [], []>} : vector<16x128xbf16>, vector<128x128xbf16>, vector<16x128xf32> -> vector<16x128xf32>
    %7 = arith.addf %3, %6 : vector<16x128xf32>
    %c0_6 = arith.constant 0 : index
    %c0_7 = arith.constant 0 : index
    %8 = vector.load %arg10[%c0_6, %c0_7] : memref<16x128xf32, #tpu.memory_space<vmem>>, vector<16x128xf32>
    tpu.vector_store %arg10[%c0_6, %c0_7], %7 {strides = array<i32>} : memref<16x128xf32, #tpu.memory_space<vmem>>, vector<16x128xf32>,
    %c0_i32_8 = arith.constant 0 : i32
    %9 = arith.cmpi eq, %arg2, %c0_i32_8 : i32
    %10 = arith.extui %9 : i1 to i32
    %c0_i32_9 = arith.constant 0 : i32
    %11 = arith.cmpi ne, %10, %c0_i32_9 : i32
    scf.if %11 {
      %c0_10 = arith.constant 0 : index
      %c0_11 = arith.constant 0 : index
      %12 = vector.load %arg10[%c0_10, %c0_11] : memref<16x128xf32, #tpu.memory_space<vmem>>, vector<16x128xf32>
      %c0_12 = arith.constant 0 : index
      %c0_13 = arith.constant 0 : index
      %13 = vector.load %arg5[%c0_12, %c0_13] : memref<1x128xf32, #tpu.memory_space<vmem>>, vector<1x128xf32>
      %14 = vector.broadcast %13 : vector<1x128xf32> to vector<16x128xf32>
      %15 = arith.addf %12, %14 : vector<16x128xf32>
      %c0_14 = arith.constant 0 : index
      %c0_15 = arith.constant 0 : index
      %16 = vector.load %arg6[%c0_14, %c0_15] : memref<16x128xbf16, #tpu.memory_space<vmem>>, vector<16x128xbf16>
      %17 = arith.extf %16 : vector<16x128xbf16> to vector<16x128xf32>
      %18 = arith.addf %15, %17 : vector<16x128xf32>
      %cst_16 = arith.constant dense<0.000000e+00> : vector<16xf32>
      %19 = vector.multi_reduction <add>, %18, %cst_16 [1] : vector<16x128xf32> to vector<16xf32>
      %20 = vector.shape_cast %19 : vector<16xf32> to vector<16x1xf32>
      %cst_17 = arith.constant 3.125000e-02 : f32
      %21 = vector.broadcast %cst_17 : f32 to vector<16x1xf32>
      %22 = arith.mulf %20, %21 : vector<16x1xf32>
      %23 = arith.mulf %18, %18 : vector<16x128xf32>
      %cst_18 = arith.constant dense<0.000000e+00> : vector<16xf32>
      %24 = vector.multi_reduction <add>, %23, %cst_18 [1] : vector<16x128xf32> to vector<16xf32>
      %25 = vector.shape_cast %24 : vector<16xf32> to vector<16x1xf32>
      %cst_19 = arith.constant 3.125000e-02 : f32
      %26 = vector.broadcast %cst_19 : f32 to vector<16x1xf32>
      %27 = arith.mulf %25, %26 : vector<16x1xf32>
      %28 = arith.mulf %22, %22 : vector<16x1xf32>
      %29 = arith.subf %27, %28 : vector<16x1xf32>
      %cst_20 = arith.constant 0.000000e+00 : f32
      %30 = vector.broadcast %cst_20 : f32 to vector<16x1xf32>
      %31 = arith.maximumf %29, %30 : vector<16x1xf32>
      %32 = vector.broadcast %22 : vector<16x1xf32> to vector<16x128xf32>
      %33 = arith.subf %18, %32 : vector<16x128xf32>
      %cst_21 = arith.constant 9.99999974E-6 : f32
      %34 = vector.broadcast %cst_21 : f32 to vector<16x1xf32>
      %35 = arith.addf %31, %34 : vector<16x1xf32>
      %36 = math.rsqrt %35 : vector<16x1xf32>
      %37 = vector.broadcast %36 : vector<16x1xf32> to vector<16x128xf32>
      %38 = arith.mulf %33, %37 : vector<16x128xf32>
      %c0_22 = arith.constant 0 : index
      %c0_23 = arith.constant 0 : index
      %39 = vector.load %arg7[%c0_22, %c0_23] : memref<1x128xf32, #tpu.memory_space<vmem>>, vector<1x128xf32>
      %40 = vector.broadcast %39 : vector<1x128xf32> to vector<16x128xf32>
      %41 = arith.mulf %38, %40 : vector<16x128xf32>
      %c0_24 = arith.constant 0 : index
      %c0_25 = arith.constant 0 : index
      %42 = vector.load %arg8[%c0_24, %c0_25] : memref<1x128xf32, #tpu.memory_space<vmem>>, vector<1x128xf32>
      %43 = vector.broadcast %42 : vector<1x128xf32> to vector<16x128xf32>
      %44 = arith.addf %41, %43 : vector<16x128xf32>
      %45 = arith.truncf %44 : vector<16x128xf32> to vector<16x128xbf16>
      %c0_26 = arith.constant 0 : index
      %c0_27 = arith.constant 0 : index
      %46 = vector.load %arg9[%c0_26, %c0_27] : memref<16x128xbf16, #tpu.memory_space<vmem>>, vector<16x128xbf16>
      tpu.vector_store %arg9[%c0_26, %c0_27], %45 {strides = array<i32>} : memref<16x128xbf16, #tpu.memory_space<vmem>>, vector<16x128xbf16>,
    } else {
    }
    return
  }
  func.func @transform_0(%arg0: i32, %arg1: i32, %arg2: i32) -> (i32, i32) {
    %c0_i32 = arith.constant 0 : i32
    return %arg0, %arg2 : i32, i32
  }
  func.func @transform_1(%arg0: i32, %arg1: i32, %arg2: i32) -> (i32, i32) {
    %c0_i32 = arith.constant 0 : i32
    return %arg2, %arg1 : i32, i32
  }
  func.func @transform_2(%arg0: i32, %arg1: i32, %arg2: i32) -> (i32, i32) {
    %c0_i32 = arith.constant 0 : i32
    %c0_i32_0 = arith.constant 0 : i32
    return %c0_i32, %arg1 : i32, i32
  }
  func.func @transform_3(%arg0: i32, %arg1: i32, %arg2: i32) -> (i32, i32) {
    %c0_i32 = arith.constant 0 : i32
    return %arg0, %arg1 : i32, i32
  }
  func.func @transform_4(%arg0: i32, %arg1: i32, %arg2: i32) -> (i32, i32) {
    %c0_i32 = arith.constant 0 : i32
    %c0_i32_0 = arith.constant 0 : i32
    return %c0_i32, %arg1 : i32, i32
  }
  func.func @transform_5(%arg0: i32, %arg1: i32, %arg2: i32) -> (i32, i32) {
    %c0_i32 = arith.constant 0 : i32
    %c0_i32_0 = arith.constant 0 : i32
    return %c0_i32, %arg1 : i32, i32
  }
  func.func @transform_6(%arg0: i32, %arg1: i32, %arg2: i32) -> (i32, i32) {
    %c0_i32 = arith.constant 0 : i32
    return %arg0, %arg1 : i32, i32
  }
}

module attributes {stable_mosaic.version = 11 : i64} {
  func.func @_linear_kernel(%arg0: i32, %arg1: i32, %arg2: i32, %arg3: memref<16x128xbf16, #tpu.memory_space<vmem>>, %arg4: memref<128x128xbf16, #tpu.memory_space<vmem>>, %arg5: memref<1x128xf32, #tpu.memory_space<vmem>>, %arg6: memref<16x128xbf16, #tpu.memory_space<vmem>>, %arg7: memref<16x128xf32, #tpu.memory_space<vmem>>) attributes {dimension_semantics = [#tpu.dimension_semantics<parallel>, #tpu.dimension_semantics<parallel>, #tpu.dimension_semantics<arbitrary>], iteration_bounds = array<i64: 1, 1, 1>, scalar_prefetch = 0 : i64, scratch_operands = 1 : i64, tpu.core_type = #tpu.core_type<tc>, window_params = [{transform_indices = @transform_0, window_bounds = array<i64: 16, 128>}, {transform_indices = @transform_1, window_bounds = array<i64: 128, 128>}, {transform_indices = @transform_2, window_bounds = array<i64: 1, 128>}, {transform_indices = @transform_3, window_bounds = array<i64: 16, 128>}]} {
    %c0_i32 = arith.constant 0 : i32
    %0 = arith.cmpi eq, %arg2, %c0_i32 : i32
    %1 = arith.extui %0 : i1 to i32
    %c0_i32_0 = arith.constant 0 : i32
    %2 = arith.cmpi ne, %1, %c0_i32_0 : i32
    scf.if %2 {
      %cst_10 = arith.constant 0.000000e+00 : f32
      %12 = vector.broadcast %cst_10 : f32 to vector<16x128xf32>
      %c0_11 = arith.constant 0 : index
      %c0_12 = arith.constant 0 : index
      %13 = vector.load %arg7[%c0_11, %c0_12] : memref<16x128xf32, #tpu.memory_space<vmem>>, vector<16x128xf32>
      tpu.vector_store %arg7[%c0_11, %c0_12], %12 {strides = array<i32>} : memref<16x128xf32, #tpu.memory_space<vmem>>, vector<16x128xf32>,
    } else {
    }
    %c0 = arith.constant 0 : index
    %c0_1 = arith.constant 0 : index
    %3 = vector.load %arg7[%c0, %c0_1] : memref<16x128xf32, #tpu.memory_space<vmem>>, vector<16x128xf32>
    %c0_2 = arith.constant 0 : index
    %c0_3 = arith.constant 0 : index
    %4 = vector.load %arg3[%c0_2, %c0_3] : memref<16x128xbf16, #tpu.memory_space<vmem>>, vector<16x128xbf16>
    %c0_4 = arith.constant 0 : index
    %c0_5 = arith.constant 0 : index
    %5 = vector.load %arg4[%c0_4, %c0_5] : memref<128x128xbf16, #tpu.memory_space<vmem>>, vector<128x128xbf16>
    %cst = arith.constant dense<0.000000e+00> : vector<16x128xf32>
    %6 = tpu.matmul %4, %5, %cst {dimension_numbers = #tpu.dot_dimension_numbers<[1], [0], [0], [1], [0, 0, 1, 1], [], []>} : vector<16x128xbf16>, vector<128x128xbf16>, vector<16x128xf32> -> vector<16x128xf32>
    %7 = arith.addf %3, %6 : vector<16x128xf32>
    %c0_6 = arith.constant 0 : index
    %c0_7 = arith.constant 0 : index
    %8 = vector.load %arg7[%c0_6, %c0_7] : memref<16x128xf32, #tpu.memory_space<vmem>>, vector<16x128xf32>
    tpu.vector_store %arg7[%c0_6, %c0_7], %7 {strides = array<i32>} : memref<16x128xf32, #tpu.memory_space<vmem>>, vector<16x128xf32>,
    %c0_i32_8 = arith.constant 0 : i32
    %9 = arith.cmpi eq, %arg2, %c0_i32_8 : i32
    %10 = arith.extui %9 : i1 to i32
    %c0_i32_9 = arith.constant 0 : i32
    %11 = arith.cmpi ne, %10, %c0_i32_9 : i32
    scf.if %11 {
      %c0_10 = arith.constant 0 : index
      %c0_11 = arith.constant 0 : index
      %12 = vector.load %arg7[%c0_10, %c0_11] : memref<16x128xf32, #tpu.memory_space<vmem>>, vector<16x128xf32>
      %c0_12 = arith.constant 0 : index
      %c0_13 = arith.constant 0 : index
      %13 = vector.load %arg5[%c0_12, %c0_13] : memref<1x128xf32, #tpu.memory_space<vmem>>, vector<1x128xf32>
      %14 = vector.broadcast %13 : vector<1x128xf32> to vector<16x128xf32>
      %15 = arith.addf %12, %14 : vector<16x128xf32>
      %16 = arith.truncf %15 : vector<16x128xf32> to vector<16x128xbf16>
      %c0_14 = arith.constant 0 : index
      %c0_15 = arith.constant 0 : index
      %17 = vector.load %arg6[%c0_14, %c0_15] : memref<16x128xbf16, #tpu.memory_space<vmem>>, vector<16x128xbf16>
      tpu.vector_store %arg6[%c0_14, %c0_15], %16 {strides = array<i32>} : memref<16x128xbf16, #tpu.memory_space<vmem>>, vector<16x128xbf16>,
    } else {
    }
    return
  }
  func.func @transform_0(%arg0: i32, %arg1: i32, %arg2: i32) -> (i32, i32) {
    %c0_i32 = arith.constant 0 : i32
    return %arg0, %arg2 : i32, i32
  }
  func.func @transform_1(%arg0: i32, %arg1: i32, %arg2: i32) -> (i32, i32) {
    %c0_i32 = arith.constant 0 : i32
    return %arg2, %arg1 : i32, i32
  }
  func.func @transform_2(%arg0: i32, %arg1: i32, %arg2: i32) -> (i32, i32) {
    %c0_i32 = arith.constant 0 : i32
    %c0_i32_0 = arith.constant 0 : i32
    return %c0_i32, %arg1 : i32, i32
  }
  func.func @transform_3(%arg0: i32, %arg1: i32, %arg2: i32) -> (i32, i32) {
    %c0_i32 = arith.constant 0 : i32
    return %arg0, %arg1 : i32, i32
  }
}

module attributes {stable_mosaic.version = 11 : i64} {
  func.func @_attn_self_kernel(%arg0: i32, %arg1: memref<1x8x384xbf16, #tpu.memory_space<vmem>>, %arg2: memref<1x1x8xf32, #tpu.memory_space<vmem>>, %arg3: memref<1x8x128xbf16, #tpu.memory_space<vmem>>) attributes {dimension_semantics = [#tpu.dimension_semantics<parallel>], iteration_bounds = array<i64: 2>, scalar_prefetch = 0 : i64, scratch_operands = 0 : i64, tpu.core_type = #tpu.core_type<tc>, window_params = [{transform_indices = @transform_0, window_bounds = array<i64: 1, 8, 384>}, {transform_indices = @transform_1, window_bounds = array<i64: 1, 1, 8>}, {transform_indices = @transform_2, window_bounds = array<i64: 1, 8, 128>}]} {
    %c0 = arith.constant 0 : index
    %c0_0 = arith.constant 0 : index
    %c0_1 = arith.constant 0 : index
    %0 = vector.load %arg1[%c0, %c0_0, %c0_1] : memref<1x8x384xbf16, #tpu.memory_space<vmem>>, vector<1x8x384xbf16>
    %1 = vector.shape_cast %0 : vector<1x8x384xbf16> to vector<8x384xbf16>
    %2 = vector.extract_strided_slice %1 {offsets = [0, 0], sizes = [8, 128], strides = [1, 1]} : vector<8x384xbf16> to vector<8x128xbf16>
    %3 = vector.extract_strided_slice %1 {offsets = [0, 128], sizes = [8, 128], strides = [1, 1]} : vector<8x384xbf16> to vector<8x128xbf16>
    %4 = vector.extract_strided_slice %1 {offsets = [0, 256], sizes = [8, 128], strides = [1, 1]} : vector<8x384xbf16> to vector<8x128xbf16>
    %c0_2 = arith.constant 0 : index
    %c0_3 = arith.constant 0 : index
    %c0_4 = arith.constant 0 : index
    %5 = vector.load %arg2[%c0_2, %c0_3, %c0_4] : memref<1x1x8xf32, #tpu.memory_space<vmem>>, vector<1x1x8xf32>
    %6 = vector.shape_cast %5 : vector<1x1x8xf32> to vector<1x8xf32>
    %7 = tpu.iota {dimensions = array<i32: 1>} : vector<1x128xi32>
    %8 = tpu.iota {dimensions = array<i32: 0>} : vector<8x8xi32>
    %9 = tpu.iota {dimensions = array<i32: 1>} : vector<8x8xi32>
    %cst = arith.constant 0.000000e+00 : f32
    %10 = vector.broadcast %cst : f32 to vector<8x128xf32>
    %c0_i32 = arith.constant 0 : i32
    %11 = vector.broadcast %c0_i32 : i32 to vector<1x128xi32>
    %12 = arith.cmpi sge, %7, %11 : vector<1x128xi32>
    %c8_i32 = arith.constant 8 : i32
    %13 = vector.broadcast %c8_i32 : i32 to vector<1x128xi32>
    %14 = arith.cmpi slt, %7, %13 : vector<1x128xi32>
    %15 = arith.andi %12, %14 : vector<1x128xi1>
    %cst_5 = arith.constant 0.000000e+00 : bf16
    %16 = vector.broadcast %cst_5 : bf16 to vector<8x128xbf16>
    %17 = vector.shape_cast %15 : vector<1x128xi1> to vector<1x128xi1>
    %18 = vector.broadcast %17 : vector<1x128xi1> to vector<8x128xi1>
    %19 = arith.select %18, %2, %16 : vector<8x128xi1>, vector<8x128xbf16>
    %cst_6 = arith.constant dense<0.000000e+00> : vector<8x8xf32>
    %20 = tpu.matmul %19, %3, %cst_6 {dimension_numbers = #tpu.dot_dimension_numbers<[1], [1], [0], [0], [0, 0, 1, 0], [], []>} : vector<8x128xbf16>, vector<8x128xbf16>, vector<8x8xf32> -> vector<8x8xf32>
    %21 = vector.broadcast %6 : vector<1x8xf32> to vector<8x8xf32>
    %22 = arith.addf %20, %21 : vector<8x8xf32>
    %23 = arith.cmpi sgt, %9, %8 : vector<8x8xi32>
    %cst_7 = arith.constant -1.000000e+09 : f32
    %24 = vector.broadcast %cst_7 : f32 to vector<8x8xf32>
    %25 = arith.select %23, %24, %22 : vector<8x8xi1>, vector<8x8xf32>
    %cst_8 = arith.constant dense<0xFF800000> : vector<8xf32>
    %26 = vector.multi_reduction <maximumf>, %25, %cst_8 [1] : vector<8x8xf32> to vector<8xf32>
    %27 = vector.shape_cast %26 : vector<8xf32> to vector<8x1xf32>
    %28 = vector.broadcast %27 : vector<8x1xf32> to vector<8x8xf32>
    %29 = arith.subf %25, %28 : vector<8x8xf32>
    %30 = math.exp %29 : vector<8x8xf32>
    %cst_9 = arith.constant dense<0.000000e+00> : vector<8xf32>
    %31 = vector.multi_reduction <add>, %30, %cst_9 [1] : vector<8x8xf32> to vector<8xf32>
    %32 = vector.shape_cast %31 : vector<8xf32> to vector<8x1xf32>
    %33 = vector.broadcast %32 : vector<8x1xf32> to vector<8x8xf32>
    %34 = arith.divf %30, %33 : vector<8x8xf32>
    %35 = arith.truncf %34 : vector<8x8xf32> to vector<8x8xbf16>
    %cst_10 = arith.constant 0.000000e+00 : bf16
    %36 = vector.broadcast %cst_10 : bf16 to vector<8x128xbf16>
    %37 = vector.shape_cast %15 : vector<1x128xi1> to vector<1x128xi1>
    %38 = vector.broadcast %37 : vector<1x128xi1> to vector<8x128xi1>
    %39 = arith.select %38, %4, %36 : vector<8x128xi1>, vector<8x128xbf16>
    %cst_11 = arith.constant dense<0.000000e+00> : vector<8x128xf32>
    %40 = tpu.matmul %35, %39, %cst_11 {dimension_numbers = #tpu.dot_dimension_numbers<[1], [0], [0], [1], [0, 0, 1, 1], [], []>} : vector<8x8xbf16>, vector<8x128xbf16>, vector<8x128xf32> -> vector<8x128xf32>
    %41 = arith.addf %10, %40 : vector<8x128xf32>
    %c8_i32_12 = arith.constant 8 : i32
    %42 = vector.broadcast %c8_i32_12 : i32 to vector<1x128xi32>
    %43 = arith.cmpi sge, %7, %42 : vector<1x128xi32>
    %c16_i32 = arith.constant 16 : i32
    %44 = vector.broadcast %c16_i32 : i32 to vector<1x128xi32>
    %45 = arith.cmpi slt, %7, %44 : vector<1x128xi32>
    %46 = arith.andi %43, %45 : vector<1x128xi1>
    %cst_13 = arith.constant 0.000000e+00 : bf16
    %47 = vector.broadcast %cst_13 : bf16 to vector<8x128xbf16>
    %48 = vector.shape_cast %46 : vector<1x128xi1> to vector<1x128xi1>
    %49 = vector.broadcast %48 : vector<1x128xi1> to vector<8x128xi1>
    %50 = arith.select %49, %2, %47 : vector<8x128xi1>, vector<8x128xbf16>
    %cst_14 = arith.constant dense<0.000000e+00> : vector<8x8xf32>
    %51 = tpu.matmul %50, %3, %cst_14 {dimension_numbers = #tpu.dot_dimension_numbers<[1], [1], [0], [0], [0, 0, 1, 0], [], []>} : vector<8x128xbf16>, vector<8x128xbf16>, vector<8x8xf32> -> vector<8x8xf32>
    %52 = vector.broadcast %6 : vector<1x8xf32> to vector<8x8xf32>
    %53 = arith.addf %51, %52 : vector<8x8xf32>
    %54 = arith.cmpi sgt, %9, %8 : vector<8x8xi32>
    %cst_15 = arith.constant -1.000000e+09 : f32
    %55 = vector.broadcast %cst_15 : f32 to vector<8x8xf32>
    %56 = arith.select %54, %55, %53 : vector<8x8xi1>, vector<8x8xf32>
    %cst_16 = arith.constant dense<0xFF800000> : vector<8xf32>
    %57 = vector.multi_reduction <maximumf>, %56, %cst_16 [1] : vector<8x8xf32> to vector<8xf32>
    %58 = vector.shape_cast %57 : vector<8xf32> to vector<8x1xf32>
    %59 = vector.broadcast %58 : vector<8x1xf32> to vector<8x8xf32>
    %60 = arith.subf %56, %59 : vector<8x8xf32>
    %61 = math.exp %60 : vector<8x8xf32>
    %cst_17 = arith.constant dense<0.000000e+00> : vector<8xf32>
    %62 = vector.multi_reduction <add>, %61, %cst_17 [1] : vector<8x8xf32> to vector<8xf32>
    %63 = vector.shape_cast %62 : vector<8xf32> to vector<8x1xf32>
    %64 = vector.broadcast %63 : vector<8x1xf32> to vector<8x8xf32>
    %65 = arith.divf %61, %64 : vector<8x8xf32>
    %66 = arith.truncf %65 : vector<8x8xf32> to vector<8x8xbf16>
    %cst_18 = arith.constant 0.000000e+00 : bf16
    %67 = vector.broadcast %cst_18 : bf16 to vector<8x128xbf16>
    %68 = vector.shape_cast %46 : vector<1x128xi1> to vector<1x128xi1>
    %69 = vector.broadcast %68 : vector<1x128xi1> to vector<8x128xi1>
    %70 = arith.select %69, %4, %67 : vector<8x128xi1>, vector<8x128xbf16>
    %cst_19 = arith.constant dense<0.000000e+00> : vector<8x128xf32>
    %71 = tpu.matmul %66, %70, %cst_19 {dimension_numbers = #tpu.dot_dimension_numbers<[1], [0], [0], [1], [0, 0, 1, 1], [], []>} : vector<8x8xbf16>, vector<8x128xbf16>, vector<8x128xf32> -> vector<8x128xf32>
    %72 = arith.addf %41, %71 : vector<8x128xf32>
    %c16_i32_20 = arith.constant 16 : i32
    %73 = vector.broadcast %c16_i32_20 : i32 to vector<1x128xi32>
    %74 = arith.cmpi sge, %7, %73 : vector<1x128xi32>
    %c24_i32 = arith.constant 24 : i32
    %75 = vector.broadcast %c24_i32 : i32 to vector<1x128xi32>
    %76 = arith.cmpi slt, %7, %75 : vector<1x128xi32>
    %77 = arith.andi %74, %76 : vector<1x128xi1>
    %cst_21 = arith.constant 0.000000e+00 : bf16
    %78 = vector.broadcast %cst_21 : bf16 to vector<8x128xbf16>
    %79 = vector.shape_cast %77 : vector<1x128xi1> to vector<1x128xi1>
    %80 = vector.broadcast %79 : vector<1x128xi1> to vector<8x128xi1>
    %81 = arith.select %80, %2, %78 : vector<8x128xi1>, vector<8x128xbf16>
    %cst_22 = arith.constant dense<0.000000e+00> : vector<8x8xf32>
    %82 = tpu.matmul %81, %3, %cst_22 {dimension_numbers = #tpu.dot_dimension_numbers<[1], [1], [0], [0], [0, 0, 1, 0], [], []>} : vector<8x128xbf16>, vector<8x128xbf16>, vector<8x8xf32> -> vector<8x8xf32>
    %83 = vector.broadcast %6 : vector<1x8xf32> to vector<8x8xf32>
    %84 = arith.addf %82, %83 : vector<8x8xf32>
    %85 = arith.cmpi sgt, %9, %8 : vector<8x8xi32>
    %cst_23 = arith.constant -1.000000e+09 : f32
    %86 = vector.broadcast %cst_23 : f32 to vector<8x8xf32>
    %87 = arith.select %85, %86, %84 : vector<8x8xi1>, vector<8x8xf32>
    %cst_24 = arith.constant dense<0xFF800000> : vector<8xf32>
    %88 = vector.multi_reduction <maximumf>, %87, %cst_24 [1] : vector<8x8xf32> to vector<8xf32>
    %89 = vector.shape_cast %88 : vector<8xf32> to vector<8x1xf32>
    %90 = vector.broadcast %89 : vector<8x1xf32> to vector<8x8xf32>
    %91 = arith.subf %87, %90 : vector<8x8xf32>
    %92 = math.exp %91 : vector<8x8xf32>
    %cst_25 = arith.constant dense<0.000000e+00> : vector<8xf32>
    %93 = vector.multi_reduction <add>, %92, %cst_25 [1] : vector<8x8xf32> to vector<8xf32>
    %94 = vector.shape_cast %93 : vector<8xf32> to vector<8x1xf32>
    %95 = vector.broadcast %94 : vector<8x1xf32> to vector<8x8xf32>
    %96 = arith.divf %92, %95 : vector<8x8xf32>
    %97 = arith.truncf %96 : vector<8x8xf32> to vector<8x8xbf16>
    %cst_26 = arith.constant 0.000000e+00 : bf16
    %98 = vector.broadcast %cst_26 : bf16 to vector<8x128xbf16>
    %99 = vector.shape_cast %77 : vector<1x128xi1> to vector<1x128xi1>
    %100 = vector.broadcast %99 : vector<1x128xi1> to vector<8x128xi1>
    %101 = arith.select %100, %4, %98 : vector<8x128xi1>, vector<8x128xbf16>
    %cst_27 = arith.constant dense<0.000000e+00> : vector<8x128xf32>
    %102 = tpu.matmul %97, %101, %cst_27 {dimension_numbers = #tpu.dot_dimension_numbers<[1], [0], [0], [1], [0, 0, 1, 1], [], []>} : vector<8x8xbf16>, vector<8x128xbf16>, vector<8x128xf32> -> vector<8x128xf32>
    %103 = arith.addf %72, %102 : vector<8x128xf32>
    %c24_i32_28 = arith.constant 24 : i32
    %104 = vector.broadcast %c24_i32_28 : i32 to vector<1x128xi32>
    %105 = arith.cmpi sge, %7, %104 : vector<1x128xi32>
    %c32_i32 = arith.constant 32 : i32
    %106 = vector.broadcast %c32_i32 : i32 to vector<1x128xi32>
    %107 = arith.cmpi slt, %7, %106 : vector<1x128xi32>
    %108 = arith.andi %105, %107 : vector<1x128xi1>
    %cst_29 = arith.constant 0.000000e+00 : bf16
    %109 = vector.broadcast %cst_29 : bf16 to vector<8x128xbf16>
    %110 = vector.shape_cast %108 : vector<1x128xi1> to vector<1x128xi1>
    %111 = vector.broadcast %110 : vector<1x128xi1> to vector<8x128xi1>
    %112 = arith.select %111, %2, %109 : vector<8x128xi1>, vector<8x128xbf16>
    %cst_30 = arith.constant dense<0.000000e+00> : vector<8x8xf32>
    %113 = tpu.matmul %112, %3, %cst_30 {dimension_numbers = #tpu.dot_dimension_numbers<[1], [1], [0], [0], [0, 0, 1, 0], [], []>} : vector<8x128xbf16>, vector<8x128xbf16>, vector<8x8xf32> -> vector<8x8xf32>
    %114 = vector.broadcast %6 : vector<1x8xf32> to vector<8x8xf32>
    %115 = arith.addf %113, %114 : vector<8x8xf32>
    %116 = arith.cmpi sgt, %9, %8 : vector<8x8xi32>
    %cst_31 = arith.constant -1.000000e+09 : f32
    %117 = vector.broadcast %cst_31 : f32 to vector<8x8xf32>
    %118 = arith.select %116, %117, %115 : vector<8x8xi1>, vector<8x8xf32>
    %cst_32 = arith.constant dense<0xFF800000> : vector<8xf32>
    %119 = vector.multi_reduction <maximumf>, %118, %cst_32 [1] : vector<8x8xf32> to vector<8xf32>
    %120 = vector.shape_cast %119 : vector<8xf32> to vector<8x1xf32>
    %121 = vector.broadcast %120 : vector<8x1xf32> to vector<8x8xf32>
    %122 = arith.subf %118, %121 : vector<8x8xf32>
    %123 = math.exp %122 : vector<8x8xf32>
    %cst_33 = arith.constant dense<0.000000e+00> : vector<8xf32>
    %124 = vector.multi_reduction <add>, %123, %cst_33 [1] : vector<8x8xf32> to vector<8xf32>
    %125 = vector.shape_cast %124 : vector<8xf32> to vector<8x1xf32>
    %126 = vector.broadcast %125 : vector<8x1xf32> to vector<8x8xf32>
    %127 = arith.divf %123, %126 : vector<8x8xf32>
    %128 = arith.truncf %127 : vector<8x8xf32> to vector<8x8xbf16>
    %cst_34 = arith.constant 0.000000e+00 : bf16
    %129 = vector.broadcast %cst_34 : bf16 to vector<8x128xbf16>
    %130 = vector.shape_cast %108 : vector<1x128xi1> to vector<1x128xi1>
    %131 = vector.broadcast %130 : vector<1x128xi1> to vector<8x128xi1>
    %132 = arith.select %131, %4, %129 : vector<8x128xi1>, vector<8x128xbf16>
    %cst_35 = arith.constant dense<0.000000e+00> : vector<8x128xf32>
    %133 = tpu.matmul %128, %132, %cst_35 {dimension_numbers = #tpu.dot_dimension_numbers<[1], [0], [0], [1], [0, 0, 1, 1], [], []>} : vector<8x8xbf16>, vector<8x128xbf16>, vector<8x128xf32> -> vector<8x128xf32>
    %134 = arith.addf %103, %133 : vector<8x128xf32>
    %135 = arith.truncf %134 : vector<8x128xf32> to vector<8x128xbf16>
    %c0_36 = arith.constant 0 : index
    %c0_37 = arith.constant 0 : index
    %c0_38 = arith.constant 0 : index
    %136 = vector.load %arg3[%c0_36, %c0_37, %c0_38] : memref<1x8x128xbf16, #tpu.memory_space<vmem>>, vector<1x8x128xbf16>
    %137 = vector.shape_cast %136 : vector<1x8x128xbf16> to vector<8x128xbf16>
    %138 = vector.shape_cast %135 : vector<8x128xbf16> to vector<1x8x128xbf16>
    tpu.vector_store %arg3[%c0_36, %c0_37, %c0_38], %138 {strides = array<i32>} : memref<1x8x128xbf16, #tpu.memory_space<vmem>>, vector<1x8x128xbf16>,
    return
  }
  func.func @transform_0(%arg0: i32) -> (i32, i32, i32) {
    %c0_i32 = arith.constant 0 : i32
    %c0_i32_0 = arith.constant 0 : i32
    %c0_i32_1 = arith.constant 0 : i32
    return %arg0, %c0_i32, %c0_i32_0 : i32, i32, i32
  }
  func.func @transform_1(%arg0: i32) -> (i32, i32, i32) {
    %c0_i32 = arith.constant 0 : i32
    %c0_i32_0 = arith.constant 0 : i32
    %c0_i32_1 = arith.constant 0 : i32
    return %arg0, %c0_i32, %c0_i32_0 : i32, i32, i32
  }
  func.func @transform_2(%arg0: i32) -> (i32, i32, i32) {
    %c0_i32 = arith.constant 0 : i32
    %c0_i32_0 = arith.constant 0 : i32
    %c0_i32_1 = arith.constant 0 : i32
    return %arg0, %c0_i32, %c0_i32_0 : i32, i32, i32
  }
}

module attributes {stable_mosaic.version = 11 : i64} {
  func.func @_attn_cross_kernel(%arg0: i32, %arg1: memref<1x8x128xbf16, #tpu.memory_space<vmem>>, %arg2: memref<1x8x256xbf16, #tpu.memory_space<vmem>>, %arg3: memref<1x1x8xf32, #tpu.memory_space<vmem>>, %arg4: memref<1x8x128xbf16, #tpu.memory_space<vmem>>) attributes {dimension_semantics = [#tpu.dimension_semantics<parallel>], iteration_bounds = array<i64: 2>, scalar_prefetch = 0 : i64, scratch_operands = 0 : i64, tpu.core_type = #tpu.core_type<tc>, window_params = [{transform_indices = @transform_0, window_bounds = array<i64: 1, 8, 128>}, {transform_indices = @transform_1, window_bounds = array<i64: 1, 8, 256>}, {transform_indices = @transform_2, window_bounds = array<i64: 1, 1, 8>}, {transform_indices = @transform_3, window_bounds = array<i64: 1, 8, 128>}]} {
    %c0 = arith.constant 0 : index
    %c0_0 = arith.constant 0 : index
    %c0_1 = arith.constant 0 : index
    %0 = vector.load %arg1[%c0, %c0_0, %c0_1] : memref<1x8x128xbf16, #tpu.memory_space<vmem>>, vector<1x8x128xbf16>
    %1 = vector.shape_cast %0 : vector<1x8x128xbf16> to vector<8x128xbf16>
    %c0_2 = arith.constant 0 : index
    %c0_3 = arith.constant 0 : index
    %c0_4 = arith.constant 0 : index
    %2 = vector.load %arg2[%c0_2, %c0_3, %c0_4] : memref<1x8x256xbf16, #tpu.memory_space<vmem>>, vector<1x8x256xbf16>
    %3 = vector.shape_cast %2 : vector<1x8x256xbf16> to vector<8x256xbf16>
    %4 = vector.extract_strided_slice %3 {offsets = [0, 0], sizes = [8, 128], strides = [1, 1]} : vector<8x256xbf16> to vector<8x128xbf16>
    %5 = vector.extract_strided_slice %3 {offsets = [0, 128], sizes = [8, 128], strides = [1, 1]} : vector<8x256xbf16> to vector<8x128xbf16>
    %c0_5 = arith.constant 0 : index
    %c0_6 = arith.constant 0 : index
    %c0_7 = arith.constant 0 : index
    %6 = vector.load %arg3[%c0_5, %c0_6, %c0_7] : memref<1x1x8xf32, #tpu.memory_space<vmem>>, vector<1x1x8xf32>
    %7 = vector.shape_cast %6 : vector<1x1x8xf32> to vector<1x8xf32>
    %8 = tpu.iota {dimensions = array<i32: 1>} : vector<1x128xi32>
    %cst = arith.constant 0.000000e+00 : f32
    %9 = vector.broadcast %cst : f32 to vector<8x128xf32>
    %c0_i32 = arith.constant 0 : i32
    %10 = vector.broadcast %c0_i32 : i32 to vector<1x128xi32>
    %11 = arith.cmpi sge, %8, %10 : vector<1x128xi32>
    %c8_i32 = arith.constant 8 : i32
    %12 = vector.broadcast %c8_i32 : i32 to vector<1x128xi32>
    %13 = arith.cmpi slt, %8, %12 : vector<1x128xi32>
    %14 = arith.andi %11, %13 : vector<1x128xi1>
    %cst_8 = arith.constant 0.000000e+00 : bf16
    %15 = vector.broadcast %cst_8 : bf16 to vector<8x128xbf16>
    %16 = vector.shape_cast %14 : vector<1x128xi1> to vector<1x128xi1>
    %17 = vector.broadcast %16 : vector<1x128xi1> to vector<8x128xi1>
    %18 = arith.select %17, %1, %15 : vector<8x128xi1>, vector<8x128xbf16>
    %cst_9 = arith.constant dense<0.000000e+00> : vector<8x8xf32>
    %19 = tpu.matmul %18, %4, %cst_9 {dimension_numbers = #tpu.dot_dimension_numbers<[1], [1], [0], [0], [0, 0, 1, 0], [], []>} : vector<8x128xbf16>, vector<8x128xbf16>, vector<8x8xf32> -> vector<8x8xf32>
    %20 = vector.broadcast %7 : vector<1x8xf32> to vector<8x8xf32>
    %21 = arith.addf %19, %20 : vector<8x8xf32>
    %cst_10 = arith.constant dense<0xFF800000> : vector<8xf32>
    %22 = vector.multi_reduction <maximumf>, %21, %cst_10 [1] : vector<8x8xf32> to vector<8xf32>
    %23 = vector.shape_cast %22 : vector<8xf32> to vector<8x1xf32>
    %24 = vector.broadcast %23 : vector<8x1xf32> to vector<8x8xf32>
    %25 = arith.subf %21, %24 : vector<8x8xf32>
    %26 = math.exp %25 : vector<8x8xf32>
    %cst_11 = arith.constant dense<0.000000e+00> : vector<8xf32>
    %27 = vector.multi_reduction <add>, %26, %cst_11 [1] : vector<8x8xf32> to vector<8xf32>
    %28 = vector.shape_cast %27 : vector<8xf32> to vector<8x1xf32>
    %29 = vector.broadcast %28 : vector<8x1xf32> to vector<8x8xf32>
    %30 = arith.divf %26, %29 : vector<8x8xf32>
    %31 = arith.truncf %30 : vector<8x8xf32> to vector<8x8xbf16>
    %cst_12 = arith.constant 0.000000e+00 : bf16
    %32 = vector.broadcast %cst_12 : bf16 to vector<8x128xbf16>
    %33 = vector.shape_cast %14 : vector<1x128xi1> to vector<1x128xi1>
    %34 = vector.broadcast %33 : vector<1x128xi1> to vector<8x128xi1>
    %35 = arith.select %34, %5, %32 : vector<8x128xi1>, vector<8x128xbf16>
    %cst_13 = arith.constant dense<0.000000e+00> : vector<8x128xf32>
    %36 = tpu.matmul %31, %35, %cst_13 {dimension_numbers = #tpu.dot_dimension_numbers<[1], [0], [0], [1], [0, 0, 1, 1], [], []>} : vector<8x8xbf16>, vector<8x128xbf16>, vector<8x128xf32> -> vector<8x128xf32>
    %37 = arith.addf %9, %36 : vector<8x128xf32>
    %c8_i32_14 = arith.constant 8 : i32
    %38 = vector.broadcast %c8_i32_14 : i32 to vector<1x128xi32>
    %39 = arith.cmpi sge, %8, %38 : vector<1x128xi32>
    %c16_i32 = arith.constant 16 : i32
    %40 = vector.broadcast %c16_i32 : i32 to vector<1x128xi32>
    %41 = arith.cmpi slt, %8, %40 : vector<1x128xi32>
    %42 = arith.andi %39, %41 : vector<1x128xi1>
    %cst_15 = arith.constant 0.000000e+00 : bf16
    %43 = vector.broadcast %cst_15 : bf16 to vector<8x128xbf16>
    %44 = vector.shape_cast %42 : vector<1x128xi1> to vector<1x128xi1>
    %45 = vector.broadcast %44 : vector<1x128xi1> to vector<8x128xi1>
    %46 = arith.select %45, %1, %43 : vector<8x128xi1>, vector<8x128xbf16>
    %cst_16 = arith.constant dense<0.000000e+00> : vector<8x8xf32>
    %47 = tpu.matmul %46, %4, %cst_16 {dimension_numbers = #tpu.dot_dimension_numbers<[1], [1], [0], [0], [0, 0, 1, 0], [], []>} : vector<8x128xbf16>, vector<8x128xbf16>, vector<8x8xf32> -> vector<8x8xf32>
    %48 = vector.broadcast %7 : vector<1x8xf32> to vector<8x8xf32>
    %49 = arith.addf %47, %48 : vector<8x8xf32>
    %cst_17 = arith.constant dense<0xFF800000> : vector<8xf32>
    %50 = vector.multi_reduction <maximumf>, %49, %cst_17 [1] : vector<8x8xf32> to vector<8xf32>
    %51 = vector.shape_cast %50 : vector<8xf32> to vector<8x1xf32>
    %52 = vector.broadcast %51 : vector<8x1xf32> to vector<8x8xf32>
    %53 = arith.subf %49, %52 : vector<8x8xf32>
    %54 = math.exp %53 : vector<8x8xf32>
    %cst_18 = arith.constant dense<0.000000e+00> : vector<8xf32>
    %55 = vector.multi_reduction <add>, %54, %cst_18 [1] : vector<8x8xf32> to vector<8xf32>
    %56 = vector.shape_cast %55 : vector<8xf32> to vector<8x1xf32>
    %57 = vector.broadcast %56 : vector<8x1xf32> to vector<8x8xf32>
    %58 = arith.divf %54, %57 : vector<8x8xf32>
    %59 = arith.truncf %58 : vector<8x8xf32> to vector<8x8xbf16>
    %cst_19 = arith.constant 0.000000e+00 : bf16
    %60 = vector.broadcast %cst_19 : bf16 to vector<8x128xbf16>
    %61 = vector.shape_cast %42 : vector<1x128xi1> to vector<1x128xi1>
    %62 = vector.broadcast %61 : vector<1x128xi1> to vector<8x128xi1>
    %63 = arith.select %62, %5, %60 : vector<8x128xi1>, vector<8x128xbf16>
    %cst_20 = arith.constant dense<0.000000e+00> : vector<8x128xf32>
    %64 = tpu.matmul %59, %63, %cst_20 {dimension_numbers = #tpu.dot_dimension_numbers<[1], [0], [0], [1], [0, 0, 1, 1], [], []>} : vector<8x8xbf16>, vector<8x128xbf16>, vector<8x128xf32> -> vector<8x128xf32>
    %65 = arith.addf %37, %64 : vector<8x128xf32>
    %c16_i32_21 = arith.constant 16 : i32
    %66 = vector.broadcast %c16_i32_21 : i32 to vector<1x128xi32>
    %67 = arith.cmpi sge, %8, %66 : vector<1x128xi32>
    %c24_i32 = arith.constant 24 : i32
    %68 = vector.broadcast %c24_i32 : i32 to vector<1x128xi32>
    %69 = arith.cmpi slt, %8, %68 : vector<1x128xi32>
    %70 = arith.andi %67, %69 : vector<1x128xi1>
    %cst_22 = arith.constant 0.000000e+00 : bf16
    %71 = vector.broadcast %cst_22 : bf16 to vector<8x128xbf16>
    %72 = vector.shape_cast %70 : vector<1x128xi1> to vector<1x128xi1>
    %73 = vector.broadcast %72 : vector<1x128xi1> to vector<8x128xi1>
    %74 = arith.select %73, %1, %71 : vector<8x128xi1>, vector<8x128xbf16>
    %cst_23 = arith.constant dense<0.000000e+00> : vector<8x8xf32>
    %75 = tpu.matmul %74, %4, %cst_23 {dimension_numbers = #tpu.dot_dimension_numbers<[1], [1], [0], [0], [0, 0, 1, 0], [], []>} : vector<8x128xbf16>, vector<8x128xbf16>, vector<8x8xf32> -> vector<8x8xf32>
    %76 = vector.broadcast %7 : vector<1x8xf32> to vector<8x8xf32>
    %77 = arith.addf %75, %76 : vector<8x8xf32>
    %cst_24 = arith.constant dense<0xFF800000> : vector<8xf32>
    %78 = vector.multi_reduction <maximumf>, %77, %cst_24 [1] : vector<8x8xf32> to vector<8xf32>
    %79 = vector.shape_cast %78 : vector<8xf32> to vector<8x1xf32>
    %80 = vector.broadcast %79 : vector<8x1xf32> to vector<8x8xf32>
    %81 = arith.subf %77, %80 : vector<8x8xf32>
    %82 = math.exp %81 : vector<8x8xf32>
    %cst_25 = arith.constant dense<0.000000e+00> : vector<8xf32>
    %83 = vector.multi_reduction <add>, %82, %cst_25 [1] : vector<8x8xf32> to vector<8xf32>
    %84 = vector.shape_cast %83 : vector<8xf32> to vector<8x1xf32>
    %85 = vector.broadcast %84 : vector<8x1xf32> to vector<8x8xf32>
    %86 = arith.divf %82, %85 : vector<8x8xf32>
    %87 = arith.truncf %86 : vector<8x8xf32> to vector<8x8xbf16>
    %cst_26 = arith.constant 0.000000e+00 : bf16
    %88 = vector.broadcast %cst_26 : bf16 to vector<8x128xbf16>
    %89 = vector.shape_cast %70 : vector<1x128xi1> to vector<1x128xi1>
    %90 = vector.broadcast %89 : vector<1x128xi1> to vector<8x128xi1>
    %91 = arith.select %90, %5, %88 : vector<8x128xi1>, vector<8x128xbf16>
    %cst_27 = arith.constant dense<0.000000e+00> : vector<8x128xf32>
    %92 = tpu.matmul %87, %91, %cst_27 {dimension_numbers = #tpu.dot_dimension_numbers<[1], [0], [0], [1], [0, 0, 1, 1], [], []>} : vector<8x8xbf16>, vector<8x128xbf16>, vector<8x128xf32> -> vector<8x128xf32>
    %93 = arith.addf %65, %92 : vector<8x128xf32>
    %c24_i32_28 = arith.constant 24 : i32
    %94 = vector.broadcast %c24_i32_28 : i32 to vector<1x128xi32>
    %95 = arith.cmpi sge, %8, %94 : vector<1x128xi32>
    %c32_i32 = arith.constant 32 : i32
    %96 = vector.broadcast %c32_i32 : i32 to vector<1x128xi32>
    %97 = arith.cmpi slt, %8, %96 : vector<1x128xi32>
    %98 = arith.andi %95, %97 : vector<1x128xi1>
    %cst_29 = arith.constant 0.000000e+00 : bf16
    %99 = vector.broadcast %cst_29 : bf16 to vector<8x128xbf16>
    %100 = vector.shape_cast %98 : vector<1x128xi1> to vector<1x128xi1>
    %101 = vector.broadcast %100 : vector<1x128xi1> to vector<8x128xi1>
    %102 = arith.select %101, %1, %99 : vector<8x128xi1>, vector<8x128xbf16>
    %cst_30 = arith.constant dense<0.000000e+00> : vector<8x8xf32>
    %103 = tpu.matmul %102, %4, %cst_30 {dimension_numbers = #tpu.dot_dimension_numbers<[1], [1], [0], [0], [0, 0, 1, 0], [], []>} : vector<8x128xbf16>, vector<8x128xbf16>, vector<8x8xf32> -> vector<8x8xf32>
    %104 = vector.broadcast %7 : vector<1x8xf32> to vector<8x8xf32>
    %105 = arith.addf %103, %104 : vector<8x8xf32>
    %cst_31 = arith.constant dense<0xFF800000> : vector<8xf32>
    %106 = vector.multi_reduction <maximumf>, %105, %cst_31 [1] : vector<8x8xf32> to vector<8xf32>
    %107 = vector.shape_cast %106 : vector<8xf32> to vector<8x1xf32>
    %108 = vector.broadcast %107 : vector<8x1xf32> to vector<8x8xf32>
    %109 = arith.subf %105, %108 : vector<8x8xf32>
    %110 = math.exp %109 : vector<8x8xf32>
    %cst_32 = arith.constant dense<0.000000e+00> : vector<8xf32>
    %111 = vector.multi_reduction <add>, %110, %cst_32 [1] : vector<8x8xf32> to vector<8xf32>
    %112 = vector.shape_cast %111 : vector<8xf32> to vector<8x1xf32>
    %113 = vector.broadcast %112 : vector<8x1xf32> to vector<8x8xf32>
    %114 = arith.divf %110, %113 : vector<8x8xf32>
    %115 = arith.truncf %114 : vector<8x8xf32> to vector<8x8xbf16>
    %cst_33 = arith.constant 0.000000e+00 : bf16
    %116 = vector.broadcast %cst_33 : bf16 to vector<8x128xbf16>
    %117 = vector.shape_cast %98 : vector<1x128xi1> to vector<1x128xi1>
    %118 = vector.broadcast %117 : vector<1x128xi1> to vector<8x128xi1>
    %119 = arith.select %118, %5, %116 : vector<8x128xi1>, vector<8x128xbf16>
    %cst_34 = arith.constant dense<0.000000e+00> : vector<8x128xf32>
    %120 = tpu.matmul %115, %119, %cst_34 {dimension_numbers = #tpu.dot_dimension_numbers<[1], [0], [0], [1], [0, 0, 1, 1], [], []>} : vector<8x8xbf16>, vector<8x128xbf16>, vector<8x128xf32> -> vector<8x128xf32>
    %121 = arith.addf %93, %120 : vector<8x128xf32>
    %122 = arith.truncf %121 : vector<8x128xf32> to vector<8x128xbf16>
    %c0_35 = arith.constant 0 : index
    %c0_36 = arith.constant 0 : index
    %c0_37 = arith.constant 0 : index
    %123 = vector.load %arg4[%c0_35, %c0_36, %c0_37] : memref<1x8x128xbf16, #tpu.memory_space<vmem>>, vector<1x8x128xbf16>
    %124 = vector.shape_cast %123 : vector<1x8x128xbf16> to vector<8x128xbf16>
    %125 = vector.shape_cast %122 : vector<8x128xbf16> to vector<1x8x128xbf16>
    tpu.vector_store %arg4[%c0_35, %c0_36, %c0_37], %125 {strides = array<i32>} : memref<1x8x128xbf16, #tpu.memory_space<vmem>>, vector<1x8x128xbf16>,
    return
  }
  func.func @transform_0(%arg0: i32) -> (i32, i32, i32) {
    %c0_i32 = arith.constant 0 : i32
    %c0_i32_0 = arith.constant 0 : i32
    %c0_i32_1 = arith.constant 0 : i32
    return %arg0, %c0_i32, %c0_i32_0 : i32, i32, i32
  }
  func.func @transform_1(%arg0: i32) -> (i32, i32, i32) {
    %c0_i32 = arith.constant 0 : i32
    %c0_i32_0 = arith.constant 0 : i32
    %c0_i32_1 = arith.constant 0 : i32
    return %arg0, %c0_i32, %c0_i32_0 : i32, i32, i32
  }
  func.func @transform_2(%arg0: i32) -> (i32, i32, i32) {
    %c0_i32 = arith.constant 0 : i32
    %c0_i32_0 = arith.constant 0 : i32
    %c0_i32_1 = arith.constant 0 : i32
    return %arg0, %c0_i32, %c0_i32_0 : i32, i32, i32
  }
  func.func @transform_3(%arg0: i32) -> (i32, i32, i32) {
    %c0_i32 = arith.constant 0 : i32
    %c0_i32_0 = arith.constant 0 : i32
    %c0_i32_1 = arith.constant 0 : i32
    return %arg0, %c0_i32, %c0_i32_0 : i32, i32, i32
  }
}

module attributes {stable_mosaic.version = 11 : i64} {
  func.func @_linear_add_ln_kernel(%arg0: i32, %arg1: i32, %arg2: i32, %arg3: memref<16x128xbf16, #tpu.memory_space<vmem>>, %arg4: memref<128x128xbf16, #tpu.memory_space<vmem>>, %arg5: memref<1x128xf32, #tpu.memory_space<vmem>>, %arg6: memref<16x128xbf16, #tpu.memory_space<vmem>>, %arg7: memref<1x128xf32, #tpu.memory_space<vmem>>, %arg8: memref<1x128xf32, #tpu.memory_space<vmem>>, %arg9: memref<16x128xbf16, #tpu.memory_space<vmem>>, %arg10: memref<16x128xf32, #tpu.memory_space<vmem>>) attributes {dimension_semantics = [#tpu.dimension_semantics<parallel>, #tpu.dimension_semantics<parallel>, #tpu.dimension_semantics<arbitrary>], iteration_bounds = array<i64: 1, 1, 1>, scalar_prefetch = 0 : i64, scratch_operands = 1 : i64, tpu.core_type = #tpu.core_type<tc>, window_params = [{transform_indices = @transform_0, window_bounds = array<i64: 16, 128>}, {transform_indices = @transform_1, window_bounds = array<i64: 128, 128>}, {transform_indices = @transform_2, window_bounds = array<i64: 1, 128>}, {transform_indices = @transform_3, window_bounds = array<i64: 16, 128>}, {transform_indices = @transform_4, window_bounds = array<i64: 1, 128>}, {transform_indices = @transform_5, window_bounds = array<i64: 1, 128>}, {transform_indices = @transform_6, window_bounds = array<i64: 16, 128>}]} {
    %c0_i32 = arith.constant 0 : i32
    %0 = arith.cmpi eq, %arg2, %c0_i32 : i32
    %1 = arith.extui %0 : i1 to i32
    %c0_i32_0 = arith.constant 0 : i32
    %2 = arith.cmpi ne, %1, %c0_i32_0 : i32
    scf.if %2 {
      %cst_10 = arith.constant 0.000000e+00 : f32
      %12 = vector.broadcast %cst_10 : f32 to vector<16x128xf32>
      %c0_11 = arith.constant 0 : index
      %c0_12 = arith.constant 0 : index
      %13 = vector.load %arg10[%c0_11, %c0_12] : memref<16x128xf32, #tpu.memory_space<vmem>>, vector<16x128xf32>
      tpu.vector_store %arg10[%c0_11, %c0_12], %12 {strides = array<i32>} : memref<16x128xf32, #tpu.memory_space<vmem>>, vector<16x128xf32>,
    } else {
    }
    %c0 = arith.constant 0 : index
    %c0_1 = arith.constant 0 : index
    %3 = vector.load %arg10[%c0, %c0_1] : memref<16x128xf32, #tpu.memory_space<vmem>>, vector<16x128xf32>
    %c0_2 = arith.constant 0 : index
    %c0_3 = arith.constant 0 : index
    %4 = vector.load %arg3[%c0_2, %c0_3] : memref<16x128xbf16, #tpu.memory_space<vmem>>, vector<16x128xbf16>
    %c0_4 = arith.constant 0 : index
    %c0_5 = arith.constant 0 : index
    %5 = vector.load %arg4[%c0_4, %c0_5] : memref<128x128xbf16, #tpu.memory_space<vmem>>, vector<128x128xbf16>
    %cst = arith.constant dense<0.000000e+00> : vector<16x128xf32>
    %6 = tpu.matmul %4, %5, %cst {dimension_numbers = #tpu.dot_dimension_numbers<[1], [0], [0], [1], [0, 0, 1, 1], [], []>} : vector<16x128xbf16>, vector<128x128xbf16>, vector<16x128xf32> -> vector<16x128xf32>
    %7 = arith.addf %3, %6 : vector<16x128xf32>
    %c0_6 = arith.constant 0 : index
    %c0_7 = arith.constant 0 : index
    %8 = vector.load %arg10[%c0_6, %c0_7] : memref<16x128xf32, #tpu.memory_space<vmem>>, vector<16x128xf32>
    tpu.vector_store %arg10[%c0_6, %c0_7], %7 {strides = array<i32>} : memref<16x128xf32, #tpu.memory_space<vmem>>, vector<16x128xf32>,
    %c0_i32_8 = arith.constant 0 : i32
    %9 = arith.cmpi eq, %arg2, %c0_i32_8 : i32
    %10 = arith.extui %9 : i1 to i32
    %c0_i32_9 = arith.constant 0 : i32
    %11 = arith.cmpi ne, %10, %c0_i32_9 : i32
    scf.if %11 {
      %c0_10 = arith.constant 0 : index
      %c0_11 = arith.constant 0 : index
      %12 = vector.load %arg10[%c0_10, %c0_11] : memref<16x128xf32, #tpu.memory_space<vmem>>, vector<16x128xf32>
      %c0_12 = arith.constant 0 : index
      %c0_13 = arith.constant 0 : index
      %13 = vector.load %arg5[%c0_12, %c0_13] : memref<1x128xf32, #tpu.memory_space<vmem>>, vector<1x128xf32>
      %14 = vector.broadcast %13 : vector<1x128xf32> to vector<16x128xf32>
      %15 = arith.addf %12, %14 : vector<16x128xf32>
      %c0_14 = arith.constant 0 : index
      %c0_15 = arith.constant 0 : index
      %16 = vector.load %arg6[%c0_14, %c0_15] : memref<16x128xbf16, #tpu.memory_space<vmem>>, vector<16x128xbf16>
      %17 = arith.extf %16 : vector<16x128xbf16> to vector<16x128xf32>
      %18 = arith.addf %15, %17 : vector<16x128xf32>
      %cst_16 = arith.constant dense<0.000000e+00> : vector<16xf32>
      %19 = vector.multi_reduction <add>, %18, %cst_16 [1] : vector<16x128xf32> to vector<16xf32>
      %20 = vector.shape_cast %19 : vector<16xf32> to vector<16x1xf32>
      %cst_17 = arith.constant 3.125000e-02 : f32
      %21 = vector.broadcast %cst_17 : f32 to vector<16x1xf32>
      %22 = arith.mulf %20, %21 : vector<16x1xf32>
      %23 = arith.mulf %18, %18 : vector<16x128xf32>
      %cst_18 = arith.constant dense<0.000000e+00> : vector<16xf32>
      %24 = vector.multi_reduction <add>, %23, %cst_18 [1] : vector<16x128xf32> to vector<16xf32>
      %25 = vector.shape_cast %24 : vector<16xf32> to vector<16x1xf32>
      %cst_19 = arith.constant 3.125000e-02 : f32
      %26 = vector.broadcast %cst_19 : f32 to vector<16x1xf32>
      %27 = arith.mulf %25, %26 : vector<16x1xf32>
      %28 = arith.mulf %22, %22 : vector<16x1xf32>
      %29 = arith.subf %27, %28 : vector<16x1xf32>
      %cst_20 = arith.constant 0.000000e+00 : f32
      %30 = vector.broadcast %cst_20 : f32 to vector<16x1xf32>
      %31 = arith.maximumf %29, %30 : vector<16x1xf32>
      %32 = vector.broadcast %22 : vector<16x1xf32> to vector<16x128xf32>
      %33 = arith.subf %18, %32 : vector<16x128xf32>
      %cst_21 = arith.constant 9.99999974E-6 : f32
      %34 = vector.broadcast %cst_21 : f32 to vector<16x1xf32>
      %35 = arith.addf %31, %34 : vector<16x1xf32>
      %36 = math.rsqrt %35 : vector<16x1xf32>
      %37 = vector.broadcast %36 : vector<16x1xf32> to vector<16x128xf32>
      %38 = arith.mulf %33, %37 : vector<16x128xf32>
      %c0_22 = arith.constant 0 : index
      %c0_23 = arith.constant 0 : index
      %39 = vector.load %arg7[%c0_22, %c0_23] : memref<1x128xf32, #tpu.memory_space<vmem>>, vector<1x128xf32>
      %40 = vector.broadcast %39 : vector<1x128xf32> to vector<16x128xf32>
      %41 = arith.mulf %38, %40 : vector<16x128xf32>
      %c0_24 = arith.constant 0 : index
      %c0_25 = arith.constant 0 : index
      %42 = vector.load %arg8[%c0_24, %c0_25] : memref<1x128xf32, #tpu.memory_space<vmem>>, vector<1x128xf32>
      %43 = vector.broadcast %42 : vector<1x128xf32> to vector<16x128xf32>
      %44 = arith.addf %41, %43 : vector<16x128xf32>
      %45 = arith.truncf %44 : vector<16x128xf32> to vector<16x128xbf16>
      %c0_26 = arith.constant 0 : index
      %c0_27 = arith.constant 0 : index
      %46 = vector.load %arg9[%c0_26, %c0_27] : memref<16x128xbf16, #tpu.memory_space<vmem>>, vector<16x128xbf16>
      tpu.vector_store %arg9[%c0_26, %c0_27], %45 {strides = array<i32>} : memref<16x128xbf16, #tpu.memory_space<vmem>>, vector<16x128xbf16>,
    } else {
    }
    return
  }
  func.func @transform_0(%arg0: i32, %arg1: i32, %arg2: i32) -> (i32, i32) {
    %c0_i32 = arith.constant 0 : i32
    return %arg0, %arg2 : i32, i32
  }
  func.func @transform_1(%arg0: i32, %arg1: i32, %arg2: i32) -> (i32, i32) {
    %c0_i32 = arith.constant 0 : i32
    return %arg2, %arg1 : i32, i32
  }
  func.func @transform_2(%arg0: i32, %arg1: i32, %arg2: i32) -> (i32, i32) {
    %c0_i32 = arith.constant 0 : i32
    %c0_i32_0 = arith.constant 0 : i32
    return %c0_i32, %arg1 : i32, i32
  }
  func.func @transform_3(%arg0: i32, %arg1: i32, %arg2: i32) -> (i32, i32) {
    %c0_i32 = arith.constant 0 : i32
    return %arg0, %arg1 : i32, i32
  }
  func.func @transform_4(%arg0: i32, %arg1: i32, %arg2: i32) -> (i32, i32) {
    %c0_i32 = arith.constant 0 : i32
    %c0_i32_0 = arith.constant 0 : i32
    return %c0_i32, %arg1 : i32, i32
  }
  func.func @transform_5(%arg0: i32, %arg1: i32, %arg2: i32) -> (i32, i32) {
    %c0_i32 = arith.constant 0 : i32
    %c0_i32_0 = arith.constant 0 : i32
    return %c0_i32, %arg1 : i32, i32
  }
  func.func @transform_6(%arg0: i32, %arg1: i32, %arg2: i32) -> (i32, i32) {
    %c0_i32 = arith.constant 0 : i32
    return %arg0, %arg1 : i32, i32
  }
}

module attributes {stable_mosaic.version = 11 : i64} {
  func.func @_linear_kernel(%arg0: i32, %arg1: i32, %arg2: i32, %arg3: memref<16x128xbf16, #tpu.memory_space<vmem>>, %arg4: memref<128x512xbf16, #tpu.memory_space<vmem>>, %arg5: memref<1x512xf32, #tpu.memory_space<vmem>>, %arg6: memref<16x512xbf16, #tpu.memory_space<vmem>>, %arg7: memref<16x512xf32, #tpu.memory_space<vmem>>) attributes {dimension_semantics = [#tpu.dimension_semantics<parallel>, #tpu.dimension_semantics<parallel>, #tpu.dimension_semantics<arbitrary>], iteration_bounds = array<i64: 1, 2, 1>, scalar_prefetch = 0 : i64, scratch_operands = 1 : i64, tpu.core_type = #tpu.core_type<tc>, window_params = [{transform_indices = @transform_0, window_bounds = array<i64: 16, 128>}, {transform_indices = @transform_1, window_bounds = array<i64: 128, 512>}, {transform_indices = @transform_2, window_bounds = array<i64: 1, 512>}, {transform_indices = @transform_3, window_bounds = array<i64: 16, 512>}]} {
    %c0_i32 = arith.constant 0 : i32
    %0 = arith.cmpi eq, %arg2, %c0_i32 : i32
    %1 = arith.extui %0 : i1 to i32
    %c0_i32_0 = arith.constant 0 : i32
    %2 = arith.cmpi ne, %1, %c0_i32_0 : i32
    scf.if %2 {
      %cst_10 = arith.constant 0.000000e+00 : f32
      %12 = vector.broadcast %cst_10 : f32 to vector<16x512xf32>
      %c0_11 = arith.constant 0 : index
      %c0_12 = arith.constant 0 : index
      %13 = vector.load %arg7[%c0_11, %c0_12] : memref<16x512xf32, #tpu.memory_space<vmem>>, vector<16x512xf32>
      tpu.vector_store %arg7[%c0_11, %c0_12], %12 {strides = array<i32>} : memref<16x512xf32, #tpu.memory_space<vmem>>, vector<16x512xf32>,
    } else {
    }
    %c0 = arith.constant 0 : index
    %c0_1 = arith.constant 0 : index
    %3 = vector.load %arg7[%c0, %c0_1] : memref<16x512xf32, #tpu.memory_space<vmem>>, vector<16x512xf32>
    %c0_2 = arith.constant 0 : index
    %c0_3 = arith.constant 0 : index
    %4 = vector.load %arg3[%c0_2, %c0_3] : memref<16x128xbf16, #tpu.memory_space<vmem>>, vector<16x128xbf16>
    %c0_4 = arith.constant 0 : index
    %c0_5 = arith.constant 0 : index
    %5 = vector.load %arg4[%c0_4, %c0_5] : memref<128x512xbf16, #tpu.memory_space<vmem>>, vector<128x512xbf16>
    %cst = arith.constant dense<0.000000e+00> : vector<16x512xf32>
    %6 = tpu.matmul %4, %5, %cst {dimension_numbers = #tpu.dot_dimension_numbers<[1], [0], [0], [1], [0, 0, 1, 1], [], []>} : vector<16x128xbf16>, vector<128x512xbf16>, vector<16x512xf32> -> vector<16x512xf32>
    %7 = arith.addf %3, %6 : vector<16x512xf32>
    %c0_6 = arith.constant 0 : index
    %c0_7 = arith.constant 0 : index
    %8 = vector.load %arg7[%c0_6, %c0_7] : memref<16x512xf32, #tpu.memory_space<vmem>>, vector<16x512xf32>
    tpu.vector_store %arg7[%c0_6, %c0_7], %7 {strides = array<i32>} : memref<16x512xf32, #tpu.memory_space<vmem>>, vector<16x512xf32>,
    %c0_i32_8 = arith.constant 0 : i32
    %9 = arith.cmpi eq, %arg2, %c0_i32_8 : i32
    %10 = arith.extui %9 : i1 to i32
    %c0_i32_9 = arith.constant 0 : i32
    %11 = arith.cmpi ne, %10, %c0_i32_9 : i32
    scf.if %11 {
      %c0_10 = arith.constant 0 : index
      %c0_11 = arith.constant 0 : index
      %12 = vector.load %arg7[%c0_10, %c0_11] : memref<16x512xf32, #tpu.memory_space<vmem>>, vector<16x512xf32>
      %c0_12 = arith.constant 0 : index
      %c0_13 = arith.constant 0 : index
      %13 = vector.load %arg5[%c0_12, %c0_13] : memref<1x512xf32, #tpu.memory_space<vmem>>, vector<1x512xf32>
      %14 = vector.broadcast %13 : vector<1x512xf32> to vector<16x512xf32>
      %15 = arith.addf %12, %14 : vector<16x512xf32>
      %cst_14 = arith.constant 0.000000e+00 : f32
      %16 = vector.broadcast %cst_14 : f32 to vector<16x512xf32>
      %17 = arith.maximumf %15, %16 : vector<16x512xf32>
      %18 = arith.truncf %17 : vector<16x512xf32> to vector<16x512xbf16>
      %c0_15 = arith.constant 0 : index
      %c0_16 = arith.constant 0 : index
      %19 = vector.load %arg6[%c0_15, %c0_16] : memref<16x512xbf16, #tpu.memory_space<vmem>>, vector<16x512xbf16>
      tpu.vector_store %arg6[%c0_15, %c0_16], %18 {strides = array<i32>} : memref<16x512xbf16, #tpu.memory_space<vmem>>, vector<16x512xbf16>,
    } else {
    }
    return
  }
  func.func @transform_0(%arg0: i32, %arg1: i32, %arg2: i32) -> (i32, i32) {
    %c0_i32 = arith.constant 0 : i32
    return %arg0, %arg2 : i32, i32
  }
  func.func @transform_1(%arg0: i32, %arg1: i32, %arg2: i32) -> (i32, i32) {
    %c0_i32 = arith.constant 0 : i32
    return %arg2, %arg1 : i32, i32
  }
  func.func @transform_2(%arg0: i32, %arg1: i32, %arg2: i32) -> (i32, i32) {
    %c0_i32 = arith.constant 0 : i32
    %c0_i32_0 = arith.constant 0 : i32
    return %c0_i32, %arg1 : i32, i32
  }
  func.func @transform_3(%arg0: i32, %arg1: i32, %arg2: i32) -> (i32, i32) {
    %c0_i32 = arith.constant 0 : i32
    return %arg0, %arg1 : i32, i32
  }
}

module attributes {stable_mosaic.version = 11 : i64} {
  func.func @_linear_kernel(%arg0: i32, %arg1: i32, %arg2: i32, %arg3: memref<16x128xbf16, #tpu.memory_space<vmem>>, %arg4: memref<128x256xbf16, #tpu.memory_space<vmem>>, %arg5: memref<1x256xf32, #tpu.memory_space<vmem>>, %arg6: memref<16x256xbf16, #tpu.memory_space<vmem>>, %arg7: memref<16x256xf32, #tpu.memory_space<vmem>>) attributes {dimension_semantics = [#tpu.dimension_semantics<parallel>, #tpu.dimension_semantics<parallel>, #tpu.dimension_semantics<arbitrary>], iteration_bounds = array<i64: 1, 1, 1>, scalar_prefetch = 0 : i64, scratch_operands = 1 : i64, tpu.core_type = #tpu.core_type<tc>, window_params = [{transform_indices = @transform_0, window_bounds = array<i64: 16, 128>}, {transform_indices = @transform_1, window_bounds = array<i64: 128, 256>}, {transform_indices = @transform_2, window_bounds = array<i64: 1, 256>}, {transform_indices = @transform_3, window_bounds = array<i64: 16, 256>}]} {
    %c0_i32 = arith.constant 0 : i32
    %0 = arith.cmpi eq, %arg2, %c0_i32 : i32
    %1 = arith.extui %0 : i1 to i32
    %c0_i32_0 = arith.constant 0 : i32
    %2 = arith.cmpi ne, %1, %c0_i32_0 : i32
    scf.if %2 {
      %cst_10 = arith.constant 0.000000e+00 : f32
      %12 = vector.broadcast %cst_10 : f32 to vector<16x256xf32>
      %c0_11 = arith.constant 0 : index
      %c0_12 = arith.constant 0 : index
      %13 = vector.load %arg7[%c0_11, %c0_12] : memref<16x256xf32, #tpu.memory_space<vmem>>, vector<16x256xf32>
      tpu.vector_store %arg7[%c0_11, %c0_12], %12 {strides = array<i32>} : memref<16x256xf32, #tpu.memory_space<vmem>>, vector<16x256xf32>,
    } else {
    }
    %c0 = arith.constant 0 : index
    %c0_1 = arith.constant 0 : index
    %3 = vector.load %arg7[%c0, %c0_1] : memref<16x256xf32, #tpu.memory_space<vmem>>, vector<16x256xf32>
    %c0_2 = arith.constant 0 : index
    %c0_3 = arith.constant 0 : index
    %4 = vector.load %arg3[%c0_2, %c0_3] : memref<16x128xbf16, #tpu.memory_space<vmem>>, vector<16x128xbf16>
    %c0_4 = arith.constant 0 : index
    %c0_5 = arith.constant 0 : index
    %5 = vector.load %arg4[%c0_4, %c0_5] : memref<128x256xbf16, #tpu.memory_space<vmem>>, vector<128x256xbf16>
    %cst = arith.constant dense<0.000000e+00> : vector<16x256xf32>
    %6 = tpu.matmul %4, %5, %cst {dimension_numbers = #tpu.dot_dimension_numbers<[1], [0], [0], [1], [0, 0, 1, 1], [], []>} : vector<16x128xbf16>, vector<128x256xbf16>, vector<16x256xf32> -> vector<16x256xf32>
    %7 = arith.addf %3, %6 : vector<16x256xf32>
    %c0_6 = arith.constant 0 : index
    %c0_7 = arith.constant 0 : index
    %8 = vector.load %arg7[%c0_6, %c0_7] : memref<16x256xf32, #tpu.memory_space<vmem>>, vector<16x256xf32>
    tpu.vector_store %arg7[%c0_6, %c0_7], %7 {strides = array<i32>} : memref<16x256xf32, #tpu.memory_space<vmem>>, vector<16x256xf32>,
    %c0_i32_8 = arith.constant 0 : i32
    %9 = arith.cmpi eq, %arg2, %c0_i32_8 : i32
    %10 = arith.extui %9 : i1 to i32
    %c0_i32_9 = arith.constant 0 : i32
    %11 = arith.cmpi ne, %10, %c0_i32_9 : i32
    scf.if %11 {
      %c0_10 = arith.constant 0 : index
      %c0_11 = arith.constant 0 : index
      %12 = vector.load %arg7[%c0_10, %c0_11] : memref<16x256xf32, #tpu.memory_space<vmem>>, vector<16x256xf32>
      %c0_12 = arith.constant 0 : index
      %c0_13 = arith.constant 0 : index
      %13 = vector.load %arg5[%c0_12, %c0_13] : memref<1x256xf32, #tpu.memory_space<vmem>>, vector<1x256xf32>
      %14 = vector.broadcast %13 : vector<1x256xf32> to vector<16x256xf32>
      %15 = arith.addf %12, %14 : vector<16x256xf32>
      %16 = arith.truncf %15 : vector<16x256xf32> to vector<16x256xbf16>
      %c0_14 = arith.constant 0 : index
      %c0_15 = arith.constant 0 : index
      %17 = vector.load %arg6[%c0_14, %c0_15] : memref<16x256xbf16, #tpu.memory_space<vmem>>, vector<16x256xbf16>
      tpu.vector_store %arg6[%c0_14, %c0_15], %16 {strides = array<i32>} : memref<16x256xbf16, #tpu.memory_space<vmem>>, vector<16x256xbf16>,
    } else {
    }
    return
  }
  func.func @transform_0(%arg0: i32, %arg1: i32, %arg2: i32) -> (i32, i32) {
    %c0_i32 = arith.constant 0 : i32
    return %arg0, %arg2 : i32, i32
  }
  func.func @transform_1(%arg0: i32, %arg1: i32, %arg2: i32) -> (i32, i32) {
    %c0_i32 = arith.constant 0 : i32
    return %arg2, %arg1 : i32, i32
  }
  func.func @transform_2(%arg0: i32, %arg1: i32, %arg2: i32) -> (i32, i32) {
    %c0_i32 = arith.constant 0 : i32
    %c0_i32_0 = arith.constant 0 : i32
    return %c0_i32, %arg1 : i32, i32
  }
  func.func @transform_3(%arg0: i32, %arg1: i32, %arg2: i32) -> (i32, i32) {
    %c0_i32 = arith.constant 0 : i32
    return %arg0, %arg1 : i32, i32
  }
}

module attributes {stable_mosaic.version = 11 : i64} {
  func.func @_linear_add_ln_kernel(%arg0: i32, %arg1: i32, %arg2: i32, %arg3: memref<16x1024xbf16, #tpu.memory_space<vmem>>, %arg4: memref<1024x128xbf16, #tpu.memory_space<vmem>>, %arg5: memref<1x128xf32, #tpu.memory_space<vmem>>, %arg6: memref<16x128xbf16, #tpu.memory_space<vmem>>, %arg7: memref<1x128xf32, #tpu.memory_space<vmem>>, %arg8: memref<1x128xf32, #tpu.memory_space<vmem>>, %arg9: memref<16x128xbf16, #tpu.memory_space<vmem>>, %arg10: memref<16x128xf32, #tpu.memory_space<vmem>>) attributes {dimension_semantics = [#tpu.dimension_semantics<parallel>, #tpu.dimension_semantics<parallel>, #tpu.dimension_semantics<arbitrary>], iteration_bounds = array<i64: 1, 1, 1>, scalar_prefetch = 0 : i64, scratch_operands = 1 : i64, tpu.core_type = #tpu.core_type<tc>, window_params = [{transform_indices = @transform_0, window_bounds = array<i64: 16, 1024>}, {transform_indices = @transform_1, window_bounds = array<i64: 1024, 128>}, {transform_indices = @transform_2, window_bounds = array<i64: 1, 128>}, {transform_indices = @transform_3, window_bounds = array<i64: 16, 128>}, {transform_indices = @transform_4, window_bounds = array<i64: 1, 128>}, {transform_indices = @transform_5, window_bounds = array<i64: 1, 128>}, {transform_indices = @transform_6, window_bounds = array<i64: 16, 128>}]} {
    %c0_i32 = arith.constant 0 : i32
    %0 = arith.cmpi eq, %arg2, %c0_i32 : i32
    %1 = arith.extui %0 : i1 to i32
    %c0_i32_0 = arith.constant 0 : i32
    %2 = arith.cmpi ne, %1, %c0_i32_0 : i32
    scf.if %2 {
      %cst_10 = arith.constant 0.000000e+00 : f32
      %12 = vector.broadcast %cst_10 : f32 to vector<16x128xf32>
      %c0_11 = arith.constant 0 : index
      %c0_12 = arith.constant 0 : index
      %13 = vector.load %arg10[%c0_11, %c0_12] : memref<16x128xf32, #tpu.memory_space<vmem>>, vector<16x128xf32>
      tpu.vector_store %arg10[%c0_11, %c0_12], %12 {strides = array<i32>} : memref<16x128xf32, #tpu.memory_space<vmem>>, vector<16x128xf32>,
    } else {
    }
    %c0 = arith.constant 0 : index
    %c0_1 = arith.constant 0 : index
    %3 = vector.load %arg10[%c0, %c0_1] : memref<16x128xf32, #tpu.memory_space<vmem>>, vector<16x128xf32>
    %c0_2 = arith.constant 0 : index
    %c0_3 = arith.constant 0 : index
    %4 = vector.load %arg3[%c0_2, %c0_3] : memref<16x1024xbf16, #tpu.memory_space<vmem>>, vector<16x1024xbf16>
    %c0_4 = arith.constant 0 : index
    %c0_5 = arith.constant 0 : index
    %5 = vector.load %arg4[%c0_4, %c0_5] : memref<1024x128xbf16, #tpu.memory_space<vmem>>, vector<1024x128xbf16>
    %cst = arith.constant dense<0.000000e+00> : vector<16x128xf32>
    %6 = tpu.matmul %4, %5, %cst {dimension_numbers = #tpu.dot_dimension_numbers<[1], [0], [0], [1], [0, 0, 1, 1], [], []>} : vector<16x1024xbf16>, vector<1024x128xbf16>, vector<16x128xf32> -> vector<16x128xf32>
    %7 = arith.addf %3, %6 : vector<16x128xf32>
    %c0_6 = arith.constant 0 : index
    %c0_7 = arith.constant 0 : index
    %8 = vector.load %arg10[%c0_6, %c0_7] : memref<16x128xf32, #tpu.memory_space<vmem>>, vector<16x128xf32>
    tpu.vector_store %arg10[%c0_6, %c0_7], %7 {strides = array<i32>} : memref<16x128xf32, #tpu.memory_space<vmem>>, vector<16x128xf32>,
    %c0_i32_8 = arith.constant 0 : i32
    %9 = arith.cmpi eq, %arg2, %c0_i32_8 : i32
    %10 = arith.extui %9 : i1 to i32
    %c0_i32_9 = arith.constant 0 : i32
    %11 = arith.cmpi ne, %10, %c0_i32_9 : i32
    scf.if %11 {
      %c0_10 = arith.constant 0 : index
      %c0_11 = arith.constant 0 : index
      %12 = vector.load %arg10[%c0_10, %c0_11] : memref<16x128xf32, #tpu.memory_space<vmem>>, vector<16x128xf32>
      %c0_12 = arith.constant 0 : index
      %c0_13 = arith.constant 0 : index
      %13 = vector.load %arg5[%c0_12, %c0_13] : memref<1x128xf32, #tpu.memory_space<vmem>>, vector<1x128xf32>
      %14 = vector.broadcast %13 : vector<1x128xf32> to vector<16x128xf32>
      %15 = arith.addf %12, %14 : vector<16x128xf32>
      %c0_14 = arith.constant 0 : index
      %c0_15 = arith.constant 0 : index
      %16 = vector.load %arg6[%c0_14, %c0_15] : memref<16x128xbf16, #tpu.memory_space<vmem>>, vector<16x128xbf16>
      %17 = arith.extf %16 : vector<16x128xbf16> to vector<16x128xf32>
      %18 = arith.addf %15, %17 : vector<16x128xf32>
      %cst_16 = arith.constant dense<0.000000e+00> : vector<16xf32>
      %19 = vector.multi_reduction <add>, %18, %cst_16 [1] : vector<16x128xf32> to vector<16xf32>
      %20 = vector.shape_cast %19 : vector<16xf32> to vector<16x1xf32>
      %cst_17 = arith.constant 3.125000e-02 : f32
      %21 = vector.broadcast %cst_17 : f32 to vector<16x1xf32>
      %22 = arith.mulf %20, %21 : vector<16x1xf32>
      %23 = arith.mulf %18, %18 : vector<16x128xf32>
      %cst_18 = arith.constant dense<0.000000e+00> : vector<16xf32>
      %24 = vector.multi_reduction <add>, %23, %cst_18 [1] : vector<16x128xf32> to vector<16xf32>
      %25 = vector.shape_cast %24 : vector<16xf32> to vector<16x1xf32>
      %cst_19 = arith.constant 3.125000e-02 : f32
      %26 = vector.broadcast %cst_19 : f32 to vector<16x1xf32>
      %27 = arith.mulf %25, %26 : vector<16x1xf32>
      %28 = arith.mulf %22, %22 : vector<16x1xf32>
      %29 = arith.subf %27, %28 : vector<16x1xf32>
      %cst_20 = arith.constant 0.000000e+00 : f32
      %30 = vector.broadcast %cst_20 : f32 to vector<16x1xf32>
      %31 = arith.maximumf %29, %30 : vector<16x1xf32>
      %32 = vector.broadcast %22 : vector<16x1xf32> to vector<16x128xf32>
      %33 = arith.subf %18, %32 : vector<16x128xf32>
      %cst_21 = arith.constant 9.99999974E-6 : f32
      %34 = vector.broadcast %cst_21 : f32 to vector<16x1xf32>
      %35 = arith.addf %31, %34 : vector<16x1xf32>
      %36 = math.rsqrt %35 : vector<16x1xf32>
      %37 = vector.broadcast %36 : vector<16x1xf32> to vector<16x128xf32>
      %38 = arith.mulf %33, %37 : vector<16x128xf32>
      %c0_22 = arith.constant 0 : index
      %c0_23 = arith.constant 0 : index
      %39 = vector.load %arg7[%c0_22, %c0_23] : memref<1x128xf32, #tpu.memory_space<vmem>>, vector<1x128xf32>
      %40 = vector.broadcast %39 : vector<1x128xf32> to vector<16x128xf32>
      %41 = arith.mulf %38, %40 : vector<16x128xf32>
      %c0_24 = arith.constant 0 : index
      %c0_25 = arith.constant 0 : index
      %42 = vector.load %arg8[%c0_24, %c0_25] : memref<1x128xf32, #tpu.memory_space<vmem>>, vector<1x128xf32>
      %43 = vector.broadcast %42 : vector<1x128xf32> to vector<16x128xf32>
      %44 = arith.addf %41, %43 : vector<16x128xf32>
      %45 = arith.truncf %44 : vector<16x128xf32> to vector<16x128xbf16>
      %c0_26 = arith.constant 0 : index
      %c0_27 = arith.constant 0 : index
      %46 = vector.load %arg9[%c0_26, %c0_27] : memref<16x128xbf16, #tpu.memory_space<vmem>>, vector<16x128xbf16>
      tpu.vector_store %arg9[%c0_26, %c0_27], %45 {strides = array<i32>} : memref<16x128xbf16, #tpu.memory_space<vmem>>, vector<16x128xbf16>,
    } else {
    }
    return
  }
  func.func @transform_0(%arg0: i32, %arg1: i32, %arg2: i32) -> (i32, i32) {
    %c0_i32 = arith.constant 0 : i32
    return %arg0, %arg2 : i32, i32
  }
  func.func @transform_1(%arg0: i32, %arg1: i32, %arg2: i32) -> (i32, i32) {
    %c0_i32 = arith.constant 0 : i32
    return %arg2, %arg1 : i32, i32
  }
  func.func @transform_2(%arg0: i32, %arg1: i32, %arg2: i32) -> (i32, i32) {
    %c0_i32 = arith.constant 0 : i32
    %c0_i32_0 = arith.constant 0 : i32
    return %c0_i32, %arg1 : i32, i32
  }
  func.func @transform_3(%arg0: i32, %arg1: i32, %arg2: i32) -> (i32, i32) {
    %c0_i32 = arith.constant 0 : i32
    return %arg0, %arg1 : i32, i32
  }
  func.func @transform_4(%arg0: i32, %arg1: i32, %arg2: i32) -> (i32, i32) {
    %c0_i32 = arith.constant 0 : i32
    %c0_i32_0 = arith.constant 0 : i32
    return %c0_i32, %arg1 : i32, i32
  }
  func.func @transform_5(%arg0: i32, %arg1: i32, %arg2: i32) -> (i32, i32) {
    %c0_i32 = arith.constant 0 : i32
    %c0_i32_0 = arith.constant 0 : i32
    return %c0_i32, %arg1 : i32, i32
  }
  func.func @transform_6(%arg0: i32, %arg1: i32, %arg2: i32) -> (i32, i32) {
    %c0_i32 = arith.constant 0 : i32
    return %arg0, %arg1 : i32, i32
  }
}

module attributes {stable_mosaic.version = 11 : i64} {
  func.func @_linear_add_ln_kernel(%arg0: i32, %arg1: i32, %arg2: i32, %arg3: memref<16x128xbf16, #tpu.memory_space<vmem>>, %arg4: memref<128x128xbf16, #tpu.memory_space<vmem>>, %arg5: memref<1x128xf32, #tpu.memory_space<vmem>>, %arg6: memref<16x128xbf16, #tpu.memory_space<vmem>>, %arg7: memref<1x128xf32, #tpu.memory_space<vmem>>, %arg8: memref<1x128xf32, #tpu.memory_space<vmem>>, %arg9: memref<16x128xbf16, #tpu.memory_space<vmem>>, %arg10: memref<16x128xf32, #tpu.memory_space<vmem>>) attributes {dimension_semantics = [#tpu.dimension_semantics<parallel>, #tpu.dimension_semantics<parallel>, #tpu.dimension_semantics<arbitrary>], iteration_bounds = array<i64: 1, 1, 1>, scalar_prefetch = 0 : i64, scratch_operands = 1 : i64, tpu.core_type = #tpu.core_type<tc>, window_params = [{transform_indices = @transform_0, window_bounds = array<i64: 16, 128>}, {transform_indices = @transform_1, window_bounds = array<i64: 128, 128>}, {transform_indices = @transform_2, window_bounds = array<i64: 1, 128>}, {transform_indices = @transform_3, window_bounds = array<i64: 16, 128>}, {transform_indices = @transform_4, window_bounds = array<i64: 1, 128>}, {transform_indices = @transform_5, window_bounds = array<i64: 1, 128>}, {transform_indices = @transform_6, window_bounds = array<i64: 16, 128>}]} {
    %c0_i32 = arith.constant 0 : i32
    %0 = arith.cmpi eq, %arg2, %c0_i32 : i32
    %1 = arith.extui %0 : i1 to i32
    %c0_i32_0 = arith.constant 0 : i32
    %2 = arith.cmpi ne, %1, %c0_i32_0 : i32
    scf.if %2 {
      %cst_10 = arith.constant 0.000000e+00 : f32
      %12 = vector.broadcast %cst_10 : f32 to vector<16x128xf32>
      %c0_11 = arith.constant 0 : index
      %c0_12 = arith.constant 0 : index
      %13 = vector.load %arg10[%c0_11, %c0_12] : memref<16x128xf32, #tpu.memory_space<vmem>>, vector<16x128xf32>
      tpu.vector_store %arg10[%c0_11, %c0_12], %12 {strides = array<i32>} : memref<16x128xf32, #tpu.memory_space<vmem>>, vector<16x128xf32>,
    } else {
    }
    %c0 = arith.constant 0 : index
    %c0_1 = arith.constant 0 : index
    %3 = vector.load %arg10[%c0, %c0_1] : memref<16x128xf32, #tpu.memory_space<vmem>>, vector<16x128xf32>
    %c0_2 = arith.constant 0 : index
    %c0_3 = arith.constant 0 : index
    %4 = vector.load %arg3[%c0_2, %c0_3] : memref<16x128xbf16, #tpu.memory_space<vmem>>, vector<16x128xbf16>
    %c0_4 = arith.constant 0 : index
    %c0_5 = arith.constant 0 : index
    %5 = vector.load %arg4[%c0_4, %c0_5] : memref<128x128xbf16, #tpu.memory_space<vmem>>, vector<128x128xbf16>
    %cst = arith.constant dense<0.000000e+00> : vector<16x128xf32>
    %6 = tpu.matmul %4, %5, %cst {dimension_numbers = #tpu.dot_dimension_numbers<[1], [0], [0], [1], [0, 0, 1, 1], [], []>} : vector<16x128xbf16>, vector<128x128xbf16>, vector<16x128xf32> -> vector<16x128xf32>
    %7 = arith.addf %3, %6 : vector<16x128xf32>
    %c0_6 = arith.constant 0 : index
    %c0_7 = arith.constant 0 : index
    %8 = vector.load %arg10[%c0_6, %c0_7] : memref<16x128xf32, #tpu.memory_space<vmem>>, vector<16x128xf32>
    tpu.vector_store %arg10[%c0_6, %c0_7], %7 {strides = array<i32>} : memref<16x128xf32, #tpu.memory_space<vmem>>, vector<16x128xf32>,
    %c0_i32_8 = arith.constant 0 : i32
    %9 = arith.cmpi eq, %arg2, %c0_i32_8 : i32
    %10 = arith.extui %9 : i1 to i32
    %c0_i32_9 = arith.constant 0 : i32
    %11 = arith.cmpi ne, %10, %c0_i32_9 : i32
    scf.if %11 {
      %c0_10 = arith.constant 0 : index
      %c0_11 = arith.constant 0 : index
      %12 = vector.load %arg10[%c0_10, %c0_11] : memref<16x128xf32, #tpu.memory_space<vmem>>, vector<16x128xf32>
      %c0_12 = arith.constant 0 : index
      %c0_13 = arith.constant 0 : index
      %13 = vector.load %arg5[%c0_12, %c0_13] : memref<1x128xf32, #tpu.memory_space<vmem>>, vector<1x128xf32>
      %14 = vector.broadcast %13 : vector<1x128xf32> to vector<16x128xf32>
      %15 = arith.addf %12, %14 : vector<16x128xf32>
      %c0_14 = arith.constant 0 : index
      %c0_15 = arith.constant 0 : index
      %16 = vector.load %arg6[%c0_14, %c0_15] : memref<16x128xbf16, #tpu.memory_space<vmem>>, vector<16x128xbf16>
      %17 = arith.extf %16 : vector<16x128xbf16> to vector<16x128xf32>
      %18 = arith.addf %15, %17 : vector<16x128xf32>
      %cst_16 = arith.constant dense<0.000000e+00> : vector<16xf32>
      %19 = vector.multi_reduction <add>, %18, %cst_16 [1] : vector<16x128xf32> to vector<16xf32>
      %20 = vector.shape_cast %19 : vector<16xf32> to vector<16x1xf32>
      %cst_17 = arith.constant 3.125000e-02 : f32
      %21 = vector.broadcast %cst_17 : f32 to vector<16x1xf32>
      %22 = arith.mulf %20, %21 : vector<16x1xf32>
      %23 = arith.mulf %18, %18 : vector<16x128xf32>
      %cst_18 = arith.constant dense<0.000000e+00> : vector<16xf32>
      %24 = vector.multi_reduction <add>, %23, %cst_18 [1] : vector<16x128xf32> to vector<16xf32>
      %25 = vector.shape_cast %24 : vector<16xf32> to vector<16x1xf32>
      %cst_19 = arith.constant 3.125000e-02 : f32
      %26 = vector.broadcast %cst_19 : f32 to vector<16x1xf32>
      %27 = arith.mulf %25, %26 : vector<16x1xf32>
      %28 = arith.mulf %22, %22 : vector<16x1xf32>
      %29 = arith.subf %27, %28 : vector<16x1xf32>
      %cst_20 = arith.constant 0.000000e+00 : f32
      %30 = vector.broadcast %cst_20 : f32 to vector<16x1xf32>
      %31 = arith.maximumf %29, %30 : vector<16x1xf32>
      %32 = vector.broadcast %22 : vector<16x1xf32> to vector<16x128xf32>
      %33 = arith.subf %18, %32 : vector<16x128xf32>
      %cst_21 = arith.constant 9.99999974E-6 : f32
      %34 = vector.broadcast %cst_21 : f32 to vector<16x1xf32>
      %35 = arith.addf %31, %34 : vector<16x1xf32>
      %36 = math.rsqrt %35 : vector<16x1xf32>
      %37 = vector.broadcast %36 : vector<16x1xf32> to vector<16x128xf32>
      %38 = arith.mulf %33, %37 : vector<16x128xf32>
      %c0_22 = arith.constant 0 : index
      %c0_23 = arith.constant 0 : index
      %39 = vector.load %arg7[%c0_22, %c0_23] : memref<1x128xf32, #tpu.memory_space<vmem>>, vector<1x128xf32>
      %40 = vector.broadcast %39 : vector<1x128xf32> to vector<16x128xf32>
      %41 = arith.mulf %38, %40 : vector<16x128xf32>
      %c0_24 = arith.constant 0 : index
      %c0_25 = arith.constant 0 : index
      %42 = vector.load %arg8[%c0_24, %c0_25] : memref<1x128xf32, #tpu.memory_space<vmem>>, vector<1x128xf32>
      %43 = vector.broadcast %42 : vector<1x128xf32> to vector<16x128xf32>
      %44 = arith.addf %41, %43 : vector<16x128xf32>
      %45 = arith.truncf %44 : vector<16x128xf32> to vector<16x128xbf16>
      %c0_26 = arith.constant 0 : index
      %c0_27 = arith.constant 0 : index
      %46 = vector.load %arg9[%c0_26, %c0_27] : memref<16x128xbf16, #tpu.memory_space<vmem>>, vector<16x128xbf16>
      tpu.vector_store %arg9[%c0_26, %c0_27], %45 {strides = array<i32>} : memref<16x128xbf16, #tpu.memory_space<vmem>>, vector<16x128xbf16>,
    } else {
    }
    return
  }
  func.func @transform_0(%arg0: i32, %arg1: i32, %arg2: i32) -> (i32, i32) {
    %c0_i32 = arith.constant 0 : i32
    return %arg0, %arg2 : i32, i32
  }
  func.func @transform_1(%arg0: i32, %arg1: i32, %arg2: i32) -> (i32, i32) {
    %c0_i32 = arith.constant 0 : i32
    return %arg2, %arg1 : i32, i32
  }
  func.func @transform_2(%arg0: i32, %arg1: i32, %arg2: i32) -> (i32, i32) {
    %c0_i32 = arith.constant 0 : i32
    %c0_i32_0 = arith.constant 0 : i32
    return %c0_i32, %arg1 : i32, i32
  }
  func.func @transform_3(%arg0: i32, %arg1: i32, %arg2: i32) -> (i32, i32) {
    %c0_i32 = arith.constant 0 : i32
    return %arg0, %arg1 : i32, i32
  }
  func.func @transform_4(%arg0: i32, %arg1: i32, %arg2: i32) -> (i32, i32) {
    %c0_i32 = arith.constant 0 : i32
    %c0_i32_0 = arith.constant 0 : i32
    return %c0_i32, %arg1 : i32, i32
  }
  func.func @transform_5(%arg0: i32, %arg1: i32, %arg2: i32) -> (i32, i32) {
    %c0_i32 = arith.constant 0 : i32
    %c0_i32_0 = arith.constant 0 : i32
    return %c0_i32, %arg1 : i32, i32
  }
  func.func @transform_6(%arg0: i32, %arg1: i32, %arg2: i32) -> (i32, i32) {
    %c0_i32 = arith.constant 0 : i32
    return %arg0, %arg1 : i32, i32
  }
}

module attributes {stable_mosaic.version = 11 : i64} {
  func.func @_linear_kernel(%arg0: i32, %arg1: i32, %arg2: i32, %arg3: memref<16x128xbf16, #tpu.memory_space<vmem>>, %arg4: memref<128x256xbf16, #tpu.memory_space<vmem>>, %arg5: memref<1x256xf32, #tpu.memory_space<vmem>>, %arg6: memref<16x256xbf16, #tpu.memory_space<vmem>>, %arg7: memref<16x256xf32, #tpu.memory_space<vmem>>) attributes {dimension_semantics = [#tpu.dimension_semantics<parallel>, #tpu.dimension_semantics<parallel>, #tpu.dimension_semantics<arbitrary>], iteration_bounds = array<i64: 1, 1, 1>, scalar_prefetch = 0 : i64, scratch_operands = 1 : i64, tpu.core_type = #tpu.core_type<tc>, window_params = [{transform_indices = @transform_0, window_bounds = array<i64: 16, 128>}, {transform_indices = @transform_1, window_bounds = array<i64: 128, 256>}, {transform_indices = @transform_2, window_bounds = array<i64: 1, 256>}, {transform_indices = @transform_3, window_bounds = array<i64: 16, 256>}]} {
    %c0_i32 = arith.constant 0 : i32
    %0 = arith.cmpi eq, %arg2, %c0_i32 : i32
    %1 = arith.extui %0 : i1 to i32
    %c0_i32_0 = arith.constant 0 : i32
    %2 = arith.cmpi ne, %1, %c0_i32_0 : i32
    scf.if %2 {
      %cst_10 = arith.constant 0.000000e+00 : f32
      %12 = vector.broadcast %cst_10 : f32 to vector<16x256xf32>
      %c0_11 = arith.constant 0 : index
      %c0_12 = arith.constant 0 : index
      %13 = vector.load %arg7[%c0_11, %c0_12] : memref<16x256xf32, #tpu.memory_space<vmem>>, vector<16x256xf32>
      tpu.vector_store %arg7[%c0_11, %c0_12], %12 {strides = array<i32>} : memref<16x256xf32, #tpu.memory_space<vmem>>, vector<16x256xf32>,
    } else {
    }
    %c0 = arith.constant 0 : index
    %c0_1 = arith.constant 0 : index
    %3 = vector.load %arg7[%c0, %c0_1] : memref<16x256xf32, #tpu.memory_space<vmem>>, vector<16x256xf32>
    %c0_2 = arith.constant 0 : index
    %c0_3 = arith.constant 0 : index
    %4 = vector.load %arg3[%c0_2, %c0_3] : memref<16x128xbf16, #tpu.memory_space<vmem>>, vector<16x128xbf16>
    %c0_4 = arith.constant 0 : index
    %c0_5 = arith.constant 0 : index
    %5 = vector.load %arg4[%c0_4, %c0_5] : memref<128x256xbf16, #tpu.memory_space<vmem>>, vector<128x256xbf16>
    %cst = arith.constant dense<0.000000e+00> : vector<16x256xf32>
    %6 = tpu.matmul %4, %5, %cst {dimension_numbers = #tpu.dot_dimension_numbers<[1], [0], [0], [1], [0, 0, 1, 1], [], []>} : vector<16x128xbf16>, vector<128x256xbf16>, vector<16x256xf32> -> vector<16x256xf32>
    %7 = arith.addf %3, %6 : vector<16x256xf32>
    %c0_6 = arith.constant 0 : index
    %c0_7 = arith.constant 0 : index
    %8 = vector.load %arg7[%c0_6, %c0_7] : memref<16x256xf32, #tpu.memory_space<vmem>>, vector<16x256xf32>
    tpu.vector_store %arg7[%c0_6, %c0_7], %7 {strides = array<i32>} : memref<16x256xf32, #tpu.memory_space<vmem>>, vector<16x256xf32>,
    %c0_i32_8 = arith.constant 0 : i32
    %9 = arith.cmpi eq, %arg2, %c0_i32_8 : i32
    %10 = arith.extui %9 : i1 to i32
    %c0_i32_9 = arith.constant 0 : i32
    %11 = arith.cmpi ne, %10, %c0_i32_9 : i32
    scf.if %11 {
      %c0_10 = arith.constant 0 : index
      %c0_11 = arith.constant 0 : index
      %12 = vector.load %arg7[%c0_10, %c0_11] : memref<16x256xf32, #tpu.memory_space<vmem>>, vector<16x256xf32>
      %c0_12 = arith.constant 0 : index
      %c0_13 = arith.constant 0 : index
      %13 = vector.load %arg5[%c0_12, %c0_13] : memref<1x256xf32, #tpu.memory_space<vmem>>, vector<1x256xf32>
      %14 = vector.broadcast %13 : vector<1x256xf32> to vector<16x256xf32>
      %15 = arith.addf %12, %14 : vector<16x256xf32>
      %16 = arith.truncf %15 : vector<16x256xf32> to vector<16x256xbf16>
      %c0_14 = arith.constant 0 : index
      %c0_15 = arith.constant 0 : index
      %17 = vector.load %arg6[%c0_14, %c0_15] : memref<16x256xbf16, #tpu.memory_space<vmem>>, vector<16x256xbf16>
      tpu.vector_store %arg6[%c0_14, %c0_15], %16 {strides = array<i32>} : memref<16x256xbf16, #tpu.memory_space<vmem>>, vector<16x256xbf16>,
    } else {
    }
    return
  }
  func.func @transform_0(%arg0: i32, %arg1: i32, %arg2: i32) -> (i32, i32) {
    %c0_i32 = arith.constant 0 : i32
    return %arg0, %arg2 : i32, i32
  }
  func.func @transform_1(%arg0: i32, %arg1: i32, %arg2: i32) -> (i32, i32) {
    %c0_i32 = arith.constant 0 : i32
    return %arg2, %arg1 : i32, i32
  }
  func.func @transform_2(%arg0: i32, %arg1: i32, %arg2: i32) -> (i32, i32) {
    %c0_i32 = arith.constant 0 : i32
    %c0_i32_0 = arith.constant 0 : i32
    return %c0_i32, %arg1 : i32, i32
  }
  func.func @transform_3(%arg0: i32, %arg1: i32, %arg2: i32) -> (i32, i32) {
    %c0_i32 = arith.constant 0 : i32
    return %arg0, %arg1 : i32, i32
  }
}

module attributes {stable_mosaic.version = 11 : i64} {
  func.func @_linear_kernel(%arg0: i32, %arg1: i32, %arg2: i32, %arg3: memref<16x128xbf16, #tpu.memory_space<vmem>>, %arg4: memref<128x128xbf16, #tpu.memory_space<vmem>>, %arg5: memref<1x128xf32, #tpu.memory_space<vmem>>, %arg6: memref<16x128xbf16, #tpu.memory_space<vmem>>, %arg7: memref<16x128xf32, #tpu.memory_space<vmem>>) attributes {dimension_semantics = [#tpu.dimension_semantics<parallel>, #tpu.dimension_semantics<parallel>, #tpu.dimension_semantics<arbitrary>], iteration_bounds = array<i64: 1, 1, 1>, scalar_prefetch = 0 : i64, scratch_operands = 1 : i64, tpu.core_type = #tpu.core_type<tc>, window_params = [{transform_indices = @transform_0, window_bounds = array<i64: 16, 128>}, {transform_indices = @transform_1, window_bounds = array<i64: 128, 128>}, {transform_indices = @transform_2, window_bounds = array<i64: 1, 128>}, {transform_indices = @transform_3, window_bounds = array<i64: 16, 128>}]} {
    %c0_i32 = arith.constant 0 : i32
    %0 = arith.cmpi eq, %arg2, %c0_i32 : i32
    %1 = arith.extui %0 : i1 to i32
    %c0_i32_0 = arith.constant 0 : i32
    %2 = arith.cmpi ne, %1, %c0_i32_0 : i32
    scf.if %2 {
      %cst_10 = arith.constant 0.000000e+00 : f32
      %12 = vector.broadcast %cst_10 : f32 to vector<16x128xf32>
      %c0_11 = arith.constant 0 : index
      %c0_12 = arith.constant 0 : index
      %13 = vector.load %arg7[%c0_11, %c0_12] : memref<16x128xf32, #tpu.memory_space<vmem>>, vector<16x128xf32>
      tpu.vector_store %arg7[%c0_11, %c0_12], %12 {strides = array<i32>} : memref<16x128xf32, #tpu.memory_space<vmem>>, vector<16x128xf32>,
    } else {
    }
    %c0 = arith.constant 0 : index
    %c0_1 = arith.constant 0 : index
    %3 = vector.load %arg7[%c0, %c0_1] : memref<16x128xf32, #tpu.memory_space<vmem>>, vector<16x128xf32>
    %c0_2 = arith.constant 0 : index
    %c0_3 = arith.constant 0 : index
    %4 = vector.load %arg3[%c0_2, %c0_3] : memref<16x128xbf16, #tpu.memory_space<vmem>>, vector<16x128xbf16>
    %c0_4 = arith.constant 0 : index
    %c0_5 = arith.constant 0 : index
    %5 = vector.load %arg4[%c0_4, %c0_5] : memref<128x128xbf16, #tpu.memory_space<vmem>>, vector<128x128xbf16>
    %cst = arith.constant dense<0.000000e+00> : vector<16x128xf32>
    %6 = tpu.matmul %4, %5, %cst {dimension_numbers = #tpu.dot_dimension_numbers<[1], [0], [0], [1], [0, 0, 1, 1], [], []>} : vector<16x128xbf16>, vector<128x128xbf16>, vector<16x128xf32> -> vector<16x128xf32>
    %7 = arith.addf %3, %6 : vector<16x128xf32>
    %c0_6 = arith.constant 0 : index
    %c0_7 = arith.constant 0 : index
    %8 = vector.load %arg7[%c0_6, %c0_7] : memref<16x128xf32, #tpu.memory_space<vmem>>, vector<16x128xf32>
    tpu.vector_store %arg7[%c0_6, %c0_7], %7 {strides = array<i32>} : memref<16x128xf32, #tpu.memory_space<vmem>>, vector<16x128xf32>,
    %c0_i32_8 = arith.constant 0 : i32
    %9 = arith.cmpi eq, %arg2, %c0_i32_8 : i32
    %10 = arith.extui %9 : i1 to i32
    %c0_i32_9 = arith.constant 0 : i32
    %11 = arith.cmpi ne, %10, %c0_i32_9 : i32
    scf.if %11 {
      %c0_10 = arith.constant 0 : index
      %c0_11 = arith.constant 0 : index
      %12 = vector.load %arg7[%c0_10, %c0_11] : memref<16x128xf32, #tpu.memory_space<vmem>>, vector<16x128xf32>
      %c0_12 = arith.constant 0 : index
      %c0_13 = arith.constant 0 : index
      %13 = vector.load %arg5[%c0_12, %c0_13] : memref<1x128xf32, #tpu.memory_space<vmem>>, vector<1x128xf32>
      %14 = vector.broadcast %13 : vector<1x128xf32> to vector<16x128xf32>
      %15 = arith.addf %12, %14 : vector<16x128xf32>
      %16 = arith.truncf %15 : vector<16x128xf32> to vector<16x128xbf16>
      %c0_14 = arith.constant 0 : index
      %c0_15 = arith.constant 0 : index
      %17 = vector.load %arg6[%c0_14, %c0_15] : memref<16x128xbf16, #tpu.memory_space<vmem>>, vector<16x128xbf16>
      tpu.vector_store %arg6[%c0_14, %c0_15], %16 {strides = array<i32>} : memref<16x128xbf16, #tpu.memory_space<vmem>>, vector<16x128xbf16>,
    } else {
    }
    return
  }
  func.func @transform_0(%arg0: i32, %arg1: i32, %arg2: i32) -> (i32, i32) {
    %c0_i32 = arith.constant 0 : i32
    return %arg0, %arg2 : i32, i32
  }
  func.func @transform_1(%arg0: i32, %arg1: i32, %arg2: i32) -> (i32, i32) {
    %c0_i32 = arith.constant 0 : i32
    return %arg2, %arg1 : i32, i32
  }
  func.func @transform_2(%arg0: i32, %arg1: i32, %arg2: i32) -> (i32, i32) {
    %c0_i32 = arith.constant 0 : i32
    %c0_i32_0 = arith.constant 0 : i32
    return %c0_i32, %arg1 : i32, i32
  }
  func.func @transform_3(%arg0: i32, %arg1: i32, %arg2: i32) -> (i32, i32) {
    %c0_i32 = arith.constant 0 : i32
    return %arg0, %arg1 : i32, i32
  }
}

module attributes {stable_mosaic.version = 11 : i64} {
  func.func @_linear_kernel(%arg0: i32, %arg1: i32, %arg2: i32, %arg3: memref<16x128xbf16, #tpu.memory_space<vmem>>, %arg4: memref<128x512xbf16, #tpu.memory_space<vmem>>, %arg5: memref<1x512xf32, #tpu.memory_space<vmem>>, %arg6: memref<16x512xbf16, #tpu.memory_space<vmem>>, %arg7: memref<16x512xf32, #tpu.memory_space<vmem>>) attributes {dimension_semantics = [#tpu.dimension_semantics<parallel>, #tpu.dimension_semantics<parallel>, #tpu.dimension_semantics<arbitrary>], iteration_bounds = array<i64: 1, 2, 1>, scalar_prefetch = 0 : i64, scratch_operands = 1 : i64, tpu.core_type = #tpu.core_type<tc>, window_params = [{transform_indices = @transform_0, window_bounds = array<i64: 16, 128>}, {transform_indices = @transform_1, window_bounds = array<i64: 128, 512>}, {transform_indices = @transform_2, window_bounds = array<i64: 1, 512>}, {transform_indices = @transform_3, window_bounds = array<i64: 16, 512>}]} {
    %c0_i32 = arith.constant 0 : i32
    %0 = arith.cmpi eq, %arg2, %c0_i32 : i32
    %1 = arith.extui %0 : i1 to i32
    %c0_i32_0 = arith.constant 0 : i32
    %2 = arith.cmpi ne, %1, %c0_i32_0 : i32
    scf.if %2 {
      %cst_10 = arith.constant 0.000000e+00 : f32
      %12 = vector.broadcast %cst_10 : f32 to vector<16x512xf32>
      %c0_11 = arith.constant 0 : index
      %c0_12 = arith.constant 0 : index
      %13 = vector.load %arg7[%c0_11, %c0_12] : memref<16x512xf32, #tpu.memory_space<vmem>>, vector<16x512xf32>
      tpu.vector_store %arg7[%c0_11, %c0_12], %12 {strides = array<i32>} : memref<16x512xf32, #tpu.memory_space<vmem>>, vector<16x512xf32>,
    } else {
    }
    %c0 = arith.constant 0 : index
    %c0_1 = arith.constant 0 : index
    %3 = vector.load %arg7[%c0, %c0_1] : memref<16x512xf32, #tpu.memory_space<vmem>>, vector<16x512xf32>
    %c0_2 = arith.constant 0 : index
    %c0_3 = arith.constant 0 : index
    %4 = vector.load %arg3[%c0_2, %c0_3] : memref<16x128xbf16, #tpu.memory_space<vmem>>, vector<16x128xbf16>
    %c0_4 = arith.constant 0 : index
    %c0_5 = arith.constant 0 : index
    %5 = vector.load %arg4[%c0_4, %c0_5] : memref<128x512xbf16, #tpu.memory_space<vmem>>, vector<128x512xbf16>
    %cst = arith.constant dense<0.000000e+00> : vector<16x512xf32>
    %6 = tpu.matmul %4, %5, %cst {dimension_numbers = #tpu.dot_dimension_numbers<[1], [0], [0], [1], [0, 0, 1, 1], [], []>} : vector<16x128xbf16>, vector<128x512xbf16>, vector<16x512xf32> -> vector<16x512xf32>
    %7 = arith.addf %3, %6 : vector<16x512xf32>
    %c0_6 = arith.constant 0 : index
    %c0_7 = arith.constant 0 : index
    %8 = vector.load %arg7[%c0_6, %c0_7] : memref<16x512xf32, #tpu.memory_space<vmem>>, vector<16x512xf32>
    tpu.vector_store %arg7[%c0_6, %c0_7], %7 {strides = array<i32>} : memref<16x512xf32, #tpu.memory_space<vmem>>, vector<16x512xf32>,
    %c0_i32_8 = arith.constant 0 : i32
    %9 = arith.cmpi eq, %arg2, %c0_i32_8 : i32
    %10 = arith.extui %9 : i1 to i32
    %c0_i32_9 = arith.constant 0 : i32
    %11 = arith.cmpi ne, %10, %c0_i32_9 : i32
    scf.if %11 {
      %c0_10 = arith.constant 0 : index
      %c0_11 = arith.constant 0 : index
      %12 = vector.load %arg7[%c0_10, %c0_11] : memref<16x512xf32, #tpu.memory_space<vmem>>, vector<16x512xf32>
      %c0_12 = arith.constant 0 : index
      %c0_13 = arith.constant 0 : index
      %13 = vector.load %arg5[%c0_12, %c0_13] : memref<1x512xf32, #tpu.memory_space<vmem>>, vector<1x512xf32>
      %14 = vector.broadcast %13 : vector<1x512xf32> to vector<16x512xf32>
      %15 = arith.addf %12, %14 : vector<16x512xf32>
      %cst_14 = arith.constant 0.000000e+00 : f32
      %16 = vector.broadcast %cst_14 : f32 to vector<16x512xf32>
      %17 = arith.maximumf %15, %16 : vector<16x512xf32>
      %18 = arith.truncf %17 : vector<16x512xf32> to vector<16x512xbf16>
      %c0_15 = arith.constant 0 : index
      %c0_16 = arith.constant 0 : index
      %19 = vector.load %arg6[%c0_15, %c0_16] : memref<16x512xbf16, #tpu.memory_space<vmem>>, vector<16x512xbf16>
      tpu.vector_store %arg6[%c0_15, %c0_16], %18 {strides = array<i32>} : memref<16x512xbf16, #tpu.memory_space<vmem>>, vector<16x512xbf16>,
    } else {
    }
    return
  }
  func.func @transform_0(%arg0: i32, %arg1: i32, %arg2: i32) -> (i32, i32) {
    %c0_i32 = arith.constant 0 : i32
    return %arg0, %arg2 : i32, i32
  }
  func.func @transform_1(%arg0: i32, %arg1: i32, %arg2: i32) -> (i32, i32) {
    %c0_i32 = arith.constant 0 : i32
    return %arg2, %arg1 : i32, i32
  }
  func.func @transform_2(%arg0: i32, %arg1: i32, %arg2: i32) -> (i32, i32) {
    %c0_i32 = arith.constant 0 : i32
    %c0_i32_0 = arith.constant 0 : i32
    return %c0_i32, %arg1 : i32, i32
  }
  func.func @transform_3(%arg0: i32, %arg1: i32, %arg2: i32) -> (i32, i32) {
    %c0_i32 = arith.constant 0 : i32
    return %arg0, %arg1 : i32, i32
  }
}

</mosaic_0001>

<bundles_post_ra>
// kernel: decoder_stack_forward.21
= control target key start
LH: loop header
LB: loop body
LE: loop exit
PB: predicated region body
PF: predicated region fallthrough
CT: control target
= control target key end

     0   :  { %8 = vsyncpa [#allocation4], 0  ;;  %s265_s12 = smov [#allocation3]   ;;  %s330_s0 = inlined_call_operand.vmem [shape: bf16[16,128], index: 0, kind: input, shape index: {}]   ;;  %s331_s1 = inlined_call_operand.vmem [shape: bf16[128,128], index: 1, kind: input, shape index: {}]   ;;  %s332_s2 = inlined_call_operand.hbm [shape: f32[1,128], index: 2, kind: input, shape index: {}]   ;;  %s333_s3 = inlined_call_operand.vmem [shape: bf16[16,128], index: 3, kind: output, shape index: {}]  }
   0x1   :  { %s19_s13 = sshll.u32 %s265_s12, 4  ;;  %s241_s16 = scalar_lea.hbm %s332_s2, 16  ;;  %s20_s13 = int_to_ptr.vmem [resolvable:$true] %s19_s13 }
   0x2   :  { %p242_p0 = scmp.ne.s32.totalorder %s332_s2, %s241_s16  ;;  %p245_p1 = scmp.lt.u32.totalorder %s241_s16, %s332_s2 }
   0x4   :  { %p247_p2 = pnand %p245_p1, %p242_p0 }
   0x6   :  { %250 = shalt.err (!%p247_p2)
}
   0x7   :  { %s251_s21 = scalar_lea.vmem %s20_s13, 16  ;;  %s255_s22 = scalar_lea.vmem %s20_s13, 32 }
   0x8   :  { %p252_p3 = scmp.ne.s32.totalorder %s20_s13, %s251_s21  ;;  %p256_p4 = scmp.lt.s32.totalorder %s20_s13, %s20_s13 }
   0x9   :  { %p257_p5 = scmp.lt.s32.totalorder %s255_s22, %s251_s21 }
   0xb   :  { %p258_p6 = por %p257_p5, %p256_p4 }
   0xd   :  { %p259_p7 = pnand %p258_p6, %p252_p3 }
   0xf   :  { %262 = shalt.err (!%p259_p7)
}
  0x10   :  { %22 = dma.hbm_to_vmem [thread:$0]  %s332_s2, 16, %s20_s13, [#allocation4]  }
  0x11   :  { %263 = dma.done.wait [#allocation4], 16  }
  0x12   :  { %264 = vsyncadd [#allocation4], 4294967280  ;;  %v266_v0 = vmov 0.0   ;;  %vm267_vm0 = vmmov 0   ;;  %v232_v1 = vld [vmem:[%s331_s1] sm:$0xff]   ;;  %v233_v2 = vld [vmem:[%s331_s1 + $0x8] sm:$0xff]  }
  0x13   :  { %209 = vmatprep.subr.bf16.mxu0 %v266_v0  ;;  %225 = vmatprep.mubr.msk.bf16.mxu0 %vm267_vm0, %v266_v0  ;;  %v234_v3 = vld [vmem:[%s331_s1 + $0x10] sm:$0xff]   ;;  %v235_v4 = vld [vmem:[%s331_s1 + $0x18] sm:$0xff]   ;;  %v236_v5 = vld [vmem:[%s331_s1 + $0x20] sm:$0xff]  }
  0x14   :  { %210 = vmatpush3.bf16.msra.mxu0 %v232_v1  ;;  %v237_v6 = vld [vmem:[%s331_s1 + $0x28] sm:$0xff]   ;;  %v238_v7 = vld [vmem:[%s331_s1 + $0x30] sm:$0xff]   ;;  %v239_v8 = vld [vmem:[%s331_s1 + $0x38] sm:$0xff]  }
  0x15   :  { %211 = vmatprep.subr.bf16.mxu0 %v266_v0  ;;  %v240_v9 = vld [vmem:[%s330_s0] sm:$0xff]  }
  0x16   :  { %v190_v11 = vld [vmem:[#allocation3] ss:$0 sm:$0xff] }
  0x18   :  { %212 = vmatpush3.bf16.msra.mxu0 %v233_v2 }
  0x19   :  { %213 = vmatprep.subr.bf16.mxu0 %v266_v0 }
  0x1c   :  { %214 = vmatpush3.bf16.msra.mxu0 %v234_v3 }
  0x1d   :  { %215 = vmatprep.subr.bf16.mxu0 %v266_v0 }
  0x20   :  { %216 = vmatpush3.bf16.msra.mxu0 %v235_v4 }
  0x21   :  { %217 = vmatprep.subr.bf16.mxu0 %v266_v0 }
  0x24   :  { %218 = vmatpush3.bf16.msra.mxu0 %v236_v5 }
  0x25   :  { %219 = vmatprep.subr.bf16.mxu0 %v266_v0 }
  0x28   :  { %220 = vmatpush3.bf16.msra.mxu0 %v237_v6 }
  0x29   :  { %221 = vmatprep.subr.bf16.mxu0 %v266_v0 }
  0x2c   :  { %222 = vmatpush3.bf16.msra.mxu0 %v238_v7 }
  0x2d   :  { %223 = vmatprep.subr.bf16.mxu0 %v266_v0 }
  0x30   :  { %224 = vmatpush3.bf16.msra.mxu0 %v239_v8 }
  0x33   :  { %226 = vmatmul.mubr.bf16.vlgmr.msra.gmra.mrb[0].mxu0 %v240_v9 }
 0x106   :  { %v141_v10 = vpop.f32.mrb[0].mxu0 }
 0x107   :  { %v227_v12 = vpop.f32.mrb[1].mxu0  ;;  %v164_v14 = vadd.f32 %v190_v11, %v141_v10 }
 0x108   :  { %v144_v13 = vpop.f32.mrb[2].mxu0 }
 0x109   :  { %v165_v15 = vadd.f32 %v190_v11, %v144_v13  ;;  %v228_v16 = vpop.f32.mrb[3].mxu0 }
 0x10b   :  { %v198_v17 = vpack.c.bf16 %v165_v15, %v164_v14 }
 0x10d   :  { %199 = vst [vmem:[%s333_s3] sm:$0xff] %v198_v17  }
 0x10e   :  { %180 = vsyncpa [#allocation4], 1 }

// kernel: decoder_stack_forward.20
= control target key start
LH: loop header
LB: loop body
LE: loop exit
PB: predicated region body
PF: predicated region fallthrough
CT: control target
= control target key end

     0   :  { %11 = vsyncpa [#allocation4], 0  ;;  %s473_s0 = inlined_call_operand.vmem [shape: bf16[16,128], index: 0, kind: input, shape index: {}]   ;;  %s474_s1 = inlined_call_operand.vmem [shape: bf16[128,128], index: 1, kind: input, shape index: {}]   ;;  %s475_s2 = inlined_call_operand.vmem [shape: f32[1,128], index: 2, kind: input, shape index: {}]   ;;  %s476_s3 = inlined_call_operand.vmem [shape: bf16[16,128], index: 3, kind: input, shape index: {}]   ;;  %s477_s4 = inlined_call_operand.hbm [shape: f32[1,128], index: 4, kind: input, shape index: {}]   ;;  %s478_s5 = inlined_call_operand.hbm [shape: f32[1,128], index: 5, kind: input, shape index: {}]   ;;  %s479_s6 = inlined_call_operand.vmem [shape: bf16[16,128], index: 6, kind: output, shape index: {}]  }
   0x1   :  { %12 = vsyncpa [#allocation6], 0  ;;  %s374_s21 = smov [#allocation3]   ;;  %s375_s23 = smov [#allocation5]  }
   0x2   :  { %s27_s22 = sshll.u32 %s374_s21, 4  ;;  %s37_s24 = sshll.u32 %s375_s23, 4  ;;  %s28_s22 = int_to_ptr.vmem [resolvable:$true] %s27_s22  ;;  %s38_s24 = int_to_ptr.vmem [resolvable:$true] %s37_s24 }
   0x3   :  { %s326_s27 = scalar_lea.hbm %s477_s4, 16 }
   0x4   :  { %p327_p0 = scmp.ne.s32.totalorder %s477_s4, %s326_s27  ;;  %p330_p1 = scmp.lt.u32.totalorder %s326_s27, %s477_s4 }
   0x6   :  { %p332_p2 = pnand %p330_p1, %p327_p0 }
   0x8   :  { %335 = shalt.err (!%p332_p2)
}
   0x9   :  { %s336_s8 = scalar_lea.vmem %s28_s22, 16  ;;  %s340_s9 = scalar_lea.vmem %s28_s22, 32 }
   0xa   :  { %p337_p3 = scmp.ne.s32.totalorder %s28_s22, %s336_s8  ;;  %p341_p4 = scmp.lt.s32.totalorder %s28_s22, %s28_s22 }
   0xb   :  { %p342_p5 = scmp.lt.s32.totalorder %s340_s9, %s336_s8 }
   0xd   :  { %p343_p6 = por %p342_p5, %p341_p4 }
   0xf   :  { %p344_p7 = pnand %p343_p6, %p337_p3 }
  0x11   :  { %347 = shalt.err (!%p344_p7)
}
  0x12   :  { %30 = dma.hbm_to_vmem [thread:$0]  %s477_s4, 16, %s28_s22, [#allocation4]  }
  0x13   :  { %s348_s14 = scalar_lea.hbm %s478_s5, 16 }
  0x14   :  { %p349_p8 = scmp.ne.s32.totalorder %s478_s5, %s348_s14  ;;  %p352_p9 = scmp.lt.u32.totalorder %s348_s14, %s478_s5 }
  0x16   :  { %p354_p10 = pnand %p352_p9, %p349_p8 }
  0x18   :  { %357 = shalt.err (!%p354_p10)
}
  0x19   :  { %s358_s19 = scalar_lea.vmem %s38_s24, 16  ;;  %s362_s20 = scalar_lea.vmem %s38_s24, 32 }
  0x1a   :  { %p359_p11 = scmp.ne.s32.totalorder %s38_s24, %s358_s19  ;;  %p363_p12 = scmp.lt.s32.totalorder %s38_s24, %s38_s24 }
  0x1b   :  { %p364_p13 = scmp.lt.s32.totalorder %s362_s20, %s358_s19 }
  0x1d   :  { %p365_p0 = por %p364_p13, %p363_p12 }
  0x1f   :  { %p366_p1 = pnand %p365_p0, %p359_p11 }
  0x21   :  { %369 = shalt.err (!%p366_p1)
}
  0x22   :  { %40 = dma.hbm_to_vmem [thread:$0]  %s478_s5, 16, %s38_s24, [#allocation6]  }
  0x23   :  { %370 = dma.done.wait [#allocation4], 16  }
  0x24   :  { %371 = vsyncadd [#allocation4], 4294967280 }
  0x25   :  { %372 = dma.done.wait [#allocation6], 16  }
  0x26   :  { %373 = vsyncadd [#allocation6], 4294967280  ;;  %v376_v0 = vmov 0.0   ;;  %vm377_vm0 = vmmov 0   ;;  %v313_v1 = vld [vmem:[%s474_s1] sm:$0xff]   ;;  %v314_v2 = vld [vmem:[%s474_s1 + $0x8] sm:$0xff]  }
  0x27   :  { %289 = vmatprep.subr.bf16.mxu0 %v376_v0  ;;  %305 = vmatprep.mubr.msk.bf16.mxu0 %vm377_vm0, %v376_v0  ;;  %v315_v3 = vld [vmem:[%s474_s1 + $0x10] sm:$0xff]   ;;  %v316_v4 = vld [vmem:[%s474_s1 + $0x18] sm:$0xff]   ;;  %v317_v5 = vld [vmem:[%s474_s1 + $0x20] sm:$0xff]  }
  0x28   :  { %290 = vmatpush3.bf16.msra.mxu0 %v313_v1  ;;  %v318_v6 = vld [vmem:[%s474_s1 + $0x28] sm:$0xff]   ;;  %v319_v7 = vld [vmem:[%s474_s1 + $0x30] sm:$0xff]   ;;  %v320_v8 = vld [vmem:[%s474_s1 + $0x38] sm:$0xff]  }
  0x29   :  { %291 = vmatprep.subr.bf16.mxu0 %v376_v0  ;;  %v321_v9 = vld [vmem:[%s473_s0] sm:$0xff]  }
  0x2a   :  { %v272_v10 = vld [vmem:[%s476_s3] sm:$0xff]  }
  0x2b   :  { %v264_v11 = vld [vmem:[%s475_s2] ss:$0 sm:$0xff]  ;;  %v273_v12 = vunpack.c.l.bf16 %v272_v10  ;;  %v274_v16 = vunpack.c.h.bf16 %v272_v10  ;;  %v266_v48 = vld [vmem:[#allocation5] ss:$0 sm:$0xff] }
  0x2c   :  { %292 = vmatpush3.bf16.msra.mxu0 %v314_v2  ;;  %v265_v43 = vld [vmem:[#allocation3] ss:$0 sm:$0xff] }
  0x2d   :  { %293 = vmatprep.subr.bf16.mxu0 %v376_v0 }
  0x30   :  { %294 = vmatpush3.bf16.msra.mxu0 %v315_v3 }
  0x31   :  { %295 = vmatprep.subr.bf16.mxu0 %v376_v0 }
  0x34   :  { %296 = vmatpush3.bf16.msra.mxu0 %v316_v4 }
  0x35   :  { %297 = vmatprep.subr.bf16.mxu0 %v376_v0 }
  0x38   :  { %298 = vmatpush3.bf16.msra.mxu0 %v317_v5 }
  0x39   :  { %299 = vmatprep.subr.bf16.mxu0 %v376_v0 }
  0x3c   :  { %300 = vmatpush3.bf16.msra.mxu0 %v318_v6 }
  0x3d   :  { %301 = vmatprep.subr.bf16.mxu0 %v376_v0 }
  0x40   :  { %302 = vmatpush3.bf16.msra.mxu0 %v319_v7 }
  0x41   :  { %303 = vmatprep.subr.bf16.mxu0 %v376_v0 }
  0x44   :  { %304 = vmatpush3.bf16.msra.mxu0 %v320_v8 }
  0x47   :  { %306 = vmatmul.mubr.bf16.vlgmr.msra.gmra.mrb[0].mxu0 %v321_v9 }
 0x11a   :  { %v162_v13 = vpop.f32.mrb[0].mxu0 }
 0x11b   :  { %v185_v14 = vadd.f32 %v264_v11, %v162_v13  ;;  %v307_v15 = vpop.f32.mrb[1].mxu0 }
 0x11c   :  { %v165_v17 = vpop.f32.mrb[2].mxu0 }
 0x11d   :  { %v191_v18 = vadd.f32 %v273_v12, %v185_v14  ;;  %v186_v19 = vadd.f32 %v264_v11, %v165_v17  ;;  %v308_v20 = vpop.f32.mrb[3].mxu0 }
 0x11f   :  { %v192_v21 = vadd.f32 %v274_v16, %v186_v19  ;;  %193 = vadd.xlane.f32.xlu0 %v191_v18  ;;  %v199_v22 = vmul.f32 %v191_v18, %v191_v18 }
 0x121   :  { %201 = vadd.xlane.f32.xlu1 %v199_v22  ;;  %v200_v23 = vmul.f32 %v192_v21, %v192_v21 }
 0x123   :  { %195 = vadd.xlane.f32.xlu0 %v192_v21 }
 0x125   :  { %203 = vadd.xlane.f32.xlu1 %v200_v23 }
 0x1ac   :  { %v194_v24 = vpop.xlane.xlu0 %193 }
 0x1ad   :  { %v197_v25 = vmul.f32 0.03125, %v194_v24 }
 0x1ae   :  { %v202_v26 = vpop.xlane.xlu1 %201 }
 0x1af   :  { %v207_v27 = vmul.f32 %v197_v25, %v197_v25  ;;  %v205_v28 = vmul.f32 0.03125, %v202_v26  ;;  %v213_v40 = vsub.f32 %v191_v18, %v197_v25 }
 0x1b0   :  { %v196_v29 = vpop.xlane.xlu0 %195 }
 0x1b1   :  { %v209_v30 = vsub.f32 %v205_v28, %v207_v27  ;;  %v198_v31 = vmul.f32 0.03125, %v196_v29 }
 0x1b2   :  { %v204_v32 = vpop.xlane.xlu1 %203 }
 0x1b3   :  { %v211_v33 = vmax.f32 %v209_v30, 0.0  ;;  %v208_v34 = vmul.f32 %v198_v31, %v198_v31  ;;  %v206_v35 = vmul.f32 0.03125, %v204_v32  ;;  %v214_v44 = vsub.f32 %v192_v21, %v198_v31 }
 0x1b5   :  { %v215_v36 = vadd.f32 1e-05, %v211_v33  ;;  %v210_v37 = vsub.f32 %v206_v35, %v208_v34 }
 0x1b7   :  { %322 = vrsqrt.f32 %v215_v36  ;;  %v212_v38 = vmax.f32 %v210_v37, 0.0 }
 0x1b9   :  { %v216_v39 = vadd.f32 1e-05, %v212_v38 }
 0x1bb   :  { %324 = vrsqrt.f32 %v216_v39 }
 0x1c1   :  { %v323_v41 = vpop.eup %322 }
 0x1c2   :  { %v219_v42 = vmul.f32 %v323_v41, %v213_v40 }
 0x1c4   :  { %v228_v46 = vmul.f32 %v265_v43, %v219_v42 }
 0x1c5   :  { %v325_v45 = vpop.eup %324 }
 0x1c6   :  { %v220_v47 = vmul.f32 %v325_v45, %v214_v44  ;;  %v237_v50 = vadd.f32 %v266_v48, %v228_v46 }
 0x1c8   :  { %v229_v49 = vmul.f32 %v265_v43, %v220_v47 }
 0x1ca   :  { %v238_v51 = vadd.f32 %v266_v48, %v229_v49 }
 0x1cc   :  { %v278_v52 = vpack.c.bf16 %v238_v51, %v237_v50 }
 0x1ce   :  { %279 = vst [vmem:[%s479_s6] sm:$0xff] %v278_v52  }
 0x1cf   :  { %253 = vsyncpa [#allocation4], 1 }
 0x1d0   :  { %254 = vsyncpa [#allocation6], 1 }

// kernel: decoder_stack_forward.19
= control target key start
LH: loop header
LB: loop body
LE: loop exit
PB: predicated region body
PF: predicated region fallthrough
CT: control target
= control target key end

     0   :  { %s815_s9 = smov 0   ;;  %s961_s0 = inlined_call_operand.vmem [shape: bf16[2,8,384], index: 0, kind: input, shape index: {}]   ;;  %s962_s1 = inlined_call_operand.vmem [shape: f32[2,1,8], index: 1, kind: input, shape index: {}]   ;;  %s963_s2 = inlined_call_operand.vmem [shape: bf16[2,8,128], index: 2, kind: output, shape index: {}]  }
   0x1 LB: > { %s671_s10 = sadd.s32 4294967295, %s796_s9   ;;  %p675_p0 = scmp.ge.s32.totalorder %s796_s9, 1  ;;  %s796_s9 = sphi %s815_s9, %s12_s9  }
   0x2   : > { %p120_p1 = scmp.lt.s32.totalorder %s796_s9, 3 }
   0x4   : > { %p121_p2 = pnand %p675_p0, %p120_p1 }
   0x5   : > { %p144_p3 = scmp.lt.s32.totalorder (!%p121_p2), %s671_s10, 1  ;;  %v160_v0 = vlaneseq (!%p121_p2)  ;;  %v798_v1 = vmov (!%p121_p2), 0.0   ;;  %vm799_vm0 = vmmov (!%p121_p2), 0  }
   0x6   : > { %124 = sbr.rel (%p121_p2) target bundleno = 817 (0x331), region = 28  ;;  %702 = vmatprep.subr.bf16.mxu1 (!%p121_p2), %v798_v1  ;;  %704 = vmatprep.mubr.msk.bf16.mxu1 (!%p121_p2), %vm799_vm0, %v798_v1 }
   0x7   : > { %714 = vmatprep.subr.bf16.mxu0 (!%p121_p2), %v798_v1  ;;  %716 = vmatprep.mubr.msk.bf16.mxu0 (!%p121_p2), %vm799_vm0, %v798_v1  ;;  %v832_v2 = vand.u32 (!%p121_p2), 127, %v160_v0  ;;  %v163_v18 = vshrl.u32 (!%p121_p2), %v160_v0, 7 }
   0x9   : > { %vm165_vm1 = vcmp.lt.s32.totalorder (!%p121_p2), %v832_v2, 8  ;;  %vm237_vm3 = vcmp.ge.s32.totalorder (!%p121_p2), %v832_v2, 8  ;;  %vm238_vm4 = vcmp.lt.s32.totalorder (!%p121_p2), %v832_v2, 16  ;;  %vm391_vm7 = vcmp.ge.s32.totalorder (!%p121_p2), %v832_v2, 16 }
   0xa   : > { %vm841_vm2 = vmpackc.low (!%p121_p2), %vm165_vm1, %vm165_vm1  ;;  %vm392_vm8 = vcmp.lt.s32.totalorder (!%p121_p2), %v832_v2, 24  ;;  %vm499_vm11 = vcmp.ge.s32.totalorder (!%p121_p2), %v832_v2, 24  ;;  %vm500_vm12 = vcmp.lt.s32.totalorder (!%p121_p2), %v832_v2, 32  ;;  %vm221_vm15 = vcmp.gt.s32.totalorder (!%p121_p2), %v832_v2, %v163_v18 }
   0xb   : > { %vm850_vm5 = vmand (!%p121_p2), %vm237_vm3, %vm238_vm4  ;;  %vm223_vm1 = vcmask (!%p121_p2), 64512   ;;  %vm301_vm3 = vcmask (!%p121_p2), 1043456  }
   0xc   : > { %vm242_vm6 = vmpackc.low (!%p121_p2), %vm850_vm5, %vm850_vm5 }
   0xd   : > { %s973_s10 = smov (!%p144_p3, %s671_s10), 1  ;;  %vm867_vm9 = vmand %vm391_vm7, %vm392_vm8 }
   0xe   : > { %s762_s11 = smul.u32 12, %s973_s10  ;;  %vm396_vm10 = vmpackc.low %vm867_vm9, %vm867_vm9  ;;  %s151_s17 = scalar_lea.vmem %s962_s1, %s973_s10 }
   0xf   : > { %vm884_vm13 = vmand %vm499_vm11, %vm500_vm12  ;;  %v678_v17 = vld [vmem:[%s151_s17] ss:$0 sm:$0xff]  ;;  %s677_s18 = sshll.u32 %s973_s10, 2 }
  0x10   : > { %s837_s14 = scalar_lea.vmem %s961_s0, %s762_s11  ;;  %vm504_vm14 = vmpackc.low %vm884_vm13, %vm884_vm13  ;;  %s155_s21 = scalar_lea.vmem %s963_s2, %s677_s18 }
  0x11   : > { %v157_v3 = vld [vmem:[%s837_s14] sm:$0xff]  ;;  %v158_v63 = vld [vmem:[%s837_s14 + $0x8] sm:$0xf] }
  0x12   : > { %v679_v4 = vcombine.high %v157_v3, %v157_v3  ;;  %v170_v6 = vsel %vm841_vm2, %v157_v3, 0  ;;  %v243_v8 = vsel %vm242_vm6, %v157_v3, 0  ;;  %v397_v10 = vsel %vm396_vm10, %v157_v3, 0 }
  0x13   : > { %v505_v12 = vsel %vm504_vm14, %v157_v3, 0  ;;  %v297_v0 = vsel %vm242_vm6, %v158_v63, 0  ;;  %v236_v3 = vsel %vm841_vm2, %v158_v63, 0  ;;  %v559_v9 = vsel %vm504_vm14, %v158_v63, 0 }
  0x14   : > { %703 = vmatpush3.bf16.xpose.msra.mxu1 %v679_v4  ;;  %v303_v2 = vsel %vm301_vm3, %v297_v0, 0 }
  0x15   : > { %708 = vmatprep.subr.bf16.mxu1 %v798_v1  ;;  %715 = vmatpush3.bf16.msra.mxu0 %v303_v2 }
  0x16   : > { %720 = vmatprep.subr.bf16.mxu0 %v798_v1 }
  0x1b   : > { %705 = vmatmul.mubr.bf16.vlgmr.msra.gmra.mrb[0].mxu1 %v170_v6 }
  0x1c   : > { %709 = vmatpush3.bf16.xpose.msra.mxu1 %v679_v4  ;;  %710 = vmatprep.mubr.msk.bf16.mxu1 %vm799_vm0, %v798_v1 }
  0x1d   : > { %726 = vmatprep.subr.bf16.mxu1 %v798_v1 }
  0x23   : > { %711 = vmatmul.mubr.bf16.vlgmr.msra.gmra.mrb[4].mxu1 %v243_v8 }
  0x24   : > { %727 = vmatpush3.bf16.xpose.msra.mxu1 %v679_v4  ;;  %728 = vmatprep.mubr.msk.bf16.mxu1 %vm799_vm0, %v798_v1 }
  0x25   : > { %738 = vmatprep.subr.bf16.mxu1 %v798_v1 }
  0x2b   : > { %729 = vmatmul.mubr.bf16.vlgmr.msra.gmra.mrb[8].mxu1 %v397_v10 }
  0x2c   : > { %739 = vmatpush3.bf16.xpose.msra.mxu1 %v679_v4  ;;  %740 = vmatprep.mubr.msk.bf16.mxu1 %vm799_vm0, %v798_v1  ;;  %v349_v4 = vsel %vm301_vm3, %v236_v3, 0 }
  0x33   : > { %741 = vmatmul.mubr.bf16.vlgmr.msra.gmra.mrb[12].mxu1 %v505_v12 }
  0xee   : > { %v215_v13 = vpop.f32.mrb[0].mxu1 }
  0xef   : > { %v706_v14 = vpop.f32.mrb[1].mxu1  ;;  %v216_v20 = vadd.f32 %v678_v17, %v215_v13 }
  0xf0   : > { %v218_v15 = vpop.f32.mrb[2].mxu1 }
  0xf1   : > { %v707_v16 = vpop.f32.mrb[3].mxu1  ;;  %v222_v27 = vsel %vm221_vm15, -1e+09, %v216_v20  ;;  %v451_v15 = vsel %vm396_vm10, %v158_v63, 0 }
  0xf2   : > { %v224_v29 = vsel %vm223_vm1, %v222_v27, -inf }
  0xf6   : > { %v278_v19 = vpop.f32.mrb[4].mxu1 }
  0xf7   : > { %v279_v21 = vadd.f32 %v678_v17, %v278_v19  ;;  %v712_v22 = vpop.f32.mrb[5].mxu1 }
  0xf8   : > { %v281_v23 = vpop.f32.mrb[6].mxu1  ;;  %v564_v22 = vsel %vm301_vm3, %v559_v9, 0 }
  0xf9   : > { %v713_v24 = vpop.f32.mrb[7].mxu1  ;;  %v284_v25 = vsel %vm221_vm15, -1e+09, %v279_v21 }
  0xfa   : > { %v285_v26 = vsel %vm223_vm1, %v284_v25, -inf }
  0xfb   : > { %286 = vmax.xlane.f32.xlu0 %v285_v26 }
  0xfe   : > { %v432_v28 = vpop.f32.mrb[8].mxu1 }
  0xff   : > { %v433_v30 = vadd.f32 %v678_v17, %v432_v28  ;;  %225 = vmax.xlane.f32.xlu0 %v224_v29  ;;  %v730_v31 = vpop.f32.mrb[9].mxu1 }
 0x100   : > { %v435_v32 = vpop.f32.mrb[10].mxu1 }
 0x101   : > { %v438_v33 = vsel %vm221_vm15, -1e+09, %v433_v30  ;;  %v731_v34 = vpop.f32.mrb[11].mxu1 }
 0x102   : > { %v439_v35 = vsel %vm223_vm1, %v438_v33, -inf }
 0x103   : > { %440 = vmax.xlane.f32.xlu1 %v439_v35 }
 0x106   : > { %v540_v36 = vpop.f32.mrb[12].mxu1 }
 0x107   : > { %v541_v37 = vadd.f32 %v678_v17, %v540_v36  ;;  %v742_v38 = vpop.f32.mrb[13].mxu1  ;;  %v456_v17 = vsel %vm301_vm3, %v451_v15, 0 }
 0x108   : > { %v543_v39 = vpop.f32.mrb[14].mxu1 }
 0x109   : > { %v546_v40 = vsel %vm221_vm15, -1e+09, %v541_v37  ;;  %v743_v41 = vpop.f32.mrb[15].mxu1 }
 0x10a   : > { %v547_v42 = vsel %vm223_vm1, %v546_v40, -inf }
 0x10b   : > { %548 = vmax.xlane.f32.xlu1 %v547_v42 }
 0x188   : > { %v287_v43 = vpop.xlane.xlu0 %286 }
 0x189   : > { %v288_v44 = vsub.f32 %v284_v25, %v287_v43 }
 0x18b   : > { %v289_v45 = vmul.f32 1.442695, %v288_v44 }
 0x18c   : > { %v226_v46 = vpop.xlane.xlu0 %225 }
 0x18d   : > { %774 = vpow2.f32 %v289_v45  ;;  %v227_v47 = vsub.f32 %v222_v27, %v226_v46 }
 0x18f   : > { %v228_v48 = vmul.f32 1.442695, %v227_v47 }
 0x190   : > { %v441_v49 = vpop.xlane.xlu1 %440 }
 0x191   : > { %776 = vpow2.f32 %v228_v48  ;;  %v442_v50 = vsub.f32 %v438_v33, %v441_v49 }
 0x193   : > { %v443_v51 = vmul.f32 1.442695, %v442_v50 }
 0x195   : > { %778 = vpow2.f32 %v443_v51 }
 0x197   : > { %v775_v52 = vpop.eup %774 }
 0x198   : > { %v549_v53 = vpop.xlane.xlu1 %548  ;;  %v291_v54 = vsel %vm223_vm1, %v775_v52, 0.0 }
 0x199   : > { %v550_v55 = vsub.f32 %v546_v40, %v549_v53  ;;  %292 = vadd.xlane.f32.xlu0 %v291_v54 }
 0x19b   : > { %v777_v56 = vpop.eup %776  ;;  %v551_v57 = vmul.f32 1.442695, %v550_v55 }
 0x19c   : > { %v230_v58 = vsel %vm223_vm1, %v777_v56, 0.0 }
 0x19d   : > { %780 = vpow2.f32 %v551_v57  ;;  %231 = vadd.xlane.f32.xlu1 %v230_v58 }
 0x19f   : > { %v779_v59 = vpop.eup %778 }
 0x1a0   : > { %v445_v60 = vsel %vm223_vm1, %v779_v59, 0.0 }
 0x1a1   : > { %446 = vadd.xlane.f32.xlu0 %v445_v60 }
 0x1a7   : > { %v781_v61 = vpop.eup %780 }
 0x1a8   : > { %v553_v62 = vsel %vm223_vm1, %v781_v61, 0.0 }
 0x1a9   : > { %554 = vadd.xlane.f32.xlu1 %v553_v62 }
 0x226   : > { %v293_v6 = vpop.xlane.xlu0 %292 }
 0x227   : > { %782 = vrcp.f32 %v293_v6 }
 0x22a   : > { %v232_v8 = vpop.xlane.xlu1 %231 }
 0x22b   : > { %784 = vrcp.f32 %v232_v8 }
 0x22e   : > { %v447_v13 = vpop.xlane.xlu0 %446 }
 0x22f   : > { %786 = vrcp.f32 %v447_v13 }
 0x231   : > { %v783_v10 = vpop.eup %782 }
 0x232   : > { %v295_v12 = vmul.f32 %v783_v10, %v775_v52 }
 0x234   : > { %v296_v7 = vpack.c.bf16 %v295_v12, %v295_v12 }
 0x235   : > { %v785_v5 = vpop.eup %784 }
 0x236   : > { %717 = vmatmul.mubr.msk.bf16.vlgmr.msra.gmra.mrb[0].mxu0 %vm223_vm1, %v296_v7  ;;  %v234_v14 = vmul.f32 %v785_v5, %v777_v56  ;;  %v555_v18 = vpop.xlane.xlu1 %554 }
 0x237   : > { %721 = vmatpush3.bf16.msra.mxu0 %v349_v4  ;;  %722 = vmatprep.mubr.msk.bf16.mxu0 %vm799_vm0, %v798_v1  ;;  %788 = vrcp.f32 %v555_v18 }
 0x238   : > { %732 = vmatprep.subr.bf16.mxu0 %v798_v1  ;;  %v235_v16 = vpack.c.bf16 %v234_v14, %v234_v14 }
 0x239   : > { %v787_v19 = vpop.eup %786 }
 0x23a   : > { %v449_v20 = vmul.f32 %v787_v19, %v779_v59 }
 0x23c   : > { %v450_v21 = vpack.c.bf16 %v449_v20, %v449_v20 }
 0x241   : > { %v789_v23 = vpop.eup %788 }
 0x242   : > { %723 = vmatmul.mubr.msk.bf16.vlgmr.msra.gmra.mrb[0].mxu0 %vm223_vm1, %v235_v16  ;;  %v557_v24 = vmul.f32 %v789_v23, %v781_v61 }
 0x243   : > { %733 = vmatpush3.bf16.msra.mxu0 %v456_v17  ;;  %734 = vmatprep.mubr.msk.bf16.mxu0 %vm799_vm0, %v798_v1 }
 0x244   : > { %744 = vmatprep.subr.bf16.mxu0 %v798_v1  ;;  %v558_v25 = vpack.c.bf16 %v557_v24, %v557_v24 }
 0x24e   : > { %735 = vmatmul.mubr.msk.bf16.vlgmr.msra.gmra.mrb[0].mxu0 %vm223_vm1, %v450_v21 }
 0x24f   : > { %745 = vmatpush3.bf16.msra.mxu0 %v564_v22  ;;  %746 = vmatprep.mubr.msk.bf16.mxu0 %vm799_vm0, %v798_v1 }
 0x25a   : > { %747 = vmatmul.mubr.msk.bf16.vlgmr.msra.gmra.mrb[0].mxu0 %vm223_vm1, %v558_v25 }
 0x32d   : > { %v600_v11 = vpop.f32.mrb[0].mxu0 }
 0x32e   : > { %v607_v26 = vpack.c.bf16 %v600_v11, %v600_v11  ;;  %v748_v27 = vpop.f32.mrb[1].mxu0 }
 0x32f   : > { %v603_v28 = vpop.f32.mrb[2].mxu0 }
 0x330   : > { %608 = vst [vmem:[%s155_s21] sm:$0xf] %v607_v26  ;;  %v749_v29 = vpop.f32.mrb[3].mxu0 }
 0x331 PF: > { %s12_s9 = sadd.s32 1, %s796_s9  }
 0x332   : > { %p9_p4 = scmp.ge.s32.totalorder %s12_s9, 4  }
 0x334   :  { %11 = sbr.rel (!%p9_p4) target bundleno = 1 (0x1), region = 61 }

// kernel: decoder_stack_forward.18
= control target key start
LH: loop header
LB: loop body
LE: loop exit
PB: predicated region body
PF: predicated region fallthrough
CT: control target
= control target key end

     0   :  { %v453_v0 = vmov 0.0   ;;  %vm454_vm0 = vmmov 0   ;;  %v455_v3 = vmov 0   ;;  %v306_v27 = vlaneseq  ;;  %s566_s1 = inlined_call_operand.vmem [shape: bf16[128,384], index: 1, kind: input, shape index: {}]   ;;  %s567_s0 = inlined_call_operand.vmem [shape: bf16[16,128], index: 0, kind: input, shape index: {}]   ;;  %s568_s2 = inlined_call_operand.vmem [shape: f32[1,384], index: 2, kind: input, shape index: {}]   ;;  %s569_s3 = inlined_call_operand.vmem [shape: bf16[16,384], index: 3, kind: output, shape index: {}]  }
   0x1   :  { %397 = vmatprep.subr.bf16.mxu1 %v453_v0  ;;  %v420_v1 = vld [vmem:[%s566_s1 + $0x4] ss:$12 sps:$4 sm:$0xff]   ;;  %413 = vmatprep.mubr.msk.bf16.mxu1 %vm454_vm0, %v453_v0  ;;  %v422_v2 = vld [vmem:[%s566_s1 + $0x8] ss:$12 sps:$4 sm:$0xff]   ;;  %v423_v4 = vld [vmem:[%s566_s1] ss:$12 sps:$4 sm:$0xff]  }
   0x2   :  { %231 = vmatprep.mubr.bf16.mxu0 %v455_v3  ;;  %199 = vmatprep.subr.bf16.mxu0 %v420_v1  ;;  %v424_v5 = vld [vmem:[%s566_s1 + $0x1c] ss:$12 sps:$4 sm:$0xff]   ;;  %v426_v6 = vld [vmem:[%s566_s1 + $0x20] ss:$12 sps:$4 sm:$0xff]   ;;  %v427_v7 = vld [vmem:[%s566_s1 + $0x18] ss:$12 sps:$4 sm:$0xff]  }
   0x3   :  { %398 = vmatpush3.bf16.msra.mxu1 %v422_v2  ;;  %200 = vmatpush1.bf16.msra.mxu0 %v423_v4  ;;  %v428_v8 = vld [vmem:[%s566_s1 + $0x34] ss:$12 sps:$4 sm:$0xff]   ;;  %v430_v9 = vld [vmem:[%s566_s1 + $0x38] ss:$12 sps:$4 sm:$0xff]   ;;  %v431_v10 = vld [vmem:[%s566_s1 + $0x30] ss:$12 sps:$4 sm:$0xff]  }
   0x4   :  { %399 = vmatprep.subr.bf16.mxu1 %v453_v0  ;;  %201 = vmatprep.subr.bf16.mxu0 %v424_v5  ;;  %v432_v11 = vld [vmem:[%s566_s1 + $0x4c] ss:$12 sps:$4 sm:$0xff]   ;;  %v434_v12 = vld [vmem:[%s566_s1 + $0x50] ss:$12 sps:$4 sm:$0xff]   ;;  %v435_v13 = vld [vmem:[%s566_s1 + $0x48] ss:$12 sps:$4 sm:$0xff]  }
   0x5   :  { %v436_v14 = vld [vmem:[%s566_s1 + $0x64] ss:$12 sps:$4 sm:$0xff]   ;;  %v438_v15 = vld [vmem:[%s566_s1 + $0x68] ss:$12 sps:$4 sm:$0xff]   ;;  %v439_v16 = vld [vmem:[%s566_s1 + $0x60] ss:$12 sps:$4 sm:$0xff]  }
   0x6   :  { %v440_v17 = vld [vmem:[%s566_s1 + $0x7c] ss:$12 sps:$4 sm:$0xff]   ;;  %v442_v18 = vld [vmem:[%s566_s1 + $0x80] ss:$12 sps:$4 sm:$0xff]   ;;  %v443_v19 = vld [vmem:[%s566_s1 + $0x78] ss:$12 sps:$4 sm:$0xff]  }
   0x7   :  { %400 = vmatpush3.bf16.msra.mxu1 %v426_v6  ;;  %202 = vmatpush1.bf16.msra.mxu0 %v427_v7  ;;  %v444_v20 = vld [vmem:[%s566_s1 + $0x94] ss:$12 sps:$4 sm:$0xff]   ;;  %v446_v21 = vld [vmem:[%s566_s1 + $0x98] ss:$12 sps:$4 sm:$0xff]   ;;  %v447_v22 = vld [vmem:[%s566_s1 + $0x90] ss:$12 sps:$4 sm:$0xff]  }
   0x8   :  { %401 = vmatprep.subr.bf16.mxu1 %v453_v0  ;;  %203 = vmatprep.subr.bf16.mxu0 %v428_v8  ;;  %v448_v23 = vld [vmem:[%s566_s1 + $0xac] ss:$12 sps:$4 sm:$0xff]   ;;  %v450_v24 = vld [vmem:[%s566_s1 + $0xb0] ss:$12 sps:$4 sm:$0xff]   ;;  %v451_v25 = vld [vmem:[%s566_s1 + $0xa8] ss:$12 sps:$4 sm:$0xff]  }
   0x9   :  { %v452_v26 = vld [vmem:[%s567_s0] sm:$0xff]   ;;  %v307_v28 = vshrl.u32 %v306_v27, 7 }
   0xa   :  { %v304_v30 = vld [vmem:[%s568_s2] sm:$0x7] }
   0xb   :  { %402 = vmatpush3.bf16.msra.mxu1 %v430_v9  ;;  %204 = vmatpush1.bf16.msra.mxu0 %v431_v10  ;;  %v316_v29 = vsub.s32 2, %v307_v28  ;;  %v308_v31 = vsub.s32 0, %v307_v28  ;;  %v312_v32 = vsub.s32 1, %v307_v28 }
   0xc   :  { %403 = vmatprep.subr.bf16.mxu1 %v453_v0  ;;  %205 = vmatprep.subr.bf16.mxu0 %v432_v11 }
   0xd   :  { %v317_v33 = vrot.slane %v304_v30, %v316_v29  ;;  %v309_v34 = vrot.slane %v304_v30, %v308_v31  ;;  %v313_v35 = vrot.slane %v304_v30, %v312_v32 }
   0xf   :  { %404 = vmatpush3.bf16.msra.mxu1 %v434_v12  ;;  %206 = vmatpush1.bf16.msra.mxu0 %v435_v13 }
  0x10   :  { %405 = vmatprep.subr.bf16.mxu1 %v453_v0  ;;  %207 = vmatprep.subr.bf16.mxu0 %v436_v14 }
  0x13   :  { %406 = vmatpush3.bf16.msra.mxu1 %v438_v15  ;;  %208 = vmatpush1.bf16.msra.mxu0 %v439_v16 }
  0x14   :  { %407 = vmatprep.subr.bf16.mxu1 %v453_v0  ;;  %209 = vmatprep.subr.bf16.mxu0 %v440_v17 }
  0x17   :  { %408 = vmatpush3.bf16.msra.mxu1 %v442_v18  ;;  %210 = vmatpush1.bf16.msra.mxu0 %v443_v19 }
  0x18   :  { %409 = vmatprep.subr.bf16.mxu1 %v453_v0  ;;  %211 = vmatprep.subr.bf16.mxu0 %v444_v20 }
  0x1b   :  { %410 = vmatpush3.bf16.msra.mxu1 %v446_v21  ;;  %212 = vmatpush1.bf16.msra.mxu0 %v447_v22 }
  0x1c   :  { %411 = vmatprep.subr.bf16.mxu1 %v453_v0  ;;  %213 = vmatprep.subr.bf16.mxu0 %v448_v23 }
  0x1f   :  { %412 = vmatpush3.bf16.msra.mxu1 %v450_v24  ;;  %214 = vmatpush1.bf16.msra.mxu0 %v451_v25 }
  0x22   :  { %414 = vmatmul.mubr.bf16.vlgmr.msra.gmra.mrb[0].mxu1 %v452_v26  ;;  %232 = vmatmul.mubr.bf16.vlgmr.msra.gmra.mrb[0].mxu0 %v452_v26 }
  0xf5   :  { %v276_v36 = vpop.f32.mrb[0].mxu1  ;;  %v233_v38 = vpop.f32.mrb[0].mxu0 }
  0xf6   :  { %v323_v37 = vadd.f32 %v317_v33, %v276_v36  ;;  %v415_v39 = vpop.f32.mrb[1].mxu1  ;;  %v321_v40 = vadd.f32 %v309_v34, %v233_v38  ;;  %v235_v41 = vpop.f32.mrb[1].mxu0 }
  0xf7   :  { %v279_v42 = vpop.f32.mrb[2].mxu1  ;;  %v322_v44 = vadd.f32 %v313_v35, %v235_v41  ;;  %v237_v46 = vpop.f32.mrb[2].mxu0 }
  0xf8   :  { %v385_v43 = vpack.c.bf16 %v323_v37, %v323_v37  ;;  %v326_v45 = vadd.f32 %v317_v33, %v279_v42  ;;  %v416_v47 = vpop.f32.mrb[3].mxu1  ;;  %v324_v48 = vadd.f32 %v309_v34, %v237_v46  ;;  %v239_v49 = vpop.f32.mrb[3].mxu0 }
  0xf9   :  { %v384_v50 = vpack.c.bf16 %v322_v44, %v321_v40  ;;  %v325_v52 = vadd.f32 %v313_v35, %v239_v49 }
  0xfa   :  { %348 = vst [vmem:[%s569_s3 + $0x8] sm:$0xf] %v385_v43  ;;  %v387_v51 = vpack.c.bf16 %v326_v45, %v326_v45 }
  0xfb   :  { %347 = vst [vmem:[%s569_s3] sm:$0xff] %v384_v50  ;;  %v386_v53 = vpack.c.bf16 %v325_v52, %v324_v48 }
  0xfc   :  { %350 = vst [vmem:[%s569_s3 + $0x14] sm:$0xf] %v387_v51 }
  0xfd   :  { %349 = vst [vmem:[%s569_s3 + $0xc] sm:$0xff] %v386_v53 }

// kernel: decoder_stack_forward.24
= control target key start
LH: loop header
LB: loop body
LE: loop exit
PB: predicated region body
PF: predicated region fallthrough
CT: control target
= control target key end

     0   :  { %11 = vsyncpa [#allocation4], 0  ;;  %s557_s0 = inlined_call_operand.vmem [shape: bf16[16,128], index: 0, kind: input, shape index: {}]   ;;  %s558_s1 = inlined_call_operand.hbm [shape: bf16[128,128], index: 1, kind: input, shape index: {}]   ;;  %s559_s2 = inlined_call_operand.hbm [shape: f32[1,128], index: 2, kind: input, shape index: {}]   ;;  %s560_s3 = inlined_call_operand.vmem [shape: bf16[16,128], index: 3, kind: input, shape index: {}]   ;;  %s561_s4 = inlined_call_operand.hbm [shape: f32[1,128], index: 4, kind: input, shape index: {}]   ;;  %s562_s5 = inlined_call_operand.hbm [shape: f32[1,128], index: 5, kind: input, shape index: {}]   ;;  %s563_s6 = inlined_call_operand.vmem [shape: bf16[16,128], index: 6, kind: output, shape index: {}]  }
   0x1   :  { %12 = vsyncpa [#allocation6], 0 }
   0x2   :  { %13 = vsyncpa [#allocation9], 0  ;;  %s450_s21 = smov [#allocation5]   ;;  %s451_s23 = smov [#allocation3]  }
   0x3   :  { %s34_s22 = sshll.u32 %s450_s21, 4  ;;  %s21_s24 = sshll.u32 %s451_s23, 4  ;;  %s35_s22 = int_to_ptr.vmem [resolvable:$true] %s34_s22  ;;  %s493_s24 = int_to_ptr.vmem [resolvable:$true] %s21_s24 }
   0x4   :  { %s356_s27 = scalar_lea.hbm %s559_s2, 16 }
   0x5   :  { %p357_p0 = scmp.ne.s32.totalorder %s559_s2, %s356_s27  ;;  %p360_p1 = scmp.lt.u32.totalorder %s356_s27, %s559_s2 }
   0x7   :  { %p362_p2 = pnand %p360_p1, %p357_p0 }
   0x9   :  { %365 = shalt.err (!%p362_p2)
}
   0xa   :  { %s366_s8 = scalar_lea.vmem %s35_s22, 16  ;;  %s370_s9 = scalar_lea.vmem %s35_s22, 32 }
   0xb   :  { %p367_p3 = scmp.ne.s32.totalorder %s35_s22, %s366_s8  ;;  %p371_p4 = scmp.lt.s32.totalorder %s35_s22, %s35_s22 }
   0xc   :  { %p372_p5 = scmp.lt.s32.totalorder %s370_s9, %s366_s8 }
   0xe   :  { %p373_p6 = por %p372_p5, %p371_p4 }
  0x10   :  { %p374_p7 = pnand %p373_p6, %p367_p3 }
  0x12   :  { %377 = shalt.err (!%p374_p7)
}
  0x13   :  { %37 = dma.hbm_to_vmem [thread:$0]  %s559_s2, 16, %s35_s22, [#allocation6]  }
  0x14   :  { %s378_s14 = scalar_lea.hbm %s558_s1, 1024 }
  0x15   :  { %p379_p8 = scmp.ne.s32.totalorder %s558_s1, %s378_s14  ;;  %p382_p9 = scmp.lt.u32.totalorder %s378_s14, %s558_s1 }
  0x17   :  { %p384_p10 = pnand %p382_p9, %p379_p8 }
  0x19   :  { %387 = shalt.err (!%p384_p10)
}
  0x1a   :  { %s388_s19 = scalar_lea.vmem %s493_s24, 1024  ;;  %p393_p12 = scmp.lt.s32.totalorder %s493_s24, %s493_s24 }
  0x1b   :  { %p389_p11 = scmp.ne.s32.totalorder %s493_s24, %s388_s19  ;;  %p394_p13 = scmp.lt.s32.totalorder %s388_s19, %s388_s19 }
  0x1d   :  { %p395_p0 = por %p394_p13, %p393_p12 }
  0x1f   :  { %p396_p1 = pnand %p395_p0, %p389_p11 }
  0x21   :  { %399 = shalt.err (!%p396_p1)
}
  0x22   :  { %s452_s2 = smov 64   ;;  %s453_s20 = smov 4  }
  0x23   :  { %27 = dma.hbm_to_vmem [thread:$0]  %s558_s1, 1024, %s493_s24, [#allocation4], %s452_s2, %s452_s2, %s453_s20  }
  0x24   :  { %s454_s23 = smov [#allocation7]   ;;  %s455_s26 = smov [#allocation8]  }
  0x25   :  { %s46_s25 = sshll.u32 %s454_s23, 4  ;;  %s56_s27 = sshll.u32 %s455_s26, 4  ;;  %s47_s25 = int_to_ptr.vmem [resolvable:$true] %s46_s25  ;;  %s57_s27 = int_to_ptr.vmem [resolvable:$true] %s56_s27 }
  0x26   :  { %s400_s30 = scalar_lea.hbm %s561_s4, 16 }
  0x27   :  { %p401_p2 = scmp.ne.s32.totalorder %s561_s4, %s400_s30  ;;  %p404_p3 = scmp.lt.u32.totalorder %s400_s30, %s561_s4 }
  0x29   :  { %p406_p4 = pnand %p404_p3, %p401_p2 }
  0x2b   :  { %409 = shalt.err (!%p406_p4)
}
  0x2c   :  { %s410_s1 = scalar_lea.vmem %s47_s25, 16  ;;  %s414_s24 = scalar_lea.vmem %s47_s25, 32 }
  0x2d   :  { %p411_p5 = scmp.ne.s32.totalorder %s47_s25, %s410_s1  ;;  %p415_p6 = scmp.lt.s32.totalorder %s47_s25, %s47_s25 }
  0x2e   :  { %p416_p7 = scmp.lt.s32.totalorder %s414_s24, %s410_s1 }
  0x30   :  { %p417_p8 = por %p416_p7, %p415_p6 }
  0x32   :  { %p418_p9 = pnand %p417_p8, %p411_p5 }
  0x34   :  { %421 = shalt.err (!%p418_p9)
}
  0x35   :  { %49 = dma.hbm_to_vmem [thread:$0]  %s561_s4, 16, %s47_s25, [#allocation6]  }
  0x36   :  { %s422_s15 = scalar_lea.hbm %s562_s5, 16 }
  0x37   :  { %p423_p10 = scmp.ne.s32.totalorder %s562_s5, %s422_s15  ;;  %p426_p11 = scmp.lt.u32.totalorder %s422_s15, %s562_s5 }
  0x39   :  { %p428_p12 = pnand %p426_p11, %p423_p10 }
  0x3b   :  { %431 = shalt.err (!%p428_p12)
}
  0x3c   :  { %s432_s2 = scalar_lea.vmem %s57_s27, 16  ;;  %s436_s20 = scalar_lea.vmem %s57_s27, 32 }
  0x3d   :  { %p433_p13 = scmp.ne.s32.totalorder %s57_s27, %s432_s2  ;;  %p437_p0 = scmp.lt.s32.totalorder %s57_s27, %s57_s27 }
  0x3e   :  { %p438_p1 = scmp.lt.s32.totalorder %s436_s20, %s432_s2 }
  0x40   :  { %p439_p2 = por %p438_p1, %p437_p0 }
  0x42   :  { %p440_p3 = pnand %p439_p2, %p433_p13 }
  0x44   :  { %443 = shalt.err (!%p440_p3)
}
  0x45   :  { %59 = dma.hbm_to_vmem [thread:$0]  %s562_s5, 16, %s57_s27, [#allocation9]  }
  0x46   :  { %444 = dma.done.wait [#allocation4], 1024  }
  0x47   :  { %445 = vsyncadd [#allocation4], 4294966272 }
  0x48   :  { %446 = dma.done.wait [#allocation6], 32  }
  0x49   :  { %447 = vsyncadd [#allocation6], 4294967264 }
  0x4a   :  { %448 = dma.done.wait [#allocation9], 16  }
  0x4b   :  { %449 = vsyncadd [#allocation9], 4294967280  ;;  %v456_v0 = vmov 0.0   ;;  %vm457_vm0 = vmmov 0   ;;  %v343_v1 = vld [vmem:[#allocation3] sm:$0xff]   ;;  %v344_v2 = vld [vmem:[#allocation3 + $0x8] sm:$0xff]  }
  0x4c   :  { %315 = vmatprep.subr.bf16.mxu0 %v456_v0  ;;  %331 = vmatprep.mubr.msk.bf16.mxu0 %vm457_vm0, %v456_v0  ;;  %v345_v3 = vld [vmem:[#allocation3 + $0x10] sm:$0xff]   ;;  %v346_v4 = vld [vmem:[#allocation3 + $0x18] sm:$0xff]   ;;  %v347_v5 = vld [vmem:[#allocation3 + $0x20] sm:$0xff]  }
  0x4d   :  { %316 = vmatpush3.bf16.msra.mxu0 %v343_v1  ;;  %v348_v6 = vld [vmem:[#allocation3 + $0x28] sm:$0xff]   ;;  %v349_v7 = vld [vmem:[#allocation3 + $0x30] sm:$0xff]   ;;  %v350_v8 = vld [vmem:[#allocation3 + $0x38] sm:$0xff]  }
  0x4e   :  { %317 = vmatprep.subr.bf16.mxu0 %v456_v0  ;;  %v351_v9 = vld [vmem:[%s557_s0] sm:$0xff]  }
  0x4f   :  { %v298_v10 = vld [vmem:[%s560_s3] sm:$0xff]  }
  0x50   :  { %v290_v11 = vld [vmem:[#allocation5] ss:$0 sm:$0xff]  ;;  %v299_v12 = vunpack.c.l.bf16 %v298_v10  ;;  %v300_v16 = vunpack.c.h.bf16 %v298_v10  ;;  %v291_v43 = vld [vmem:[#allocation7] ss:$0 sm:$0xff]  ;;  %v292_v48 = vld [vmem:[#allocation8] ss:$0 sm:$0xff] }
  0x51   :  { %318 = vmatpush3.bf16.msra.mxu0 %v344_v2 }
  0x52   :  { %319 = vmatprep.subr.bf16.mxu0 %v456_v0 }
  0x55   :  { %320 = vmatpush3.bf16.msra.mxu0 %v345_v3 }
  0x56   :  { %321 = vmatprep.subr.bf16.mxu0 %v456_v0 }
  0x59   :  { %322 = vmatpush3.bf16.msra.mxu0 %v346_v4 }
  0x5a   :  { %323 = vmatprep.subr.bf16.mxu0 %v456_v0 }
  0x5d   :  { %324 = vmatpush3.bf16.msra.mxu0 %v347_v5 }
  0x5e   :  { %325 = vmatprep.subr.bf16.mxu0 %v456_v0 }
  0x61   :  { %326 = vmatpush3.bf16.msra.mxu0 %v348_v6 }
  0x62   :  { %327 = vmatprep.subr.bf16.mxu0 %v456_v0 }
  0x65   :  { %328 = vmatpush3.bf16.msra.mxu0 %v349_v7 }
  0x66   :  { %329 = vmatprep.subr.bf16.mxu0 %v456_v0 }
  0x69   :  { %330 = vmatpush3.bf16.msra.mxu0 %v350_v8 }
  0x6c   :  { %332 = vmatmul.mubr.bf16.vlgmr.msra.gmra.mrb[0].mxu0 %v351_v9 }
 0x13f   :  { %v187_v13 = vpop.f32.mrb[0].mxu0 }
 0x140   :  { %v210_v14 = vadd.f32 %v290_v11, %v187_v13  ;;  %v333_v15 = vpop.f32.mrb[1].mxu0 }
 0x141   :  { %v190_v17 = vpop.f32.mrb[2].mxu0 }
 0x142   :  { %v216_v18 = vadd.f32 %v299_v12, %v210_v14  ;;  %v211_v19 = vadd.f32 %v290_v11, %v190_v17  ;;  %v334_v20 = vpop.f32.mrb[3].mxu0 }
 0x144   :  { %v217_v21 = vadd.f32 %v300_v16, %v211_v19  ;;  %218 = vadd.xlane.f32.xlu0 %v216_v18  ;;  %v224_v22 = vmul.f32 %v216_v18, %v216_v18 }
 0x146   :  { %226 = vadd.xlane.f32.xlu1 %v224_v22  ;;  %v225_v23 = vmul.f32 %v217_v21, %v217_v21 }
 0x148   :  { %220 = vadd.xlane.f32.xlu0 %v217_v21 }
 0x14a   :  { %228 = vadd.xlane.f32.xlu1 %v225_v23 }
 0x1d1   :  { %v219_v24 = vpop.xlane.xlu0 %218 }
 0x1d2   :  { %v222_v25 = vmul.f32 0.03125, %v219_v24 }
 0x1d3   :  { %v227_v26 = vpop.xlane.xlu1 %226 }
 0x1d4   :  { %v232_v27 = vmul.f32 %v222_v25, %v222_v25  ;;  %v230_v28 = vmul.f32 0.03125, %v227_v26  ;;  %v238_v40 = vsub.f32 %v216_v18, %v222_v25 }
 0x1d5   :  { %v221_v29 = vpop.xlane.xlu0 %220 }
 0x1d6   :  { %v234_v30 = vsub.f32 %v230_v28, %v232_v27  ;;  %v223_v31 = vmul.f32 0.03125, %v221_v29 }
 0x1d7   :  { %v229_v32 = vpop.xlane.xlu1 %228 }
 0x1d8   :  { %v236_v33 = vmax.f32 %v234_v30, 0.0  ;;  %v233_v34 = vmul.f32 %v223_v31, %v223_v31  ;;  %v231_v35 = vmul.f32 0.03125, %v229_v32  ;;  %v239_v44 = vsub.f32 %v217_v21, %v223_v31 }
 0x1da   :  { %v240_v36 = vadd.f32 1e-05, %v236_v33  ;;  %v235_v37 = vsub.f32 %v231_v35, %v233_v34 }
 0x1dc   :  { %352 = vrsqrt.f32 %v240_v36  ;;  %v237_v38 = vmax.f32 %v235_v37, 0.0 }
 0x1de   :  { %v241_v39 = vadd.f32 1e-05, %v237_v38 }
 0x1e0   :  { %354 = vrsqrt.f32 %v241_v39 }
 0x1e6   :  { %v353_v41 = vpop.eup %352 }
 0x1e7   :  { %v244_v42 = vmul.f32 %v353_v41, %v238_v40 }
 0x1e9   :  { %v253_v46 = vmul.f32 %v291_v43, %v244_v42 }
 0x1ea   :  { %v355_v45 = vpop.eup %354 }
 0x1eb   :  { %v245_v47 = vmul.f32 %v355_v45, %v239_v44  ;;  %v262_v50 = vadd.f32 %v292_v48, %v253_v46 }
 0x1ed   :  { %v254_v49 = vmul.f32 %v291_v43, %v245_v47 }
 0x1ef   :  { %v263_v51 = vadd.f32 %v292_v48, %v254_v49 }
 0x1f1   :  { %v304_v52 = vpack.c.bf16 %v263_v51, %v262_v50 }
 0x1f3   :  { %305 = vst [vmem:[%s563_s6] sm:$0xff] %v304_v52  }
 0x1f4   :  { %278 = vsyncpa [#allocation4], 1 }
 0x1f5   :  { %279 = vsyncpa [#allocation6], 1 }
 0x1f6   :  { %280 = vsyncpa [#allocation9], 1 }

// kernel: decoder_stack_forward.23
= control target key start
LH: loop header
LB: loop body
LE: loop exit
PB: predicated region body
PF: predicated region fallthrough
CT: control target
= control target key end

     0   :  { %s868_s12 = smov 0   ;;  %s1006_s0 = inlined_call_operand.vmem [shape: bf16[2,8,128], index: 0, kind: input, shape index: {}]   ;;  %s1007_s1 = inlined_call_operand.vmem [shape: bf16[2,8,256], index: 1, kind: input, shape index: {}]   ;;  %s1008_s2 = inlined_call_operand.vmem [shape: f32[2,1,8], index: 2, kind: input, shape index: {}]   ;;  %s1009_s3 = inlined_call_operand.vmem [shape: bf16[2,8,128], index: 3, kind: output, shape index: {}]  }
   0x1 LB: > { %s719_s13 = sadd.s32 4294967295, %s844_s12   ;;  %p723_p0 = scmp.ge.s32.totalorder %s844_s12, 1  ;;  %s844_s12 = sphi %s868_s12, %s13_s12  }
   0x2   : > { %p154_p1 = scmp.lt.s32.totalorder %s844_s12, 3 }
   0x4   : > { %p155_p2 = pnand %p723_p0, %p154_p1 }
   0x5   : > { %p184_p3 = scmp.lt.s32.totalorder (!%p155_p2), %s719_s13, 1  ;;  %v204_v0 = vlaneseq (!%p155_p2)  ;;  %v846_v1 = vmov (!%p155_p2), 0.0   ;;  %vm847_vm0 = vmmov (!%p155_p2), 0   ;;  %vm259_vm15 = vcmask (!%p155_p2), 64512  }
   0x6   : > { %158 = sbr.rel (%p155_p2) target bundleno = 813 (0x32d), region = 32  ;;  %752 = vmatprep.subr.bf16.mxu1 (!%p155_p2), %v846_v1  ;;  %754 = vmatprep.mubr.msk.bf16.mxu1 (!%p155_p2), %vm847_vm0, %v846_v1 }
   0x7   : > { %v205_v2 = vand.u32 (!%p155_p2), 127, %v204_v0  ;;  %764 = vmatprep.subr.bf16.mxu0 (!%p155_p2), %v846_v1  ;;  %766 = vmatprep.mubr.msk.bf16.mxu0 (!%p155_p2), %vm847_vm0, %v846_v1 }
   0x9   : > { %vm207_vm1 = vcmp.lt.s32.totalorder (!%p155_p2), %v205_v2, 8  ;;  %vm276_vm3 = vcmp.ge.s32.totalorder (!%p155_p2), %v205_v2, 8  ;;  %vm277_vm4 = vcmp.lt.s32.totalorder (!%p155_p2), %v205_v2, 16  ;;  %vm429_vm7 = vcmp.ge.s32.totalorder (!%p155_p2), %v205_v2, 16 }
   0xa   : > { %vm897_vm2 = vmpackc.low (!%p155_p2), %vm207_vm1, %vm207_vm1  ;;  %vm430_vm8 = vcmp.lt.s32.totalorder (!%p155_p2), %v205_v2, 24  ;;  %vm536_vm11 = vcmp.ge.s32.totalorder (!%p155_p2), %v205_v2, 24  ;;  %vm537_vm12 = vcmp.lt.s32.totalorder (!%p155_p2), %v205_v2, 32  ;;  %vm339_vm1 = vcmask (!%p155_p2), 1043456  }
   0xb   : > { %vm904_vm5 = vmand (!%p155_p2), %vm276_vm3, %vm277_vm4 }
   0xc   : > { %vm281_vm6 = vmpackc.low (!%p155_p2), %vm904_vm5, %vm904_vm5 }
   0xd   : > { %s1019_s13 = smov (!%p184_p3, %s719_s13), 1  ;;  %vm920_vm9 = vmand %vm429_vm7, %vm430_vm8 }
   0xe   : > { %s735_s14 = sshll.u32 %s1019_s13, 3  ;;  %s724_s15 = sshll.u32 %s1019_s13, 2  ;;  %vm434_vm10 = vmpackc.low %vm920_vm9, %vm920_vm9 }
   0xf   : > { %s192_s18 = scalar_lea.vmem %s1007_s1, %s735_s14  ;;  %s187_s21 = scalar_lea.vmem %s1006_s0, %s724_s15  ;;  %vm936_vm13 = vmand %vm536_vm11, %vm537_vm12 }
  0x10   : > { %v894_v3 = vld [vmem:[%s192_s18] sm:$0xff]  ;;  %vm541_vm14 = vmpackc.low %vm936_vm13, %vm936_vm13  ;;  %s195_s24 = scalar_lea.vmem %s1008_s2, %s1019_s13  ;;  %s199_s27 = scalar_lea.vmem %s1009_s3, %s724_s15 }
  0x11   : > { %753 = vmatpush3.bf16.xpose.msra.mxu1 %v894_v3  ;;  %v201_v4 = vld [vmem:[%s187_s21] sm:$0xf]  ;;  %v273_v58 = vrot.slane %v894_v3, 4 }
  0x12   : > { %758 = vmatprep.subr.bf16.mxu1 %v846_v1  ;;  %v212_v6 = vsel %vm897_vm2, %v201_v4, 0  ;;  %v282_v8 = vsel %vm281_vm6, %v201_v4, 0  ;;  %v435_v10 = vsel %vm434_vm10, %v201_v4, 0  ;;  %v542_v12 = vsel %vm541_vm14, %v201_v4, 0  ;;  %v728_v13 = vld [vmem:[%s195_s24] ss:$0 sm:$0xff] }
  0x13   : > { %v335_v59 = vsel %vm281_vm6, %v273_v58, 0  ;;  %v275_v61 = vsel %vm897_vm2, %v273_v58, 0  ;;  %v595_v9 = vsel %vm541_vm14, %v273_v58, 0 }
  0x14   : > { %v341_v60 = vsel %vm339_vm1, %v335_v59, 0  ;;  %v387_v62 = vsel %vm339_vm1, %v275_v61, 0 }
  0x15   : > { %765 = vmatpush3.bf16.msra.mxu0 %v341_v60 }
  0x16   : > { %770 = vmatprep.subr.bf16.mxu0 %v846_v1 }
  0x18   : > { %755 = vmatmul.mubr.bf16.vlgmr.msra.gmra.mrb[0].mxu1 %v212_v6 }
  0x19   : > { %759 = vmatpush3.bf16.xpose.msra.mxu1 %v894_v3  ;;  %760 = vmatprep.mubr.msk.bf16.mxu1 %vm847_vm0, %v846_v1 }
  0x1a   : > { %776 = vmatprep.subr.bf16.mxu1 %v846_v1 }
  0x20   : > { %761 = vmatmul.mubr.bf16.vlgmr.msra.gmra.mrb[4].mxu1 %v282_v8  ;;  %v488_v8 = vsel %vm434_vm10, %v273_v58, 0 }
  0x21   : > { %777 = vmatpush3.bf16.xpose.msra.mxu1 %v894_v3  ;;  %778 = vmatprep.mubr.msk.bf16.mxu1 %vm847_vm0, %v846_v1 }
  0x22   : > { %788 = vmatprep.subr.bf16.mxu1 %v846_v1 }
  0x28   : > { %779 = vmatmul.mubr.bf16.vlgmr.msra.gmra.mrb[8].mxu1 %v435_v10 }
  0x29   : > { %789 = vmatpush3.bf16.xpose.msra.mxu1 %v894_v3  ;;  %790 = vmatprep.mubr.msk.bf16.mxu1 %vm847_vm0, %v846_v1 }
  0x30   : > { %791 = vmatmul.mubr.bf16.vlgmr.msra.gmra.mrb[12].mxu1 %v542_v12  ;;  %v493_v12 = vsel %vm339_vm1, %v488_v8, 0 }
  0xeb   : > { %v253_v14 = vpop.f32.mrb[0].mxu1 }
  0xec   : > { %v254_v15 = vadd.f32 %v728_v13, %v253_v14  ;;  %v756_v16 = vpop.f32.mrb[1].mxu1 }
  0xed   : > { %v256_v17 = vpop.f32.mrb[2].mxu1 }
  0xee   : > { %v757_v18 = vpop.f32.mrb[3].mxu1  ;;  %v260_v25 = vsel %vm259_vm15, %v254_v15, -inf  ;;  %v600_v17 = vsel %vm339_vm1, %v595_v9, 0 }
  0xf3   : > { %v317_v19 = vpop.f32.mrb[4].mxu1 }
  0xf4   : > { %v318_v20 = vadd.f32 %v728_v13, %v317_v19  ;;  %v762_v21 = vpop.f32.mrb[5].mxu1 }
  0xf5   : > { %v320_v22 = vpop.f32.mrb[6].mxu1 }
  0xf6   : > { %v763_v23 = vpop.f32.mrb[7].mxu1  ;;  %v323_v24 = vsel %vm259_vm15, %v318_v20, -inf }
  0xf7   : > { %324 = vmax.xlane.f32.xlu0 %v323_v24 }
  0xfb   : > { %261 = vmax.xlane.f32.xlu0 %v260_v25  ;;  %v470_v26 = vpop.f32.mrb[8].mxu1 }
  0xfc   : > { %v471_v27 = vadd.f32 %v728_v13, %v470_v26  ;;  %v780_v28 = vpop.f32.mrb[9].mxu1 }
  0xfd   : > { %v473_v29 = vpop.f32.mrb[10].mxu1 }
  0xfe   : > { %v476_v30 = vsel %vm259_vm15, %v471_v27, -inf  ;;  %v781_v31 = vpop.f32.mrb[11].mxu1 }
  0xff   : > { %477 = vmax.xlane.f32.xlu1 %v476_v30 }
 0x103   : > { %v577_v32 = vpop.f32.mrb[12].mxu1 }
 0x104   : > { %v578_v33 = vadd.f32 %v728_v13, %v577_v32  ;;  %v792_v34 = vpop.f32.mrb[13].mxu1 }
 0x105   : > { %v580_v35 = vpop.f32.mrb[14].mxu1 }
 0x106   : > { %v583_v36 = vsel %vm259_vm15, %v578_v33, -inf  ;;  %v793_v37 = vpop.f32.mrb[15].mxu1 }
 0x107   : > { %584 = vmax.xlane.f32.xlu1 %v583_v36 }
 0x184   : > { %v325_v38 = vpop.xlane.xlu0 %324 }
 0x185   : > { %v326_v39 = vsub.f32 %v318_v20, %v325_v38 }
 0x187   : > { %v327_v40 = vmul.f32 1.442695, %v326_v39 }
 0x188   : > { %v262_v41 = vpop.xlane.xlu0 %261 }
 0x189   : > { %822 = vpow2.f32 %v327_v40  ;;  %v263_v42 = vsub.f32 %v254_v15, %v262_v41 }
 0x18b   : > { %v264_v43 = vmul.f32 1.442695, %v263_v42 }
 0x18c   : > { %v478_v44 = vpop.xlane.xlu1 %477 }
 0x18d   : > { %824 = vpow2.f32 %v264_v43  ;;  %v479_v45 = vsub.f32 %v471_v27, %v478_v44 }
 0x18f   : > { %v480_v46 = vmul.f32 1.442695, %v479_v45 }
 0x191   : > { %826 = vpow2.f32 %v480_v46 }
 0x193   : > { %v823_v47 = vpop.eup %822 }
 0x194   : > { %v585_v48 = vpop.xlane.xlu1 %584  ;;  %v329_v49 = vsel %vm259_vm15, %v823_v47, 0.0 }
 0x195   : > { %v586_v50 = vsub.f32 %v578_v33, %v585_v48  ;;  %330 = vadd.xlane.f32.xlu0 %v329_v49 }
 0x197   : > { %v825_v51 = vpop.eup %824  ;;  %v587_v52 = vmul.f32 1.442695, %v586_v50 }
 0x198   : > { %v266_v53 = vsel %vm259_vm15, %v825_v51, 0.0 }
 0x199   : > { %828 = vpow2.f32 %v587_v52  ;;  %267 = vadd.xlane.f32.xlu1 %v266_v53 }
 0x19b   : > { %v827_v54 = vpop.eup %826 }
 0x19c   : > { %v482_v55 = vsel %vm259_vm15, %v827_v54, 0.0 }
 0x19d   : > { %483 = vadd.xlane.f32.xlu0 %v482_v55 }
 0x1a3   : > { %v829_v56 = vpop.eup %828 }
 0x1a4   : > { %v589_v57 = vsel %vm259_vm15, %v829_v56, 0.0 }
 0x1a5   : > { %590 = vadd.xlane.f32.xlu1 %v589_v57 }
 0x222   : > { %v331_v63 = vpop.xlane.xlu0 %330 }
 0x223   : > { %830 = vrcp.f32 %v331_v63 }
 0x226   : > { %v268_v0 = vpop.xlane.xlu1 %267 }
 0x227   : > { %832 = vrcp.f32 %v268_v0 }
 0x22a   : > { %v484_v6 = vpop.xlane.xlu0 %483 }
 0x22b   : > { %834 = vrcp.f32 %v484_v6 }
 0x22d   : > { %v831_v2 = vpop.eup %830 }
 0x22e   : > { %v333_v3 = vmul.f32 %v831_v2, %v823_v47 }
 0x230   : > { %v334_v4 = vpack.c.bf16 %v333_v3, %v333_v3 }
 0x231   : > { %v833_v5 = vpop.eup %832 }
 0x232   : > { %767 = vmatmul.mubr.msk.bf16.vlgmr.msra.gmra.mrb[0].mxu0 %vm259_vm15, %v334_v4  ;;  %v270_v7 = vmul.f32 %v833_v5, %v825_v51  ;;  %v591_v13 = vpop.xlane.xlu1 %590 }
 0x233   : > { %771 = vmatpush3.bf16.msra.mxu0 %v387_v62  ;;  %772 = vmatprep.mubr.msk.bf16.mxu0 %vm847_vm0, %v846_v1  ;;  %836 = vrcp.f32 %v591_v13 }
 0x234   : > { %782 = vmatprep.subr.bf16.mxu0 %v846_v1  ;;  %v271_v10 = vpack.c.bf16 %v270_v7, %v270_v7 }
 0x235   : > { %v835_v14 = vpop.eup %834 }
 0x236   : > { %v486_v15 = vmul.f32 %v835_v14, %v827_v54 }
 0x238   : > { %v487_v16 = vpack.c.bf16 %v486_v15, %v486_v15 }
 0x23d   : > { %v837_v18 = vpop.eup %836 }
 0x23e   : > { %773 = vmatmul.mubr.msk.bf16.vlgmr.msra.gmra.mrb[0].mxu0 %vm259_vm15, %v271_v10  ;;  %v593_v19 = vmul.f32 %v837_v18, %v829_v56 }
 0x23f   : > { %783 = vmatpush3.bf16.msra.mxu0 %v493_v12  ;;  %784 = vmatprep.mubr.msk.bf16.mxu0 %vm847_vm0, %v846_v1 }
 0x240   : > { %794 = vmatprep.subr.bf16.mxu0 %v846_v1  ;;  %v594_v20 = vpack.c.bf16 %v593_v19, %v593_v19 }
 0x24a   : > { %785 = vmatmul.mubr.msk.bf16.vlgmr.msra.gmra.mrb[0].mxu0 %vm259_vm15, %v487_v16 }
 0x24b   : > { %795 = vmatpush3.bf16.msra.mxu0 %v600_v17  ;;  %796 = vmatprep.mubr.msk.bf16.mxu0 %vm847_vm0, %v846_v1 }
 0x256   : > { %797 = vmatmul.mubr.msk.bf16.vlgmr.msra.gmra.mrb[0].mxu0 %vm259_vm15, %v594_v20 }
 0x329   : > { %v636_v11 = vpop.f32.mrb[0].mxu0 }
 0x32a   : > { %v643_v21 = vpack.c.bf16 %v636_v11, %v636_v11  ;;  %v798_v22 = vpop.f32.mrb[1].mxu0 }
 0x32b   : > { %v639_v23 = vpop.f32.mrb[2].mxu0 }
 0x32c   : > { %644 = vst [vmem:[%s199_s27] sm:$0xf] %v643_v21  ;;  %v799_v24 = vpop.f32.mrb[3].mxu0 }
 0x32d PF: > { %s13_s12 = sadd.s32 1, %s844_s12  }
 0x32e   : > { %p10_p4 = scmp.ge.s32.totalorder %s13_s12, 4  }
 0x330   :  { %12 = sbr.rel (!%p10_p4) target bundleno = 1 (0x1), region = 68 }

// kernel: decoder_stack_forward.25
= control target key start
LH: loop header
LB: loop body
LE: loop exit
PB: predicated region body
PF: predicated region fallthrough
CT: control target
= control target key end

     0   :  { %8 = vsyncpa [#allocation5], 0  ;;  %s1397_s0 = inlined_call_operand.vmem [shape: bf16[16,128], index: 0, kind: input, shape index: {}]   ;;  %s1398_s1 = inlined_call_operand.vmem [shape: bf16[128,1024], index: 1, kind: input, shape index: {}]   ;;  %s1399_s2 = inlined_call_operand.hbm [shape: f32[1,1024], index: 2, kind: input, shape index: {}]   ;;  %s1400_s3 = inlined_call_operand.vmem [shape: bf16[16,1024], index: 3, kind: output, shape index: {}]  }
   0x1   :  { %10 = vsyncpa [#allocation5 + $0x1], 0  ;;  %s1166_s12 = smov 0   ;;  %s1168_s13 = smov 0  }
   0x2   :  { %s1170_s14 = smov 0   ;;  %s1172_s15 = smov 0  }
   0x3   :  { %s1174_s16 = smov 0   ;;  %s1176_s17 = smov 0  }
   0x4 LB: > { %s900_s18 = sadd.s32 4294967295, %s1142_s17   ;;  %s31_s19 = sadd.s32 1, %s1138_s16  ;;  %s1142_s17 = sphi %s1176_s17, %s16_s17   ;;  %s1138_s16 = sphi %s1174_s16, %s1411_s16   ;;  %s1134_s15 = sphi %s1172_s15, %s1410_s15   ;;  %s1130_s14 = sphi %s1170_s14, %s1409_s14   ;;  %s1126_s13 = sphi %s1168_s13, %s1408_s13   ;;  %s1122_s12 = sphi %s1166_s12, %s1407_s12  }
   0x5   : > { %p33_p0 = scmp.ge.s32.totalorder %s31_s19, 2  ;;  %s72_s20 = sadd.s32 1, %s1130_s14 }
   0x6   : > { %p79_p1 = scmp.ne.s32.totalorder %s1130_s14, %s1126_s13  ;;  %p80_p2 = scmp.eq.s32.totalorder %s1142_s17, 0 }
   0x7   : > { %s1413_s19 = smov (%p33_p0, %s31_s19), 0  ;;  %p111_p4 = scmp.ne.s32.totalorder %s1126_s13, %s1122_s12 }
   0x8   : > { %p1202_p3 = por %p80_p2, %p79_p1  ;;  %s68_s22 = ssub.s32 %s1138_s16, %s1413_s19 }
   0x9   : > { %p112_p5 = scmp.eq.s32.totalorder %s900_s18, 0  ;;  %p70_p6 = scmp.eq.s32.totalorder %s68_s22, 0 }
   0xa   : > { %p137_p7 = scmp.eq.s32.totalorder %s900_s18, 1  ;;  %p904_p10 = scmp.ge.s32.totalorder %s1142_s17, 2 }
   0xb   : > { %p1209_p8 = por %p112_p5, %p111_p4 }
   0xc   : > { %s1214_s24 = scalar_select %p70_p6, %s1130_s14, %s72_s20  }
   0xd   : > { %s1403_s23 = scalar_select %p1209_p8, 1, 0 }
   0xe   : > { %p1216_p9 = por %p137_p7, %p79_p1  ;;  %171 = sbr.rel (%p904_p10) target bundleno = 66 (0x42), region = 20 }
  0x10   : > { %s1404_s25 = scalar_select %p1216_p9, 1, 0 }
  0x15   : > { %174 = sbr.rel (!%p1202_p3) target bundleno = 41 (0x29), region = 24  ;;  %s176_s26 = sand.u32 (%p1202_p3), 1, %s1130_s14  }
  0x16   : > { %s957_s27 = sshll.u32 (%p1202_p3), %s1138_s16, 4  ;;  %s905_s28 = sshll.u32 (%p1202_p3), %s176_s26, 8 }
  0x17   : > { %s1228_s4 = scalar_lea.vmem (%p1202_p3), %s1398_s1, %s957_s27  ;;  %s1233_s5 = scalar_lea.vmem (%p1202_p3), [#allocation3], %s905_s28 }
  0x18   : > { %v197_v0 = vld [vmem:[%s1228_s4] sm:$0xff] (%p1202_p3)  ;;  %v199_v1 = vld [vmem:[%s1228_s4 + $0x8] sm:$0xff] (%p1202_p3) }
  0x19   : > { %v201_v2 = vld [vmem:[%s1228_s4 + $0x20] sm:$0xff] (%p1202_p3)  ;;  %198 = vst [vmem:[%s1233_s5] sm:$0xff] (%p1202_p3), %v197_v0  ;;  %200 = vst [vmem:[%s1233_s5 + $0x8] sm:$0xff] (%p1202_p3), %v199_v1  ;;  %v203_v3 = vld [vmem:[%s1228_s4 + $0x28] sm:$0xff] (%p1202_p3) }
  0x1a   : > { %202 = vst [vmem:[%s1233_s5 + $0x10] sm:$0xff] (%p1202_p3), %v201_v2  ;;  %v205_v4 = vld [vmem:[%s1228_s4 + $0x40] sm:$0xff] (%p1202_p3)  ;;  %v207_v5 = vld [vmem:[%s1228_s4 + $0x48] sm:$0xff] (%p1202_p3)  ;;  %204 = vst [vmem:[%s1233_s5 + $0x18] sm:$0xff] (%p1202_p3), %v203_v3 }
  0x1b   : > { %206 = vst [vmem:[%s1233_s5 + $0x20] sm:$0xff] (%p1202_p3), %v205_v4  ;;  %208 = vst [vmem:[%s1233_s5 + $0x28] sm:$0xff] (%p1202_p3), %v207_v5  ;;  %v209_v6 = vld [vmem:[%s1228_s4 + $0x60] sm:$0xff] (%p1202_p3)  ;;  %v211_v7 = vld [vmem:[%s1228_s4 + $0x68] sm:$0xff] (%p1202_p3) }
  0x1c   : > { %v213_v8 = vld [vmem:[%s1228_s4 + $0x80] sm:$0xff]  ;;  %210 = vst [vmem:[%s1233_s5 + $0x30] sm:$0xff] %v209_v6  ;;  %212 = vst [vmem:[%s1233_s5 + $0x38] sm:$0xff] %v211_v7  ;;  %v215_v9 = vld [vmem:[%s1228_s4 + $0x88] sm:$0xff] }
  0x1d   : > { %214 = vst [vmem:[%s1233_s5 + $0x40] sm:$0xff] %v213_v8  ;;  %v217_v10 = vld [vmem:[%s1228_s4 + $0xa0] sm:$0xff]  ;;  %v219_v11 = vld [vmem:[%s1228_s4 + $0xa8] sm:$0xff]  ;;  %216 = vst [vmem:[%s1233_s5 + $0x48] sm:$0xff] %v215_v9 }
  0x1e   : > { %218 = vst [vmem:[%s1233_s5 + $0x50] sm:$0xff] %v217_v10  ;;  %220 = vst [vmem:[%s1233_s5 + $0x58] sm:$0xff] %v219_v11  ;;  %v221_v12 = vld [vmem:[%s1228_s4 + $0xc0] sm:$0xff]  ;;  %v223_v13 = vld [vmem:[%s1228_s4 + $0xc8] sm:$0xff] }
  0x1f   : > { %v225_v14 = vld [vmem:[%s1228_s4 + $0xe0] sm:$0xff]  ;;  %222 = vst [vmem:[%s1233_s5 + $0x60] sm:$0xff] %v221_v12  ;;  %224 = vst [vmem:[%s1233_s5 + $0x68] sm:$0xff] %v223_v13  ;;  %v227_v15 = vld [vmem:[%s1228_s4 + $0xe8] sm:$0xff] }
  0x20   : > { %226 = vst [vmem:[%s1233_s5 + $0x70] sm:$0xff] %v225_v14  ;;  %v229_v16 = vld [vmem:[%s1228_s4 + $0x100] sm:$0xff]  ;;  %v231_v17 = vld [vmem:[%s1228_s4 + $0x108] sm:$0xff]  ;;  %228 = vst [vmem:[%s1233_s5 + $0x78] sm:$0xff] %v227_v15 }
  0x21   : > { %230 = vst [vmem:[%s1233_s5 + $0x80] sm:$0xff] %v229_v16  ;;  %232 = vst [vmem:[%s1233_s5 + $0x88] sm:$0xff] %v231_v17  ;;  %v233_v18 = vld [vmem:[%s1228_s4 + $0x120] sm:$0xff]  ;;  %v235_v19 = vld [vmem:[%s1228_s4 + $0x128] sm:$0xff] }
  0x22   : > { %v237_v20 = vld [vmem:[%s1228_s4 + $0x140] sm:$0xff]  ;;  %234 = vst [vmem:[%s1233_s5 + $0x90] sm:$0xff] %v233_v18  ;;  %236 = vst [vmem:[%s1233_s5 + $0x98] sm:$0xff] %v235_v19  ;;  %v239_v21 = vld [vmem:[%s1228_s4 + $0x148] sm:$0xff] }
  0x23   : > { %238 = vst [vmem:[%s1233_s5 + $0xa0] sm:$0xff] %v237_v20  ;;  %v241_v22 = vld [vmem:[%s1228_s4 + $0x160] sm:$0xff]  ;;  %v243_v23 = vld [vmem:[%s1228_s4 + $0x168] sm:$0xff]  ;;  %240 = vst [vmem:[%s1233_s5 + $0xa8] sm:$0xff] %v239_v21 }
  0x24   : > { %242 = vst [vmem:[%s1233_s5 + $0xb0] sm:$0xff] %v241_v22  ;;  %244 = vst [vmem:[%s1233_s5 + $0xb8] sm:$0xff] %v243_v23  ;;  %v245_v24 = vld [vmem:[%s1228_s4 + $0x180] sm:$0xff]  ;;  %v247_v25 = vld [vmem:[%s1228_s4 + $0x188] sm:$0xff] }
  0x25   : > { %v249_v26 = vld [vmem:[%s1228_s4 + $0x1a0] sm:$0xff]  ;;  %246 = vst [vmem:[%s1233_s5 + $0xc0] sm:$0xff] %v245_v24  ;;  %248 = vst [vmem:[%s1233_s5 + $0xc8] sm:$0xff] %v247_v25  ;;  %v251_v27 = vld [vmem:[%s1228_s4 + $0x1a8] sm:$0xff] }
  0x26   : > { %250 = vst [vmem:[%s1233_s5 + $0xd0] sm:$0xff] %v249_v26  ;;  %v253_v28 = vld [vmem:[%s1228_s4 + $0x1c0] sm:$0xff]  ;;  %v255_v29 = vld [vmem:[%s1228_s4 + $0x1c8] sm:$0xff]  ;;  %252 = vst [vmem:[%s1233_s5 + $0xd8] sm:$0xff] %v251_v27 }
  0x27   : > { %254 = vst [vmem:[%s1233_s5 + $0xe0] sm:$0xff] %v253_v28  ;;  %256 = vst [vmem:[%s1233_s5 + $0xe8] sm:$0xff] %v255_v29  ;;  %v257_v30 = vld [vmem:[%s1228_s4 + $0x1e0] sm:$0xff]  ;;  %v259_v31 = vld [vmem:[%s1228_s4 + $0x1e8] sm:$0xff] }
  0x28   : > { %258 = vst [vmem:[%s1233_s5 + $0xf0] sm:$0xff] %v257_v30  ;;  %260 = vst [vmem:[%s1233_s5 + $0xf8] sm:$0xff] %v259_v31 }
  0x29 PF: > { %s267_s6 = sand.u32 1, %s1130_s14   ;;  %s958_s7 = sshll.u32 %s1138_s16, 6 }
  0x2a   : > { %s908_s8 = sshll.u32 %s267_s6, 2  ;;  %s1301_s11 = scalar_lea.hbm %s1399_s2, %s958_s7 }
  0x2b   : > { %s271_s12 = scalar_lea.vmem [#allocation4], %s908_s8  ;;  %s268_s20 = scalar_lea.sflag [#allocation5], %s267_s6 }
  0x2c   : > { %s279_s18 = sshll.u32 %s271_s12, 4  ;;  %s1064_s22 = scalar_lea.hbm %s1301_s11, 64  ;;  %s280_s18 = int_to_ptr.vmem [resolvable:$true] %s279_s18 }
  0x2d   : > { %p1065_p11 = scmp.ne.s32.totalorder %s1301_s11, %s1064_s22  ;;  %s1068_s28 = scalar_lea.hbm %s1399_s2, 128 }
  0x2e   : > { %p1069_p0 = scmp.lt.u32.totalorder %s1301_s11, %s1399_s2  ;;  %p1070_p1 = scmp.lt.u32.totalorder %s1068_s28, %s1064_s22 }
  0x2f   : > { %p1066_p12 = pnand %p1065_p11, %p1202_p3  ;;  %p1072_p4 = scmp.lt.u32.totalorder %s1064_s22, %s1301_s11 }
  0x30   : > { %p1071_p2 = por %p1070_p1, %p1069_p0 }
  0x31   : > { %p1067_p13 = pneg %p1066_p12 }
  0x32   : > { %p1073_p5 = por %p1072_p4, %p1071_p2 }
  0x34   : > { %p1074_p6 = pnand %p1073_p5, %p1067_p13 }
  0x36   : > { %1077 = shalt.err (!%p1074_p6)
}
  0x37   : > { %s1078_s4 = scalar_lea.vmem %s280_s18, 64  ;;  %s1144_s5 = smov [#allocation4]  }
  0x38   : > { %p1079_p7 = scmp.ne.s32.totalorder %s280_s18, %s1078_s4  ;;  %s1082_s6 = sshll.u32 %s1144_s5, 4  ;;  %s1083_s6 = int_to_ptr.vmem [resolvable:$false] %s1082_s6 }
  0x39   : > { %s1084_s7 = scalar_lea.vmem %s1083_s6, 128  ;;  %p1085_p12 = scmp.lt.s32.totalorder %s280_s18, %s1083_s6 }
  0x3a   : > { %p1080_p10 = pnand %p1079_p7, %p1202_p3  ;;  %p1086_p9 = scmp.lt.s32.totalorder %s1084_s7, %s1078_s4 }
  0x3c   : > { %p1081_p11 = pneg %p1080_p10  ;;  %p1087_p8 = por %p1086_p9, %p1085_p12 }
  0x3e   : > { %p1088_p0 = pnand %p1087_p8, %p1081_p11 }
  0x40   : > { %1091 = shalt.err (!%p1088_p0)
}
  0x41   : > { %964 = dma.hbm_to_vmem [thread:$0]  (%p1202_p3), %s1301_s11, 64, %s280_s18, %s268_s20  }
  0x42 PF: > { %p911_p13 = scmp.ge.s32.totalorder %s1142_s17, 1  ;;  %p284_p1 = scmp.lt.s32.totalorder %s1142_s17, 3 }
  0x44   : > { %p285_p2 = pnand %p911_p13, %p284_p1 }
  0x45   : > { %s1323_s8 = sand.u32 (!%p285_p2), 1, %s1126_s13   ;;  %p1405_p3 = scmp.ne.s32.totalorder (!%p285_p2), %s1403_s23, 0 }
  0x46   : > { %288 = sbr.rel (%p285_p2) target bundleno = 342 (0x156), region = 51  ;;  %s912_s9 = sshll.u32 (!%p285_p2), %s1323_s8, 8 }
  0x47   : > { %s913_s10 = sshll.u32 (!%p285_p2), %s1323_s8, 2  ;;  %s1327_s12 = scalar_lea.vmem (!%p285_p2), [#allocation3], %s912_s9 }
  0x48   : > { %s298_s21 = scalar_lea.sflag (!%p285_p2), [#allocation5], %s1323_s8  ;;  %s1330_s11 = scalar_lea.vmem (!%p285_p2), [#allocation4], %s913_s10 }
  0x4d   : > { %1117 = dma.done.wait (%p1405_p3), %s298_s21, 64  }
  0x4e   : > { %1119 = vsyncadd (%p1405_p3), %s298_s21, 4294967232  ;;  %v1145_v32 = vmov 0   ;;  %v1015_v33 = vld [vmem:[%s1327_s12 + $0x4] ss:$16 sps:$4 sm:$0xff]   ;;  %v1017_v34 = vld [vmem:[%s1327_s12 + $0xc] ss:$16 sps:$4 sm:$0xff]   ;;  %v685_v2 = vlaneseq }
  0x4f   : > { %602 = vmatprep.mubr.bf16.mxu0 %v1145_v32  ;;  %645 = vmatprep.mubr.bf16.mxu1 %v1145_v32  ;;  %v1019_v35 = vld [vmem:[%s1327_s12] ss:$16 sps:$4 sm:$0xff]   ;;  %v1020_v36 = vld [vmem:[%s1327_s12 + $0x8] ss:$16 sps:$4 sm:$0xff]   ;;  %v1021_v37 = vld [vmem:[%s1327_s12 + $0x24] ss:$16 sps:$4 sm:$0xff]  }
  0x50   : > { %570 = vmatprep.subr.bf16.mxu0 %v1015_v33  ;;  %613 = vmatprep.subr.bf16.mxu1 %v1017_v34  ;;  %v1023_v38 = vld [vmem:[%s1327_s12 + $0x2c] ss:$16 sps:$4 sm:$0xff]   ;;  %v1025_v39 = vld [vmem:[%s1327_s12 + $0x20] ss:$16 sps:$4 sm:$0xff]   ;;  %v1026_v40 = vld [vmem:[%s1327_s12 + $0x28] ss:$16 sps:$4 sm:$0xff]  }
  0x51   : > { %571 = vmatpush1.bf16.msra.mxu0 %v1019_v35  ;;  %614 = vmatpush1.bf16.msra.mxu1 %v1020_v36  ;;  %v1027_v41 = vld [vmem:[%s1327_s12 + $0x44] ss:$16 sps:$4 sm:$0xff]   ;;  %v1029_v42 = vld [vmem:[%s1327_s12 + $0x4c] ss:$16 sps:$4 sm:$0xff]   ;;  %v1031_v43 = vld [vmem:[%s1327_s12 + $0x40] ss:$16 sps:$4 sm:$0xff]  }
  0x52   : > { %572 = vmatprep.subr.bf16.mxu0 %v1021_v37  ;;  %615 = vmatprep.subr.bf16.mxu1 %v1023_v38  ;;  %v1032_v44 = vld [vmem:[%s1327_s12 + $0x48] ss:$16 sps:$4 sm:$0xff]   ;;  %v1033_v45 = vld [vmem:[%s1327_s12 + $0x64] ss:$16 sps:$4 sm:$0xff]   ;;  %v1035_v46 = vld [vmem:[%s1327_s12 + $0x6c] ss:$16 sps:$4 sm:$0xff]  }
  0x53   : > { %v1037_v47 = vld [vmem:[%s1327_s12 + $0x60] ss:$16 sps:$4 sm:$0xff]   ;;  %v1038_v48 = vld [vmem:[%s1327_s12 + $0x68] ss:$16 sps:$4 sm:$0xff]   ;;  %v1039_v49 = vld [vmem:[%s1327_s12 + $0x84] ss:$16 sps:$4 sm:$0xff]  }
  0x54   : > { %v1041_v50 = vld [vmem:[%s1327_s12 + $0x8c] ss:$16 sps:$4 sm:$0xff]   ;;  %v1043_v51 = vld [vmem:[%s1327_s12 + $0x80] ss:$16 sps:$4 sm:$0xff]   ;;  %v1044_v52 = vld [vmem:[%s1327_s12 + $0x88] ss:$16 sps:$4 sm:$0xff]  }
  0x55   : > { %573 = vmatpush1.bf16.msra.mxu0 %v1025_v39  ;;  %616 = vmatpush1.bf16.msra.mxu1 %v1026_v40  ;;  %v1045_v53 = vld [vmem:[%s1327_s12 + $0xa4] ss:$16 sps:$4 sm:$0xff]   ;;  %v1047_v54 = vld [vmem:[%s1327_s12 + $0xac] ss:$16 sps:$4 sm:$0xff]   ;;  %v1049_v55 = vld [vmem:[%s1327_s12 + $0xa0] ss:$16 sps:$4 sm:$0xff]  }
  0x56   : > { %574 = vmatprep.subr.bf16.mxu0 %v1027_v41  ;;  %617 = vmatprep.subr.bf16.mxu1 %v1029_v42  ;;  %v1050_v56 = vld [vmem:[%s1327_s12 + $0xa8] ss:$16 sps:$4 sm:$0xff]   ;;  %v1051_v57 = vld [vmem:[%s1327_s12 + $0xc4] ss:$16 sps:$4 sm:$0xff]   ;;  %v1053_v58 = vld [vmem:[%s1327_s12 + $0xcc] ss:$16 sps:$4 sm:$0xff]  }
  0x57   : > { %v1055_v59 = vld [vmem:[%s1327_s12 + $0xc0] ss:$16 sps:$4 sm:$0xff]   ;;  %v1056_v60 = vld [vmem:[%s1327_s12 + $0xc8] ss:$16 sps:$4 sm:$0xff]   ;;  %v1057_v61 = vld [vmem:[%s1327_s12 + $0xe4] ss:$16 sps:$4 sm:$0xff]  }
  0x58   : > { %v1059_v62 = vld [vmem:[%s1327_s12 + $0xec] ss:$16 sps:$4 sm:$0xff]   ;;  %v1061_v63 = vld [vmem:[%s1327_s12 + $0xe0] ss:$16 sps:$4 sm:$0xff]   ;;  %v1062_v0 = vld [vmem:[%s1327_s12 + $0xe8] ss:$16 sps:$4 sm:$0xff]  }
  0x59   : > { %575 = vmatpush1.bf16.msra.mxu0 %v1031_v43  ;;  %618 = vmatpush1.bf16.msra.mxu1 %v1032_v44  ;;  %v1063_v1 = vld [vmem:[%s1397_s0] sm:$0xff]   ;;  %v686_v3 = vshrl.u32 %v685_v2, 7  ;;  %s914_s20 = sshll.u32 %s1323_s8, 5  ;;  %p1406_p8 = scmp.ne.s32.totalorder %s1404_s25, 0 }
  0x5a   : > { %576 = vmatprep.subr.bf16.mxu0 %v1033_v45  ;;  %619 = vmatprep.subr.bf16.mxu1 %v1035_v46  ;;  %v683_v6 = vld [vmem:[%s1330_s11] sm:$0xf]  ;;  %s334_s22 = scalar_lea.vmem [#allocation6], %s914_s20  ;;  %s963_s26 = sshll.u32 (%p1406_p8), %s1134_s15, 4 }
  0x5b   : > { %v687_v4 = vsub.s32 0, %v686_v3  ;;  %v695_v5 = vsub.s32 2, %v686_v3  ;;  %v691_v7 = vsub.s32 1, %v686_v3  ;;  %v699_v8 = vsub.s32 3, %v686_v3  ;;  %s761_s29 = scalar_lea.vmem (%p1406_p8), %s1400_s3, %s963_s26 }
  0x5d   : > { %577 = vmatpush1.bf16.msra.mxu0 %v1037_v47  ;;  %620 = vmatpush1.bf16.msra.mxu1 %v1038_v48  ;;  %v688_v9 = vrot.slane %v683_v6, %v687_v4  ;;  %v696_v10 = vrot.slane %v683_v6, %v695_v5  ;;  %v692_v11 = vrot.slane %v683_v6, %v691_v7 }
  0x5e   : > { %578 = vmatprep.subr.bf16.mxu0 %v1039_v49  ;;  %621 = vmatprep.subr.bf16.mxu1 %v1041_v50  ;;  %v700_v12 = vrot.slane %v683_v6, %v699_v8 }
  0x61   : > { %579 = vmatpush1.bf16.msra.mxu0 %v1043_v51  ;;  %622 = vmatpush1.bf16.msra.mxu1 %v1044_v52 }
  0x62   : > { %580 = vmatprep.subr.bf16.mxu0 %v1045_v53  ;;  %623 = vmatprep.subr.bf16.mxu1 %v1047_v54 }
  0x65   : > { %581 = vmatpush1.bf16.msra.mxu0 %v1049_v55  ;;  %624 = vmatpush1.bf16.msra.mxu1 %v1050_v56 }
  0x66   : > { %582 = vmatprep.subr.bf16.mxu0 %v1051_v57  ;;  %625 = vmatprep.subr.bf16.mxu1 %v1053_v58 }
  0x69   : > { %583 = vmatpush1.bf16.msra.mxu0 %v1055_v59  ;;  %626 = vmatpush1.bf16.msra.mxu1 %v1056_v60 }
  0x6a   : > { %584 = vmatprep.subr.bf16.mxu0 %v1057_v61  ;;  %627 = vmatprep.subr.bf16.mxu1 %v1059_v62 }
  0x6d   : > { %585 = vmatpush1.bf16.msra.mxu0 %v1061_v63  ;;  %628 = vmatpush1.bf16.msra.mxu1 %v1062_v0 }
  0x70   : > { %603 = vmatmul.mubr.bf16.vlgmr.msra.gmra.mrb[0].mxu0 %v1063_v1  ;;  %646 = vmatmul.mubr.bf16.vlgmr.msra.gmra.mrb[0].mxu1 %v1063_v1 }
 0x143   : > { %v604_v13 = vpop.f32.mrb[0].mxu0  ;;  %v647_v14 = vpop.f32.mrb[0].mxu1 }
 0x144   : > { %v705_v15 = vadd.f32 %v688_v9, %v604_v13  ;;  %v707_v16 = vadd.f32 %v696_v10, %v647_v14  ;;  %v606_v17 = vpop.f32.mrb[1].mxu0  ;;  %v649_v18 = vpop.f32.mrb[1].mxu1 }
 0x145   : > { %v706_v19 = vadd.f32 %v692_v11, %v606_v17  ;;  %v708_v20 = vadd.f32 %v700_v12, %v649_v18  ;;  %v608_v21 = vpop.f32.mrb[2].mxu0  ;;  %v651_v22 = vpop.f32.mrb[2].mxu1 }
 0x146   : > { %v713_v23 = vmax.f32 %v705_v15, 0.0  ;;  %v715_v24 = vmax.f32 %v707_v16, 0.0  ;;  %v709_v25 = vadd.f32 %v688_v9, %v608_v21  ;;  %v711_v26 = vadd.f32 %v696_v10, %v651_v22  ;;  %v610_v27 = vpop.f32.mrb[3].mxu0  ;;  %v653_v28 = vpop.f32.mrb[3].mxu1 }
 0x147   : > { %v714_v29 = vmax.f32 %v706_v19, 0.0  ;;  %v716_v30 = vmax.f32 %v708_v20, 0.0  ;;  %v710_v31 = vadd.f32 %v692_v11, %v610_v27  ;;  %v712_v32 = vadd.f32 %v700_v12, %v653_v28  ;;  %755 = sbr.rel (!%p1406_p8) target bundleno = 342 (0x156), region = 71 }
 0x148   : > { %v717_v33 = vmax.f32 %v709_v25, 0.0  ;;  %v719_v34 = vmax.f32 %v711_v26, 0.0 }
 0x149   : > { %v959_v35 = vpack.c.bf16 %v714_v29, %v713_v23  ;;  %v960_v36 = vpack.c.bf16 %v716_v30, %v715_v24  ;;  %v718_v37 = vmax.f32 %v710_v31, 0.0  ;;  %v720_v38 = vmax.f32 %v712_v32, 0.0 }
 0x14b   : > { %745 = vst [vmem:[%s334_s22] sm:$0xff] %v959_v35  ;;  %746 = vst [vmem:[%s334_s22 + $0x8] sm:$0xff] %v960_v36  ;;  %v961_v39 = vpack.c.bf16 %v718_v37, %v717_v33  ;;  %v962_v40 = vpack.c.bf16 %v720_v38, %v719_v34 }
 0x14d   : > { %747 = vst [vmem:[%s334_s22 + $0x10] sm:$0xff] %v961_v39  ;;  %748 = vst [vmem:[%s334_s22 + $0x18] sm:$0xff] %v962_v40 }
 0x152   : > { %v774_v41 = vld [vmem:[%s334_s22] sm:$0xff]  ;;  %v776_v42 = vld [vmem:[%s334_s22 + $0x8] sm:$0xff] }
 0x153   : > { %775 = vst [vmem:[%s761_s29] sm:$0xff] %v774_v41  ;;  %777 = vst [vmem:[%s761_s29 + $0x8] sm:$0xff] %v776_v42 }
 0x154   : > { %v778_v43 = vld [vmem:[%s334_s22 + $0x10] sm:$0xff]  ;;  %v780_v44 = vld [vmem:[%s334_s22 + $0x18] sm:$0xff] }
 0x155   : > { %779 = vst [vmem:[%s761_s29 + $0x20] sm:$0xff] %v778_v43  ;;  %781 = vst [vmem:[%s761_s29 + $0x28] sm:$0xff] %v780_v44 }
 0x156 PF: > { %s16_s17 = sadd.s32 1, %s1142_s17   ;;  %s1407_s12 = smov %s1126_s13 }
 0x157   : > { %p13_p9 = scmp.ge.s32.totalorder %s16_s17, 4   ;;  %s1408_s13 = smov %s1130_s14 }
 0x158   : > { %s1409_s14 = smov %s1214_s24  ;;  %s1410_s15 = smov %s1138_s16 }
 0x159   : > { %s1411_s16 = smov %s1413_s19  ;;  %15 = sbr.rel (!%p13_p9) target bundleno = 4 (0x4), region = 137 }
 0x160   :  { %797 = vsyncpa [#allocation5], 1 }
 0x161   :  { %799 = vsyncpa [#allocation5 + $0x1], 1 }

// kernel: decoder_stack_forward.22
= control target key start
LH: loop header
LB: loop body
LE: loop exit
PB: predicated region body
PF: predicated region fallthrough
CT: control target
= control target key end

     0   :  { %8 = vsyncpa [#allocation4], 0  ;;  %s308_s12 = smov [#allocation3]   ;;  %s399_s0 = inlined_call_operand.vmem [shape: bf16[16,128], index: 0, kind: input, shape index: {}]   ;;  %s400_s1 = inlined_call_operand.vmem [shape: bf16[128,256], index: 1, kind: input, shape index: {}]   ;;  %s401_s2 = inlined_call_operand.hbm [shape: f32[1,256], index: 2, kind: input, shape index: {}]   ;;  %s402_s3 = inlined_call_operand.vmem [shape: bf16[16,256], index: 3, kind: output, shape index: {}]  }
   0x1   :  { %s19_s13 = sshll.u32 %s308_s12, 4  ;;  %s284_s16 = scalar_lea.hbm %s401_s2, 32  ;;  %s20_s13 = int_to_ptr.vmem [resolvable:$true] %s19_s13 }
   0x2   :  { %p285_p0 = scmp.ne.s32.totalorder %s401_s2, %s284_s16  ;;  %p288_p1 = scmp.lt.u32.totalorder %s284_s16, %s401_s2 }
   0x4   :  { %p290_p2 = pnand %p288_p1, %p285_p0 }
   0x6   :  { %293 = shalt.err (!%p290_p2)
}
   0x7   :  { %s294_s21 = scalar_lea.vmem %s20_s13, 32  ;;  %p299_p4 = scmp.lt.s32.totalorder %s20_s13, %s20_s13 }
   0x8   :  { %p295_p3 = scmp.ne.s32.totalorder %s20_s13, %s294_s21  ;;  %p300_p5 = scmp.lt.s32.totalorder %s294_s21, %s294_s21 }
   0xa   :  { %p301_p6 = por %p300_p5, %p299_p4 }
   0xc   :  { %p302_p7 = pnand %p301_p6, %p295_p3 }
   0xe   :  { %305 = shalt.err (!%p302_p7)
}
   0xf   :  { %22 = dma.hbm_to_vmem [thread:$0]  %s401_s2, 32, %s20_s13, [#allocation4]  }
  0x10   :  { %306 = dma.done.wait [#allocation4], 32  }
  0x11   :  { %307 = vsyncadd [#allocation4], 4294967264  ;;  %v309_v0 = vmov 0   ;;  %v259_v1 = vld [vmem:[%s400_s1 + $0x4] ss:$8 sps:$4 sm:$0xff]   ;;  %v203_v18 = vlaneseq }
  0x12   :  { %175 = vmatprep.mubr.bf16.mxu0 %v309_v0  ;;  %v261_v2 = vld [vmem:[%s400_s1] ss:$8 sps:$4 sm:$0xff]   ;;  %143 = vmatprep.subr.bf16.mxu0 %v259_v1  ;;  %v262_v3 = vld [vmem:[%s400_s1 + $0x14] ss:$8 sps:$4 sm:$0xff]   ;;  %v264_v4 = vld [vmem:[%s400_s1 + $0x10] ss:$8 sps:$4 sm:$0xff]  }
  0x13   :  { %144 = vmatpush1.bf16.msra.mxu0 %v261_v2  ;;  %v265_v5 = vld [vmem:[%s400_s1 + $0x24] ss:$8 sps:$4 sm:$0xff]   ;;  %v267_v6 = vld [vmem:[%s400_s1 + $0x20] ss:$8 sps:$4 sm:$0xff]   ;;  %v268_v7 = vld [vmem:[%s400_s1 + $0x34] ss:$8 sps:$4 sm:$0xff]  }
  0x14   :  { %145 = vmatprep.subr.bf16.mxu0 %v262_v3  ;;  %v270_v8 = vld [vmem:[%s400_s1 + $0x30] ss:$8 sps:$4 sm:$0xff]   ;;  %v271_v9 = vld [vmem:[%s400_s1 + $0x44] ss:$8 sps:$4 sm:$0xff]   ;;  %v273_v10 = vld [vmem:[%s400_s1 + $0x40] ss:$8 sps:$4 sm:$0xff]  }
  0x15   :  { %v274_v11 = vld [vmem:[%s400_s1 + $0x54] ss:$8 sps:$4 sm:$0xff]   ;;  %v276_v12 = vld [vmem:[%s400_s1 + $0x50] ss:$8 sps:$4 sm:$0xff]   ;;  %v277_v13 = vld [vmem:[%s400_s1 + $0x64] ss:$8 sps:$4 sm:$0xff]  }
  0x16   :  { %v279_v14 = vld [vmem:[%s400_s1 + $0x60] ss:$8 sps:$4 sm:$0xff]   ;;  %v280_v15 = vld [vmem:[%s400_s1 + $0x74] ss:$8 sps:$4 sm:$0xff]   ;;  %v282_v16 = vld [vmem:[%s400_s1 + $0x70] ss:$8 sps:$4 sm:$0xff]  }
  0x17   :  { %146 = vmatpush1.bf16.msra.mxu0 %v264_v4  ;;  %v283_v17 = vld [vmem:[%s399_s0] sm:$0xff]   ;;  %v204_v19 = vshrl.u32 %v203_v18, 7 }
  0x18   :  { %147 = vmatprep.subr.bf16.mxu0 %v265_v5  ;;  %v201_v21 = vld [vmem:[#allocation3] sm:$0x3] }
  0x19   :  { %v205_v20 = vsub.s32 0, %v204_v19  ;;  %v209_v22 = vsub.s32 1, %v204_v19 }
  0x1b   :  { %148 = vmatpush1.bf16.msra.mxu0 %v267_v6  ;;  %v206_v23 = vrot.slane %v201_v21, %v205_v20  ;;  %v210_v24 = vrot.slane %v201_v21, %v209_v22 }
  0x1c   :  { %149 = vmatprep.subr.bf16.mxu0 %v268_v7 }
  0x1f   :  { %150 = vmatpush1.bf16.msra.mxu0 %v270_v8 }
  0x20   :  { %151 = vmatprep.subr.bf16.mxu0 %v271_v9 }
  0x23   :  { %152 = vmatpush1.bf16.msra.mxu0 %v273_v10 }
  0x24   :  { %153 = vmatprep.subr.bf16.mxu0 %v274_v11 }
  0x27   :  { %154 = vmatpush1.bf16.msra.mxu0 %v276_v12 }
  0x28   :  { %155 = vmatprep.subr.bf16.mxu0 %v277_v13 }
  0x2b   :  { %156 = vmatpush1.bf16.msra.mxu0 %v279_v14 }
  0x2c   :  { %157 = vmatprep.subr.bf16.mxu0 %v280_v15 }
  0x2f   :  { %158 = vmatpush1.bf16.msra.mxu0 %v282_v16 }
  0x32   :  { %176 = vmatmul.mubr.bf16.vlgmr.msra.gmra.mrb[0].mxu0 %v283_v17 }
 0x105   :  { %v177_v25 = vpop.f32.mrb[0].mxu0 }
 0x106   :  { %v213_v26 = vadd.f32 %v206_v23, %v177_v25  ;;  %v179_v27 = vpop.f32.mrb[1].mxu0 }
 0x107   :  { %v214_v28 = vadd.f32 %v210_v24, %v179_v27  ;;  %v181_v29 = vpop.f32.mrb[2].mxu0 }
 0x108   :  { %v215_v30 = vadd.f32 %v206_v23, %v181_v29  ;;  %v183_v31 = vpop.f32.mrb[3].mxu0 }
 0x109   :  { %v255_v32 = vpack.c.bf16 %v214_v28, %v213_v26  ;;  %v216_v33 = vadd.f32 %v210_v24, %v183_v31 }
 0x10b   :  { %229 = vst [vmem:[%s402_s3] sm:$0xff] %v255_v32  ;;  %v256_v34 = vpack.c.bf16 %v216_v33, %v215_v30 }
 0x10d   :  { %230 = vst [vmem:[%s402_s3 + $0x8] sm:$0xff] %v256_v34 }
 0x10e   :  { %235 = vsyncpa [#allocation4], 1 }

// kernel: decoder_stack_forward.29
= control target key start
LH: loop header
LB: loop body
LE: loop exit
PB: predicated region body
PF: predicated region fallthrough
CT: control target
= control target key end

     0   :  { %v298_v0 = vmov 0.0   ;;  %vm299_vm0 = vmmov 0   ;;  %s377_s1 = inlined_call_operand.vmem [shape: bf16[128,128], index: 1, kind: input, shape index: {}]   ;;  %s378_s0 = inlined_call_operand.vmem [shape: bf16[16,128], index: 0, kind: input, shape index: {}]   ;;  %s379_s3 = inlined_call_operand.vmem [shape: bf16[16,128], index: 3, kind: input, shape index: {}]   ;;  %s380_s2 = inlined_call_operand.vmem [shape: f32[1,128], index: 2, kind: input, shape index: {}]   ;;  %s381_s4 = inlined_call_operand.vmem [shape: f32[1,128], index: 4, kind: input, shape index: {}]   ;;  %s382_s5 = inlined_call_operand.vmem [shape: f32[1,128], index: 5, kind: input, shape index: {}]   ;;  %s383_s6 = inlined_call_operand.vmem [shape: bf16[16,128], index: 6, kind: output, shape index: {}]  }
   0x1   :  { %263 = vmatprep.subr.bf16.mxu0 %v298_v0  ;;  %v285_v1 = vld [vmem:[%s377_s1] sm:$0xff]   ;;  %279 = vmatprep.mubr.msk.bf16.mxu0 %vm299_vm0, %v298_v0  ;;  %v286_v2 = vld [vmem:[%s377_s1 + $0x8] sm:$0xff]   ;;  %v287_v3 = vld [vmem:[%s377_s1 + $0x10] sm:$0xff]  }
   0x2   :  { %264 = vmatpush3.bf16.msra.mxu0 %v285_v1  ;;  %v288_v4 = vld [vmem:[%s377_s1 + $0x18] sm:$0xff]   ;;  %v289_v5 = vld [vmem:[%s377_s1 + $0x20] sm:$0xff]   ;;  %v290_v6 = vld [vmem:[%s377_s1 + $0x28] sm:$0xff]  }
   0x3   :  { %265 = vmatprep.subr.bf16.mxu0 %v298_v0  ;;  %v291_v7 = vld [vmem:[%s377_s1 + $0x30] sm:$0xff]   ;;  %v292_v8 = vld [vmem:[%s377_s1 + $0x38] sm:$0xff]   ;;  %v293_v9 = vld [vmem:[%s378_s0] sm:$0xff]  }
   0x4   :  { %v246_v10 = vld [vmem:[%s379_s3] sm:$0xff]  }
   0x5   :  { %v238_v11 = vld [vmem:[%s380_s2] ss:$0 sm:$0xff]  ;;  %v247_v12 = vunpack.c.l.bf16 %v246_v10  ;;  %v248_v16 = vunpack.c.h.bf16 %v246_v10 }
   0x6   :  { %266 = vmatpush3.bf16.msra.mxu0 %v286_v2  ;;  %v239_v43 = vld [vmem:[%s381_s4] ss:$0 sm:$0xff] }
   0x7   :  { %267 = vmatprep.subr.bf16.mxu0 %v298_v0  ;;  %v240_v48 = vld [vmem:[%s382_s5] ss:$0 sm:$0xff] }
   0xa   :  { %268 = vmatpush3.bf16.msra.mxu0 %v287_v3 }
   0xb   :  { %269 = vmatprep.subr.bf16.mxu0 %v298_v0 }
   0xe   :  { %270 = vmatpush3.bf16.msra.mxu0 %v288_v4 }
   0xf   :  { %271 = vmatprep.subr.bf16.mxu0 %v298_v0 }
  0x12   :  { %272 = vmatpush3.bf16.msra.mxu0 %v289_v5 }
  0x13   :  { %273 = vmatprep.subr.bf16.mxu0 %v298_v0 }
  0x16   :  { %274 = vmatpush3.bf16.msra.mxu0 %v290_v6 }
  0x17   :  { %275 = vmatprep.subr.bf16.mxu0 %v298_v0 }
  0x1a   :  { %276 = vmatpush3.bf16.msra.mxu0 %v291_v7 }
  0x1b   :  { %277 = vmatprep.subr.bf16.mxu0 %v298_v0 }
  0x1e   :  { %278 = vmatpush3.bf16.msra.mxu0 %v292_v8 }
  0x21   :  { %280 = vmatmul.mubr.bf16.vlgmr.msra.gmra.mrb[0].mxu0 %v293_v9 }
  0xf4   :  { %v138_v13 = vpop.f32.mrb[0].mxu0 }
  0xf5   :  { %v161_v14 = vadd.f32 %v238_v11, %v138_v13  ;;  %v281_v15 = vpop.f32.mrb[1].mxu0 }
  0xf6   :  { %v141_v17 = vpop.f32.mrb[2].mxu0 }
  0xf7   :  { %v167_v18 = vadd.f32 %v247_v12, %v161_v14  ;;  %v162_v19 = vadd.f32 %v238_v11, %v141_v17  ;;  %v282_v20 = vpop.f32.mrb[3].mxu0 }
  0xf9   :  { %v168_v21 = vadd.f32 %v248_v16, %v162_v19  ;;  %169 = vadd.xlane.f32.xlu0 %v167_v18  ;;  %v175_v22 = vmul.f32 %v167_v18, %v167_v18 }
  0xfb   :  { %177 = vadd.xlane.f32.xlu1 %v175_v22  ;;  %v176_v23 = vmul.f32 %v168_v21, %v168_v21 }
  0xfd   :  { %171 = vadd.xlane.f32.xlu0 %v168_v21 }
  0xff   :  { %179 = vadd.xlane.f32.xlu1 %v176_v23 }
 0x186   :  { %v170_v24 = vpop.xlane.xlu0 %169 }
 0x187   :  { %v173_v25 = vmul.f32 0.03125, %v170_v24 }
 0x188   :  { %v178_v26 = vpop.xlane.xlu1 %177 }
 0x189   :  { %v183_v27 = vmul.f32 %v173_v25, %v173_v25  ;;  %v181_v28 = vmul.f32 0.03125, %v178_v26  ;;  %v189_v40 = vsub.f32 %v167_v18, %v173_v25 }
 0x18a   :  { %v172_v29 = vpop.xlane.xlu0 %171 }
 0x18b   :  { %v185_v30 = vsub.f32 %v181_v28, %v183_v27  ;;  %v174_v31 = vmul.f32 0.03125, %v172_v29 }
 0x18c   :  { %v180_v32 = vpop.xlane.xlu1 %179 }
 0x18d   :  { %v187_v33 = vmax.f32 %v185_v30, 0.0  ;;  %v184_v34 = vmul.f32 %v174_v31, %v174_v31  ;;  %v182_v35 = vmul.f32 0.03125, %v180_v32  ;;  %v190_v44 = vsub.f32 %v168_v21, %v174_v31 }
 0x18f   :  { %v191_v36 = vadd.f32 1e-05, %v187_v33  ;;  %v186_v37 = vsub.f32 %v182_v35, %v184_v34 }
 0x191   :  { %294 = vrsqrt.f32 %v191_v36  ;;  %v188_v38 = vmax.f32 %v186_v37, 0.0 }
 0x193   :  { %v192_v39 = vadd.f32 1e-05, %v188_v38 }
 0x195   :  { %296 = vrsqrt.f32 %v192_v39 }
 0x19b   :  { %v295_v41 = vpop.eup %294 }
 0x19c   :  { %v195_v42 = vmul.f32 %v295_v41, %v189_v40 }
 0x19e   :  { %v204_v46 = vmul.f32 %v239_v43, %v195_v42 }
 0x19f   :  { %v297_v45 = vpop.eup %296 }
 0x1a0   :  { %v196_v47 = vmul.f32 %v297_v45, %v190_v44  ;;  %v213_v50 = vadd.f32 %v240_v48, %v204_v46 }
 0x1a2   :  { %v205_v49 = vmul.f32 %v239_v43, %v196_v47 }
 0x1a4   :  { %v214_v51 = vadd.f32 %v240_v48, %v205_v49 }
 0x1a6   :  { %v252_v52 = vpack.c.bf16 %v214_v51, %v213_v50 }
 0x1a8   :  { %253 = vst [vmem:[%s383_s6] sm:$0xff] %v252_v52  }

// kernel: decoder_stack_forward.30
= control target key start
LH: loop header
LB: loop body
LE: loop exit
PB: predicated region body
PF: predicated region fallthrough
CT: control target
= control target key end

     0   :  { %v227_v0 = vmov 0.0   ;;  %vm228_vm0 = vmmov 0   ;;  %s282_s1 = inlined_call_operand.vmem [shape: bf16[128,128], index: 1, kind: input, shape index: {}]   ;;  %s283_s0 = inlined_call_operand.vmem [shape: bf16[16,128], index: 0, kind: input, shape index: {}]   ;;  %s284_s2 = inlined_call_operand.vmem [shape: f32[1,128], index: 2, kind: input, shape index: {}]   ;;  %s285_s3 = inlined_call_operand.vmem [shape: bf16[16,128], index: 3, kind: output, shape index: {}]  }
   0x1   :  { %196 = vmatprep.subr.bf16.mxu0 %v227_v0  ;;  %v218_v1 = vld [vmem:[%s282_s1] sm:$0xff]   ;;  %212 = vmatprep.mubr.msk.bf16.mxu0 %vm228_vm0, %v227_v0  ;;  %v219_v2 = vld [vmem:[%s282_s1 + $0x8] sm:$0xff]   ;;  %v220_v3 = vld [vmem:[%s282_s1 + $0x10] sm:$0xff]  }
   0x2   :  { %197 = vmatpush3.bf16.msra.mxu0 %v218_v1  ;;  %v221_v4 = vld [vmem:[%s282_s1 + $0x18] sm:$0xff]   ;;  %v222_v5 = vld [vmem:[%s282_s1 + $0x20] sm:$0xff]   ;;  %v223_v6 = vld [vmem:[%s282_s1 + $0x28] sm:$0xff]  }
   0x3   :  { %198 = vmatprep.subr.bf16.mxu0 %v227_v0  ;;  %v224_v7 = vld [vmem:[%s282_s1 + $0x30] sm:$0xff]   ;;  %v225_v8 = vld [vmem:[%s282_s1 + $0x38] sm:$0xff]   ;;  %v226_v9 = vld [vmem:[%s283_s0] sm:$0xff]  }
   0x4   :  { %v177_v11 = vld [vmem:[%s284_s2] ss:$0 sm:$0xff] }
   0x6   :  { %199 = vmatpush3.bf16.msra.mxu0 %v219_v2 }
   0x7   :  { %200 = vmatprep.subr.bf16.mxu0 %v227_v0 }
   0xa   :  { %201 = vmatpush3.bf16.msra.mxu0 %v220_v3 }
   0xb   :  { %202 = vmatprep.subr.bf16.mxu0 %v227_v0 }
   0xe   :  { %203 = vmatpush3.bf16.msra.mxu0 %v221_v4 }
   0xf   :  { %204 = vmatprep.subr.bf16.mxu0 %v227_v0 }
  0x12   :  { %205 = vmatpush3.bf16.msra.mxu0 %v222_v5 }
  0x13   :  { %206 = vmatprep.subr.bf16.mxu0 %v227_v0 }
  0x16   :  { %207 = vmatpush3.bf16.msra.mxu0 %v223_v6 }
  0x17   :  { %208 = vmatprep.subr.bf16.mxu0 %v227_v0 }
  0x1a   :  { %209 = vmatpush3.bf16.msra.mxu0 %v224_v7 }
  0x1b   :  { %210 = vmatprep.subr.bf16.mxu0 %v227_v0 }
  0x1e   :  { %211 = vmatpush3.bf16.msra.mxu0 %v225_v8 }
  0x21   :  { %213 = vmatmul.mubr.bf16.vlgmr.msra.gmra.mrb[0].mxu0 %v226_v9 }
  0xf4   :  { %v129_v10 = vpop.f32.mrb[0].mxu0 }
  0xf5   :  { %v214_v12 = vpop.f32.mrb[1].mxu0  ;;  %v152_v14 = vadd.f32 %v177_v11, %v129_v10 }
  0xf6   :  { %v132_v13 = vpop.f32.mrb[2].mxu0 }
  0xf7   :  { %v153_v15 = vadd.f32 %v177_v11, %v132_v13  ;;  %v215_v16 = vpop.f32.mrb[3].mxu0 }
  0xf9   :  { %v185_v17 = vpack.c.bf16 %v153_v15, %v152_v14 }
  0xfb   :  { %186 = vst [vmem:[%s285_s3] sm:$0xff] %v185_v17  }

// kernel: decoder_stack_forward.31
= control target key start
LH: loop header
LB: loop body
LE: loop exit
PB: predicated region body
PF: predicated region fallthrough
CT: control target
= control target key end

     0   :  { %v270_v1 = vmov 0   ;;  %v191_v18 = vlaneseq  ;;  %s351_s1 = inlined_call_operand.vmem [shape: bf16[128,256], index: 1, kind: input, shape index: {}]   ;;  %s352_s0 = inlined_call_operand.vmem [shape: bf16[16,128], index: 0, kind: input, shape index: {}]   ;;  %s353_s2 = inlined_call_operand.vmem [shape: f32[1,256], index: 2, kind: input, shape index: {}]   ;;  %s354_s3 = inlined_call_operand.vmem [shape: bf16[16,256], index: 3, kind: output, shape index: {}]  }
   0x1   :  { %v245_v0 = vld [vmem:[%s351_s1 + $0x4] ss:$8 sps:$4 sm:$0xff]   ;;  %163 = vmatprep.mubr.bf16.mxu0 %v270_v1  ;;  %v247_v2 = vld [vmem:[%s351_s1] ss:$8 sps:$4 sm:$0xff]   ;;  %v248_v3 = vld [vmem:[%s351_s1 + $0x14] ss:$8 sps:$4 sm:$0xff]  }
   0x2   :  { %131 = vmatprep.subr.bf16.mxu0 %v245_v0  ;;  %v250_v4 = vld [vmem:[%s351_s1 + $0x10] ss:$8 sps:$4 sm:$0xff]   ;;  %v251_v5 = vld [vmem:[%s351_s1 + $0x24] ss:$8 sps:$4 sm:$0xff]   ;;  %v253_v6 = vld [vmem:[%s351_s1 + $0x20] ss:$8 sps:$4 sm:$0xff]  }
   0x3   :  { %132 = vmatpush1.bf16.msra.mxu0 %v247_v2  ;;  %v254_v7 = vld [vmem:[%s351_s1 + $0x34] ss:$8 sps:$4 sm:$0xff]   ;;  %v256_v8 = vld [vmem:[%s351_s1 + $0x30] ss:$8 sps:$4 sm:$0xff]   ;;  %v257_v9 = vld [vmem:[%s351_s1 + $0x44] ss:$8 sps:$4 sm:$0xff]  }
   0x4   :  { %133 = vmatprep.subr.bf16.mxu0 %v248_v3  ;;  %v259_v10 = vld [vmem:[%s351_s1 + $0x40] ss:$8 sps:$4 sm:$0xff]   ;;  %v260_v11 = vld [vmem:[%s351_s1 + $0x54] ss:$8 sps:$4 sm:$0xff]   ;;  %v262_v12 = vld [vmem:[%s351_s1 + $0x50] ss:$8 sps:$4 sm:$0xff]  }
   0x5   :  { %v263_v13 = vld [vmem:[%s351_s1 + $0x64] ss:$8 sps:$4 sm:$0xff]   ;;  %v265_v14 = vld [vmem:[%s351_s1 + $0x60] ss:$8 sps:$4 sm:$0xff]   ;;  %v266_v15 = vld [vmem:[%s351_s1 + $0x74] ss:$8 sps:$4 sm:$0xff]  }
   0x6   :  { %v268_v16 = vld [vmem:[%s351_s1 + $0x70] ss:$8 sps:$4 sm:$0xff]   ;;  %v269_v17 = vld [vmem:[%s352_s0] sm:$0xff]   ;;  %v192_v19 = vshrl.u32 %v191_v18, 7 }
   0x7   :  { %134 = vmatpush1.bf16.msra.mxu0 %v250_v4  ;;  %v189_v21 = vld [vmem:[%s353_s2] sm:$0x3] }
   0x8   :  { %135 = vmatprep.subr.bf16.mxu0 %v251_v5  ;;  %v193_v20 = vsub.s32 0, %v192_v19  ;;  %v197_v22 = vsub.s32 1, %v192_v19 }
   0xa   :  { %v194_v23 = vrot.slane %v189_v21, %v193_v20  ;;  %v198_v24 = vrot.slane %v189_v21, %v197_v22 }
   0xb   :  { %136 = vmatpush1.bf16.msra.mxu0 %v253_v6 }
   0xc   :  { %137 = vmatprep.subr.bf16.mxu0 %v254_v7 }
   0xf   :  { %138 = vmatpush1.bf16.msra.mxu0 %v256_v8 }
  0x10   :  { %139 = vmatprep.subr.bf16.mxu0 %v257_v9 }
  0x13   :  { %140 = vmatpush1.bf16.msra.mxu0 %v259_v10 }
  0x14   :  { %141 = vmatprep.subr.bf16.mxu0 %v260_v11 }
  0x17   :  { %142 = vmatpush1.bf16.msra.mxu0 %v262_v12 }
  0x18   :  { %143 = vmatprep.subr.bf16.mxu0 %v263_v13 }
  0x1b   :  { %144 = vmatpush1.bf16.msra.mxu0 %v265_v14 }
  0x1c   :  { %145 = vmatprep.subr.bf16.mxu0 %v266_v15 }
  0x1f   :  { %146 = vmatpush1.bf16.msra.mxu0 %v268_v16 }
  0x22   :  { %164 = vmatmul.mubr.bf16.vlgmr.msra.gmra.mrb[0].mxu0 %v269_v17 }
  0xf5   :  { %v165_v25 = vpop.f32.mrb[0].mxu0 }
  0xf6   :  { %v201_v26 = vadd.f32 %v194_v23, %v165_v25  ;;  %v167_v27 = vpop.f32.mrb[1].mxu0 }
  0xf7   :  { %v202_v28 = vadd.f32 %v198_v24, %v167_v27  ;;  %v169_v29 = vpop.f32.mrb[2].mxu0 }
  0xf8   :  { %v203_v30 = vadd.f32 %v194_v23, %v169_v29  ;;  %v171_v31 = vpop.f32.mrb[3].mxu0 }
  0xf9   :  { %v242_v32 = vpack.c.bf16 %v202_v28, %v201_v26  ;;  %v204_v33 = vadd.f32 %v198_v24, %v171_v31 }
  0xfb   :  { %217 = vst [vmem:[%s354_s3] sm:$0xff] %v242_v32  ;;  %v243_v34 = vpack.c.bf16 %v204_v33, %v203_v30 }
  0xfd   :  { %218 = vst [vmem:[%s354_s3 + $0x8] sm:$0xff] %v243_v34 }

// kernel: decoder_stack_forward.26
= control target key start
LH: loop header
LB: loop body
LE: loop exit
PB: predicated region body
PF: predicated region fallthrough
CT: control target
= control target key end

     0   :  { %s1350_s1 = inlined_call_operand.vmem [shape: bf16[1024,128], index: 1, kind: input, shape index: {}]   ;;  %s1351_s0 = inlined_call_operand.vmem [shape: bf16[16,1024], index: 0, kind: input, shape index: {}]   ;;  %s1352_s3 = inlined_call_operand.vmem [shape: bf16[16,128], index: 3, kind: input, shape index: {}]   ;;  %s1353_s2 = inlined_call_operand.vmem [shape: f32[1,128], index: 2, kind: input, shape index: {}]   ;;  %s1354_s4 = inlined_call_operand.vmem [shape: f32[1,128], index: 4, kind: input, shape index: {}]   ;;  %s1355_s5 = inlined_call_operand.vmem [shape: f32[1,128], index: 5, kind: input, shape index: {}]   ;;  %s1356_s6 = inlined_call_operand.vmem [shape: bf16[16,128], index: 6, kind: output, shape index: {}]  }
   0x1   :  { %v1016_v0 = vld [vmem:[%s1350_s1 + $0x40] sm:$0xff]   ;;  %v1020_v4 = vld [vmem:[%s1350_s1 + $0x48] sm:$0xff]   ;;  %v1024_v8 = vld [vmem:[%s1350_s1 + $0x50] sm:$0xff]  }
   0x2   :  { %v1017_v1 = vld [vmem:[%s1350_s1 + $0xc0] sm:$0xff]   ;;  %928 = vmatprep.subr.bf16.mxu0 %v1016_v0  ;;  %v1021_v5 = vld [vmem:[%s1350_s1 + $0xc8] sm:$0xff]   ;;  %v1025_v9 = vld [vmem:[%s1350_s1 + $0xd0] sm:$0xff]  }
   0x3   :  { %v1018_v2 = vld [vmem:[%s1350_s1] sm:$0xff]   ;;  %950 = vmatprep.subr.bf16.mxu1 %v1017_v1  ;;  %v1022_v6 = vld [vmem:[%s1350_s1 + $0x8] sm:$0xff]   ;;  %v1026_v10 = vld [vmem:[%s1350_s1 + $0x10] sm:$0xff]  }
   0x4   :  { %v1019_v3 = vld [vmem:[%s1350_s1 + $0x80] sm:$0xff]   ;;  %929 = vmatpush3.bf16.msra.mxu0 %v1018_v2  ;;  %v1023_v7 = vld [vmem:[%s1350_s1 + $0x88] sm:$0xff]   ;;  %v1027_v11 = vld [vmem:[%s1350_s1 + $0x90] sm:$0xff]  }
   0x5   :  { %951 = vmatpush3.bf16.msra.mxu1 %v1019_v3  ;;  %930 = vmatprep.subr.bf16.mxu0 %v1020_v4  ;;  %v1028_v12 = vld [vmem:[%s1350_s1 + $0x58] sm:$0xff]   ;;  %v1032_v16 = vld [vmem:[%s1350_s1 + $0x60] sm:$0xff]   ;;  %v1036_v20 = vld [vmem:[%s1350_s1 + $0x68] sm:$0xff]  }
   0x6   :  { %952 = vmatprep.subr.bf16.mxu1 %v1021_v5  ;;  %v1029_v13 = vld [vmem:[%s1350_s1 + $0xd8] sm:$0xff]   ;;  %v1033_v17 = vld [vmem:[%s1350_s1 + $0xe0] sm:$0xff]   ;;  %v1037_v21 = vld [vmem:[%s1350_s1 + $0xe8] sm:$0xff]  }
   0x7   :  { %v1030_v14 = vld [vmem:[%s1350_s1 + $0x18] sm:$0xff]   ;;  %v1034_v18 = vld [vmem:[%s1350_s1 + $0x20] sm:$0xff]   ;;  %v1038_v22 = vld [vmem:[%s1350_s1 + $0x28] sm:$0xff]  }
   0x8   :  { %931 = vmatpush3.bf16.msra.mxu0 %v1022_v6  ;;  %v1031_v15 = vld [vmem:[%s1350_s1 + $0x98] sm:$0xff]   ;;  %v1035_v19 = vld [vmem:[%s1350_s1 + $0xa0] sm:$0xff]   ;;  %v1039_v23 = vld [vmem:[%s1350_s1 + $0xa8] sm:$0xff]  }
   0x9   :  { %953 = vmatpush3.bf16.msra.mxu1 %v1023_v7  ;;  %932 = vmatprep.subr.bf16.mxu0 %v1024_v8  ;;  %v1040_v24 = vld [vmem:[%s1350_s1 + $0x70] sm:$0xff]   ;;  %v1044_v28 = vld [vmem:[%s1350_s1 + $0x78] sm:$0xff]   ;;  %v32_v32 = vld [vmem:[%s1351_s0] sm:$0xff] }
   0xa   :  { %954 = vmatprep.subr.bf16.mxu1 %v1025_v9  ;;  %v1041_v25 = vld [vmem:[%s1350_s1 + $0xf0] sm:$0xff]   ;;  %v1045_v29 = vld [vmem:[%s1350_s1 + $0xf8] sm:$0xff]   ;;  %v36_v33 = vld [vmem:[%s1351_s0 + $0x20] sm:$0xff] }
   0xb   :  { %v1042_v26 = vld [vmem:[%s1350_s1 + $0x30] sm:$0xff]   ;;  %v1046_v30 = vld [vmem:[%s1350_s1 + $0x38] sm:$0xff]   ;;  %v33_v34 = vld [vmem:[%s1351_s0 + $0x8] sm:$0xff]  ;;  %v840_v35 = vcombine.low %v32_v32, %v36_v33  ;;  %v841_v36 = vcombine.high %v32_v32, %v36_v33 }
   0xc   :  { %933 = vmatpush3.bf16.msra.mxu0 %v1026_v10  ;;  %v1043_v27 = vld [vmem:[%s1350_s1 + $0xb0] sm:$0xff]   ;;  %v1047_v31 = vld [vmem:[%s1350_s1 + $0xb8] sm:$0xff]   ;;  %v37_v37 = vld [vmem:[%s1351_s0 + $0x28] sm:$0xff] }
   0xd   :  { %955 = vmatpush3.bf16.msra.mxu1 %v1027_v11  ;;  %934 = vmatprep.subr.bf16.mxu0 %v1028_v12  ;;  %v842_v38 = vcombine.low %v33_v34, %v37_v37  ;;  %v843_v39 = vcombine.high %v33_v34, %v37_v37  ;;  %v1048_v40 = vld [vmem:[%s1350_s1 + $0x140] sm:$0xff]   ;;  %v1052_v44 = vld [vmem:[%s1350_s1 + $0x148] sm:$0xff]   ;;  %v1056_v48 = vld [vmem:[%s1350_s1 + $0x150] sm:$0xff]  }
   0xe   :  { %956 = vmatprep.subr.bf16.mxu1 %v1029_v13  ;;  %624 = vmatprep.mubr.bf16.mxu0 %v841_v36  ;;  %v1049_v41 = vld [vmem:[%s1350_s1 + $0x1c0] sm:$0xff]   ;;  %v1053_v45 = vld [vmem:[%s1350_s1 + $0x1c8] sm:$0xff]   ;;  %v1057_v49 = vld [vmem:[%s1350_s1 + $0x1d0] sm:$0xff]  }
   0xf   :  { %665 = vmatprep.mubr.bf16.mxu1 %v843_v39  ;;  %v1050_v42 = vld [vmem:[%s1350_s1 + $0x100] sm:$0xff]   ;;  %v1054_v46 = vld [vmem:[%s1350_s1 + $0x108] sm:$0xff]   ;;  %v1058_v50 = vld [vmem:[%s1350_s1 + $0x110] sm:$0xff]  }
  0x10   :  { %935 = vmatpush3.bf16.msra.mxu0 %v1030_v14  ;;  %v1051_v43 = vld [vmem:[%s1350_s1 + $0x180] sm:$0xff]   ;;  %v1055_v47 = vld [vmem:[%s1350_s1 + $0x188] sm:$0xff]   ;;  %v1059_v51 = vld [vmem:[%s1350_s1 + $0x190] sm:$0xff]  }
  0x11   :  { %957 = vmatpush3.bf16.msra.mxu1 %v1031_v15  ;;  %936 = vmatprep.subr.bf16.mxu0 %v1032_v16  ;;  %v1060_v52 = vld [vmem:[%s1350_s1 + $0x158] sm:$0xff]   ;;  %v1064_v56 = vld [vmem:[%s1350_s1 + $0x160] sm:$0xff]   ;;  %v1068_v60 = vld [vmem:[%s1350_s1 + $0x168] sm:$0xff]  }
  0x12   :  { %958 = vmatprep.subr.bf16.mxu1 %v1033_v17  ;;  %v1061_v53 = vld [vmem:[%s1350_s1 + $0x1d8] sm:$0xff]   ;;  %v1065_v57 = vld [vmem:[%s1350_s1 + $0x1e0] sm:$0xff]   ;;  %v1069_v61 = vld [vmem:[%s1350_s1 + $0x1e8] sm:$0xff]  }
  0x13   :  { %v1062_v54 = vld [vmem:[%s1350_s1 + $0x118] sm:$0xff]   ;;  %v1066_v58 = vld [vmem:[%s1350_s1 + $0x120] sm:$0xff]   ;;  %v1070_v62 = vld [vmem:[%s1350_s1 + $0x128] sm:$0xff]  }
  0x14   :  { %937 = vmatpush3.bf16.msra.mxu0 %v1034_v18  ;;  %v1063_v55 = vld [vmem:[%s1350_s1 + $0x198] sm:$0xff]   ;;  %v1067_v59 = vld [vmem:[%s1350_s1 + $0x1a0] sm:$0xff]   ;;  %v1071_v63 = vld [vmem:[%s1350_s1 + $0x1a8] sm:$0xff]  }
  0x15   :  { %959 = vmatpush3.bf16.msra.mxu1 %v1035_v19  ;;  %938 = vmatprep.subr.bf16.mxu0 %v1036_v20  ;;  %v1072_v0 = vld [vmem:[%s1350_s1 + $0x170] sm:$0xff]   ;;  %v1076_v4 = vld [vmem:[%s1350_s1 + $0x178] sm:$0xff]   ;;  %v920_v39 = vld [vmem:[%s1352_s3] sm:$0xff]  }
  0x16   :  { %960 = vmatprep.subr.bf16.mxu1 %v1037_v21  ;;  %v1073_v1 = vld [vmem:[%s1350_s1 + $0x1f0] sm:$0xff]   ;;  %v1077_v5 = vld [vmem:[%s1350_s1 + $0x1f8] sm:$0xff]  }
  0x17   :  { %v1074_v2 = vld [vmem:[%s1350_s1 + $0x130] sm:$0xff]   ;;  %v1078_v6 = vld [vmem:[%s1350_s1 + $0x138] sm:$0xff]  }
  0x18   :  { %939 = vmatpush3.bf16.msra.mxu0 %v1038_v22  ;;  %v1075_v3 = vld [vmem:[%s1350_s1 + $0x1b0] sm:$0xff]   ;;  %v1079_v7 = vld [vmem:[%s1350_s1 + $0x1b8] sm:$0xff]  }
  0x19   :  { %961 = vmatpush3.bf16.msra.mxu1 %v1039_v23  ;;  %940 = vmatprep.subr.bf16.mxu0 %v1040_v24  ;;  %v34_v8 = vld [vmem:[%s1351_s0 + $0x10] sm:$0xff]  ;;  %v35_v12 = vld [vmem:[%s1351_s0 + $0x18] sm:$0xff] }
  0x1a   :  { %962 = vmatprep.subr.bf16.mxu1 %v1041_v25  ;;  %v38_v9 = vld [vmem:[%s1351_s0 + $0x30] sm:$0xff]  ;;  %v39_v13 = vld [vmem:[%s1351_s0 + $0x38] sm:$0xff] }
  0x1b   :  { %v844_v10 = vcombine.low %v34_v8, %v38_v9  ;;  %v845_v11 = vcombine.high %v34_v8, %v38_v9  ;;  %v846_v14 = vcombine.low %v35_v12, %v39_v13  ;;  %v847_v15 = vcombine.high %v35_v12, %v39_v13 }
  0x1c   :  { %941 = vmatpush3.bf16.msra.mxu0 %v1042_v26 }
  0x1d   :  { %963 = vmatpush3.bf16.msra.mxu1 %v1043_v27  ;;  %942 = vmatprep.subr.bf16.mxu0 %v1044_v28 }
  0x1e   :  { %964 = vmatprep.subr.bf16.mxu1 %v1045_v29 }
  0x20   :  { %943 = vmatpush3.bf16.msra.mxu0 %v1046_v30 }
  0x21   :  { %965 = vmatpush3.bf16.msra.mxu1 %v1047_v31  ;;  %972 = vmatprep.subr.bf16.mxu0 %v1048_v40 }
  0x22   :  { %994 = vmatprep.subr.bf16.mxu1 %v1049_v41 }
  0x23   :  { %625 = vmatmul.mubr.bf16.vlgmr.msra.gmra.mrb[0].mxu0 %v840_v35 }
  0x24   :  { %666 = vmatmul.mubr.bf16.vlgmr.msra.gmra.mrb[0].mxu1 %v842_v38  ;;  %973 = vmatpush3.bf16.msra.mxu0 %v1050_v42 }
  0x25   :  { %995 = vmatpush3.bf16.msra.mxu1 %v1051_v43  ;;  %974 = vmatprep.subr.bf16.mxu0 %v1052_v44  ;;  %v912_v43 = vld [vmem:[%s1353_s2] ss:$0 sm:$0xff] }
  0x26   :  { %996 = vmatprep.subr.bf16.mxu1 %v1053_v45  ;;  %706 = vmatprep.mubr.bf16.mxu0 %v845_v11  ;;  %v913_v11 = vld [vmem:[%s1354_s4] ss:$0 sm:$0xff] }
  0x27   :  { %747 = vmatprep.mubr.bf16.mxu1 %v847_v15 }
  0x28   :  { %975 = vmatpush3.bf16.msra.mxu0 %v1054_v46 }
  0x29   :  { %997 = vmatpush3.bf16.msra.mxu1 %v1055_v47  ;;  %976 = vmatprep.subr.bf16.mxu0 %v1056_v48  ;;  %v921_v47 = vunpack.c.l.bf16 %v920_v39 }
  0x2a   :  { %998 = vmatprep.subr.bf16.mxu1 %v1057_v49 }
  0x2c   :  { %977 = vmatpush3.bf16.msra.mxu0 %v1058_v50  ;;  %v922_v50 = vunpack.c.h.bf16 %v920_v39 }
  0x2d   :  { %999 = vmatpush3.bf16.msra.mxu1 %v1059_v51  ;;  %978 = vmatprep.subr.bf16.mxu0 %v1060_v52 }
  0x2e   :  { %1000 = vmatprep.subr.bf16.mxu1 %v1061_v53 }
  0x30   :  { %979 = vmatpush3.bf16.msra.mxu0 %v1062_v54 }
  0x31   :  { %1001 = vmatpush3.bf16.msra.mxu1 %v1063_v55  ;;  %980 = vmatprep.subr.bf16.mxu0 %v1064_v56 }
  0x32   :  { %1002 = vmatprep.subr.bf16.mxu1 %v1065_v57 }
  0x34   :  { %981 = vmatpush3.bf16.msra.mxu0 %v1066_v58 }
  0x35   :  { %1003 = vmatpush3.bf16.msra.mxu1 %v1067_v59  ;;  %982 = vmatprep.subr.bf16.mxu0 %v1068_v60 }
  0x36   :  { %1004 = vmatprep.subr.bf16.mxu1 %v1069_v61 }
  0x38   :  { %983 = vmatpush3.bf16.msra.mxu0 %v1070_v62 }
  0x39   :  { %1005 = vmatpush3.bf16.msra.mxu1 %v1071_v63  ;;  %984 = vmatprep.subr.bf16.mxu0 %v1072_v0 }
  0x3a   :  { %1006 = vmatprep.subr.bf16.mxu1 %v1073_v1 }
  0x3c   :  { %985 = vmatpush3.bf16.msra.mxu0 %v1074_v2 }
  0x3d   :  { %1007 = vmatpush3.bf16.msra.mxu1 %v1075_v3  ;;  %986 = vmatprep.subr.bf16.mxu0 %v1076_v4 }
  0x3e   :  { %1008 = vmatprep.subr.bf16.mxu1 %v1077_v5 }
  0x40   :  { %987 = vmatpush3.bf16.msra.mxu0 %v1078_v6 }
  0x41   :  { %1009 = vmatpush3.bf16.msra.mxu1 %v1079_v7 }
  0x43   :  { %707 = vmatmul.mubr.bf16.vlgmr.msra.gmra.mrb[4].mxu0 %v844_v10 }
  0x44   :  { %748 = vmatmul.mubr.bf16.vlgmr.msra.gmra.mrb[4].mxu1 %v846_v14 }
  0xf6   :  { %v944_v16 = vpop.f32.mrb[0].mxu0 }
  0xf7   :  { %v966_v17 = vpop.f32.mrb[0].mxu1  ;;  %v945_v18 = vpop.f32.mrb[1].mxu0 }
  0xf8   :  { %v946_v19 = vadd.f32 %v945_v18, %v944_v16  ;;  %v967_v20 = vpop.f32.mrb[1].mxu1  ;;  %v947_v21 = vpop.f32.mrb[2].mxu0  ;;  %v914_v16 = vld [vmem:[%s1355_s5] ss:$0 sm:$0xff] }
  0xf9   :  { %v968_v22 = vadd.f32 %v967_v20, %v966_v17  ;;  %v969_v23 = vpop.f32.mrb[2].mxu1  ;;  %v948_v24 = vpop.f32.mrb[3].mxu0 }
  0xfa   :  { %v949_v25 = vadd.f32 %v948_v24, %v947_v21  ;;  %v970_v26 = vpop.f32.mrb[3].mxu1 }
  0xfb   :  { %v668_v27 = vadd.f32 %v968_v22, %v946_v19  ;;  %v971_v28 = vadd.f32 %v970_v26, %v969_v23 }
  0xfd   :  { %v671_v29 = vadd.f32 %v971_v28, %v949_v25 }
 0x116   :  { %v988_v30 = vpop.f32.mrb[4].mxu0 }
 0x117   :  { %v1010_v31 = vpop.f32.mrb[4].mxu1  ;;  %v989_v32 = vpop.f32.mrb[5].mxu0 }
 0x118   :  { %v990_v33 = vadd.f32 %v989_v32, %v988_v30  ;;  %v1011_v34 = vpop.f32.mrb[5].mxu1  ;;  %v991_v35 = vpop.f32.mrb[6].mxu0 }
 0x119   :  { %v1012_v36 = vadd.f32 %v1011_v34, %v1010_v31  ;;  %v1013_v37 = vpop.f32.mrb[6].mxu1  ;;  %v992_v38 = vpop.f32.mrb[7].mxu0 }
 0x11a   :  { %v709_v40 = vadd.f32 %v990_v33, %v668_v27  ;;  %v993_v41 = vadd.f32 %v992_v38, %v991_v35  ;;  %v1014_v42 = vpop.f32.mrb[7].mxu1 }
 0x11b   :  { %v1015_v44 = vadd.f32 %v1014_v42, %v1013_v37 }
 0x11c   :  { %v750_v45 = vadd.f32 %v1012_v36, %v709_v40  ;;  %v712_v46 = vadd.f32 %v993_v41, %v671_v29 }
 0x11e   :  { %v772_v48 = vadd.f32 %v912_v43, %v750_v45  ;;  %v753_v49 = vadd.f32 %v1015_v44, %v712_v46 }
 0x120   :  { %v773_v51 = vadd.f32 %v912_v43, %v753_v49  ;;  %v778_v52 = vadd.f32 %v921_v47, %v772_v48 }
 0x122   :  { %780 = vadd.xlane.f32.xlu0 %v778_v52  ;;  %v786_v53 = vmul.f32 %v778_v52, %v778_v52  ;;  %v779_v54 = vadd.f32 %v922_v50, %v773_v51 }
 0x124   :  { %788 = vadd.xlane.f32.xlu1 %v786_v53  ;;  %v787_v55 = vmul.f32 %v779_v54, %v779_v54 }
 0x126   :  { %782 = vadd.xlane.f32.xlu0 %v779_v54 }
 0x128   :  { %790 = vadd.xlane.f32.xlu1 %v787_v55 }
 0x1af   :  { %v781_v56 = vpop.xlane.xlu0 %780 }
 0x1b0   :  { %v784_v57 = vmul.f32 0.03125, %v781_v56 }
 0x1b1   :  { %v789_v58 = vpop.xlane.xlu1 %788 }
 0x1b2   :  { %v794_v59 = vmul.f32 %v784_v57, %v784_v57  ;;  %v792_v60 = vmul.f32 0.03125, %v789_v58  ;;  %v800_v8 = vsub.f32 %v778_v52, %v784_v57 }
 0x1b3   :  { %v783_v61 = vpop.xlane.xlu0 %782 }
 0x1b4   :  { %v796_v62 = vsub.f32 %v792_v60, %v794_v59  ;;  %v785_v63 = vmul.f32 0.03125, %v783_v61 }
 0x1b5   :  { %v791_v0 = vpop.xlane.xlu1 %790 }
 0x1b6   :  { %v798_v1 = vmax.f32 %v796_v62, 0.0  ;;  %v795_v2 = vmul.f32 %v785_v63, %v785_v63  ;;  %v793_v3 = vmul.f32 0.03125, %v791_v0  ;;  %v801_v12 = vsub.f32 %v779_v54, %v785_v63 }
 0x1b8   :  { %v802_v4 = vadd.f32 1e-05, %v798_v1  ;;  %v797_v5 = vsub.f32 %v793_v3, %v795_v2 }
 0x1ba   :  { %1080 = vrsqrt.f32 %v802_v4  ;;  %v799_v6 = vmax.f32 %v797_v5, 0.0 }
 0x1bc   :  { %v803_v7 = vadd.f32 1e-05, %v799_v6 }
 0x1be   :  { %1082 = vrsqrt.f32 %v803_v7 }
 0x1c4   :  { %v1081_v9 = vpop.eup %1080 }
 0x1c5   :  { %v806_v10 = vmul.f32 %v1081_v9, %v800_v8 }
 0x1c7   :  { %v815_v14 = vmul.f32 %v913_v11, %v806_v10 }
 0x1c8   :  { %v1083_v13 = vpop.eup %1082 }
 0x1c9   :  { %v807_v15 = vmul.f32 %v1083_v13, %v801_v12  ;;  %v824_v18 = vadd.f32 %v914_v16, %v815_v14 }
 0x1cb   :  { %v816_v17 = vmul.f32 %v913_v11, %v807_v15 }
 0x1cd   :  { %v825_v19 = vadd.f32 %v914_v16, %v816_v17 }
 0x1cf   :  { %v926_v20 = vpack.c.bf16 %v825_v19, %v824_v18 }
 0x1d1   :  { %927 = vst [vmem:[%s1356_s6] sm:$0xff] %v926_v20  }

// kernel: decoder_stack_forward.34
= control target key start
LH: loop header
LB: loop body
LE: loop exit
PB: predicated region body
PF: predicated region fallthrough
CT: control target
= control target key end

     0   :  { %s1077_s12 = smov 0   ;;  %s1079_s13 = smov 0   ;;  %s1262_s0 = inlined_call_operand.vmem [shape: bf16[16,128], index: 0, kind: input, shape index: {}]   ;;  %s1263_s1 = inlined_call_operand.vmem [shape: bf16[128,1024], index: 1, kind: input, shape index: {}]   ;;  %s1264_s2 = inlined_call_operand.vmem [shape: f32[1,1024], index: 2, kind: input, shape index: {}]   ;;  %s1265_s3 = inlined_call_operand.vmem [shape: bf16[16,1024], index: 3, kind: output, shape index: {}]  }
   0x1   :  { %s1081_s14 = smov 0   ;;  %s1083_s15 = smov 0  }
   0x2   :  { %s1085_s16 = smov 0  }
   0x3 LB: > { %s28_s17 = sadd.s32 1, %s1050_s15  ;;  %s866_s18 = sadd.s32 4294967295, %s1054_s16   ;;  %s1054_s16 = sphi %s1085_s16, %s13_s16   ;;  %s1050_s15 = sphi %s1083_s15, %s1270_s15   ;;  %s1046_s14 = sphi %s1081_s14, %s1269_s14   ;;  %s1042_s13 = sphi %s1079_s13, %s1268_s13   ;;  %s1038_s12 = sphi %s1077_s12, %s1267_s12  }
   0x4   : > { %p30_p0 = scmp.ge.s32.totalorder %s28_s17, 2  ;;  %p76_p1 = scmp.ne.s32.totalorder %s1042_s13, %s1038_s12 }
   0x5   : > { %p77_p2 = scmp.eq.s32.totalorder %s1054_s16, 0  ;;  %p134_p4 = scmp.eq.s32.totalorder %s866_s18, 1 }
   0x6   : > { %s1272_s17 = smov (%p30_p0, %s28_s17), 0  ;;  %s69_s20 = sadd.s32 1, %s1042_s13 }
   0x7   : > { %p78_p3 = por %p77_p2, %p76_p1  ;;  %s65_s19 = ssub.s32 %s1050_s15, %s1272_s17 }
   0x8   : > { %p67_p5 = scmp.eq.s32.totalorder %s65_s19, 0  ;;  %p1112_p6 = por %p134_p4, %p76_p1 }
   0x9   : > { %p870_p7 = scmp.ge.s32.totalorder %s1054_s16, 2 }
   0xa   : > { %s1117_s22 = scalar_select %p67_p5, %s1042_s13, %s69_s20  }
   0xb   : > { %168 = sbr.rel (%p870_p7) target bundleno = 38 (0x26), region = 20 }
  0x12   : > { %171 = sbr.rel (!%p78_p3) target bundleno = 38 (0x26), region = 24  ;;  %s173_s23 = sand.u32 (%p78_p3), 1, %s1042_s13  }
  0x13   : > { %s920_s24 = sshll.u32 (%p78_p3), %s1050_s15, 4  ;;  %s871_s25 = sshll.u32 (%p78_p3), %s173_s23, 8 }
  0x14   : > { %s1125_s28 = scalar_lea.vmem (%p78_p3), %s1263_s1, %s920_s24  ;;  %s1130_s29 = scalar_lea.vmem (%p78_p3), [#allocation3], %s871_s25 }
  0x15   : > { %v194_v0 = vld [vmem:[%s1125_s28] sm:$0xff] (%p78_p3)  ;;  %v196_v1 = vld [vmem:[%s1125_s28 + $0x8] sm:$0xff] (%p78_p3) }
  0x16   : > { %v198_v2 = vld [vmem:[%s1125_s28 + $0x20] sm:$0xff] (%p78_p3)  ;;  %195 = vst [vmem:[%s1130_s29] sm:$0xff] (%p78_p3), %v194_v0  ;;  %197 = vst [vmem:[%s1130_s29 + $0x8] sm:$0xff] (%p78_p3), %v196_v1  ;;  %v200_v3 = vld [vmem:[%s1125_s28 + $0x28] sm:$0xff] (%p78_p3) }
  0x17   : > { %199 = vst [vmem:[%s1130_s29 + $0x10] sm:$0xff] (%p78_p3), %v198_v2  ;;  %v202_v4 = vld [vmem:[%s1125_s28 + $0x40] sm:$0xff] (%p78_p3)  ;;  %v204_v5 = vld [vmem:[%s1125_s28 + $0x48] sm:$0xff] (%p78_p3)  ;;  %201 = vst [vmem:[%s1130_s29 + $0x18] sm:$0xff] (%p78_p3), %v200_v3 }
  0x18   : > { %203 = vst [vmem:[%s1130_s29 + $0x20] sm:$0xff] (%p78_p3), %v202_v4  ;;  %205 = vst [vmem:[%s1130_s29 + $0x28] sm:$0xff] (%p78_p3), %v204_v5  ;;  %v206_v6 = vld [vmem:[%s1125_s28 + $0x60] sm:$0xff] (%p78_p3)  ;;  %v208_v7 = vld [vmem:[%s1125_s28 + $0x68] sm:$0xff] (%p78_p3) }
  0x19   : > { %v210_v8 = vld [vmem:[%s1125_s28 + $0x80] sm:$0xff]  ;;  %207 = vst [vmem:[%s1130_s29 + $0x30] sm:$0xff] %v206_v6  ;;  %209 = vst [vmem:[%s1130_s29 + $0x38] sm:$0xff] %v208_v7  ;;  %v212_v9 = vld [vmem:[%s1125_s28 + $0x88] sm:$0xff] }
  0x1a   : > { %211 = vst [vmem:[%s1130_s29 + $0x40] sm:$0xff] %v210_v8  ;;  %v214_v10 = vld [vmem:[%s1125_s28 + $0xa0] sm:$0xff]  ;;  %v216_v11 = vld [vmem:[%s1125_s28 + $0xa8] sm:$0xff]  ;;  %213 = vst [vmem:[%s1130_s29 + $0x48] sm:$0xff] %v212_v9 }
  0x1b   : > { %215 = vst [vmem:[%s1130_s29 + $0x50] sm:$0xff] %v214_v10  ;;  %217 = vst [vmem:[%s1130_s29 + $0x58] sm:$0xff] %v216_v11  ;;  %v218_v12 = vld [vmem:[%s1125_s28 + $0xc0] sm:$0xff]  ;;  %v220_v13 = vld [vmem:[%s1125_s28 + $0xc8] sm:$0xff] }
  0x1c   : > { %v222_v14 = vld [vmem:[%s1125_s28 + $0xe0] sm:$0xff]  ;;  %219 = vst [vmem:[%s1130_s29 + $0x60] sm:$0xff] %v218_v12  ;;  %221 = vst [vmem:[%s1130_s29 + $0x68] sm:$0xff] %v220_v13  ;;  %v224_v15 = vld [vmem:[%s1125_s28 + $0xe8] sm:$0xff] }
  0x1d   : > { %223 = vst [vmem:[%s1130_s29 + $0x70] sm:$0xff] %v222_v14  ;;  %v226_v16 = vld [vmem:[%s1125_s28 + $0x100] sm:$0xff]  ;;  %v228_v17 = vld [vmem:[%s1125_s28 + $0x108] sm:$0xff]  ;;  %225 = vst [vmem:[%s1130_s29 + $0x78] sm:$0xff] %v224_v15 }
  0x1e   : > { %227 = vst [vmem:[%s1130_s29 + $0x80] sm:$0xff] %v226_v16  ;;  %229 = vst [vmem:[%s1130_s29 + $0x88] sm:$0xff] %v228_v17  ;;  %v230_v18 = vld [vmem:[%s1125_s28 + $0x120] sm:$0xff]  ;;  %v232_v19 = vld [vmem:[%s1125_s28 + $0x128] sm:$0xff] }
  0x1f   : > { %v234_v20 = vld [vmem:[%s1125_s28 + $0x140] sm:$0xff]  ;;  %231 = vst [vmem:[%s1130_s29 + $0x90] sm:$0xff] %v230_v18  ;;  %233 = vst [vmem:[%s1130_s29 + $0x98] sm:$0xff] %v232_v19  ;;  %v236_v21 = vld [vmem:[%s1125_s28 + $0x148] sm:$0xff] }
  0x20   : > { %235 = vst [vmem:[%s1130_s29 + $0xa0] sm:$0xff] %v234_v20  ;;  %v238_v22 = vld [vmem:[%s1125_s28 + $0x160] sm:$0xff]  ;;  %v240_v23 = vld [vmem:[%s1125_s28 + $0x168] sm:$0xff]  ;;  %237 = vst [vmem:[%s1130_s29 + $0xa8] sm:$0xff] %v236_v21 }
  0x21   : > { %239 = vst [vmem:[%s1130_s29 + $0xb0] sm:$0xff] %v238_v22  ;;  %241 = vst [vmem:[%s1130_s29 + $0xb8] sm:$0xff] %v240_v23  ;;  %v242_v24 = vld [vmem:[%s1125_s28 + $0x180] sm:$0xff]  ;;  %v244_v25 = vld [vmem:[%s1125_s28 + $0x188] sm:$0xff] }
  0x22   : > { %v246_v26 = vld [vmem:[%s1125_s28 + $0x1a0] sm:$0xff]  ;;  %243 = vst [vmem:[%s1130_s29 + $0xc0] sm:$0xff] %v242_v24  ;;  %245 = vst [vmem:[%s1130_s29 + $0xc8] sm:$0xff] %v244_v25  ;;  %v248_v27 = vld [vmem:[%s1125_s28 + $0x1a8] sm:$0xff] }
  0x23   : > { %247 = vst [vmem:[%s1130_s29 + $0xd0] sm:$0xff] %v246_v26  ;;  %v250_v28 = vld [vmem:[%s1125_s28 + $0x1c0] sm:$0xff]  ;;  %v252_v29 = vld [vmem:[%s1125_s28 + $0x1c8] sm:$0xff]  ;;  %249 = vst [vmem:[%s1130_s29 + $0xd8] sm:$0xff] %v248_v27 }
  0x24   : > { %251 = vst [vmem:[%s1130_s29 + $0xe0] sm:$0xff] %v250_v28  ;;  %253 = vst [vmem:[%s1130_s29 + $0xe8] sm:$0xff] %v252_v29  ;;  %v254_v30 = vld [vmem:[%s1125_s28 + $0x1e0] sm:$0xff]  ;;  %v256_v31 = vld [vmem:[%s1125_s28 + $0x1e8] sm:$0xff] }
  0x25   : > { %255 = vst [vmem:[%s1130_s29 + $0xf0] sm:$0xff] %v254_v30  ;;  %257 = vst [vmem:[%s1130_s29 + $0xf8] sm:$0xff] %v256_v31 }
  0x26 PF: > { %p874_p8 = scmp.ge.s32.totalorder %s1054_s16, 1  ;;  %p270_p9 = scmp.lt.s32.totalorder %s1054_s16, 3 }
  0x28   : > { %p271_p10 = pnand %p874_p8, %p270_p9 }
  0x29   : > { %s277_s30 = sand.u32 (!%p271_p10), 1, %s1038_s12   ;;  %v1056_v32 = vmov (!%p271_p10), 0   ;;  %v1015_v1 = vld [vmem:[%s1262_s0] sm:$0xff] (!%p271_p10)   ;;  %s877_s8 = sshll.u32 (!%p271_p10), %s1046_s14, 2  ;;  %v665_v2 = vlaneseq (!%p271_p10) }
  0x2a   : > { %274 = sbr.rel (%p271_p10) target bundleno = 307 (0x133), region = 51  ;;  %s875_s4 = sshll.u32 (!%p271_p10), %s277_s30, 8  ;;  %582 = vmatprep.mubr.bf16.mxu0 (!%p271_p10), %v1056_v32  ;;  %625 = vmatprep.mubr.bf16.mxu1 (!%p271_p10), %v1056_v32 }
  0x2b   : > { %s1198_s5 = scalar_lea.vmem (!%p271_p10), [#allocation3], %s875_s4  ;;  %p323_p11 = scmp.lt.s32.totalorder (!%p271_p10), %s877_s8, 7  ;;  %v666_v3 = vshrl.u32 (!%p271_p10), %v665_v2, 7 }
  0x2c   : > { %v967_v33 = vld [vmem:[%s1198_s5 + $0x4] ss:$16 sps:$4 sm:$0xff] (!%p271_p10)   ;;  %v969_v34 = vld [vmem:[%s1198_s5 + $0xc] ss:$16 sps:$4 sm:$0xff] (!%p271_p10)   ;;  %v971_v35 = vld [vmem:[%s1198_s5] ss:$16 sps:$4 sm:$0xff] (!%p271_p10)  }
  0x2d   : > { %550 = vmatprep.subr.bf16.mxu0 (!%p271_p10), %v967_v33  ;;  %v972_v36 = vld [vmem:[%s1198_s5 + $0x8] ss:$16 sps:$4 sm:$0xff] (!%p271_p10)   ;;  %593 = vmatprep.subr.bf16.mxu1 (!%p271_p10), %v969_v34  ;;  %v973_v37 = vld [vmem:[%s1198_s5 + $0x24] ss:$16 sps:$4 sm:$0xff] (!%p271_p10)   ;;  %v975_v38 = vld [vmem:[%s1198_s5 + $0x2c] ss:$16 sps:$4 sm:$0xff] (!%p271_p10)  }
  0x2e   : > { %551 = vmatpush1.bf16.msra.mxu0 (!%p271_p10), %v971_v35  ;;  %594 = vmatpush1.bf16.msra.mxu1 (!%p271_p10), %v972_v36  ;;  %v977_v39 = vld [vmem:[%s1198_s5 + $0x20] ss:$16 sps:$4 sm:$0xff] (!%p271_p10)   ;;  %v978_v40 = vld [vmem:[%s1198_s5 + $0x28] ss:$16 sps:$4 sm:$0xff] (!%p271_p10)   ;;  %v979_v41 = vld [vmem:[%s1198_s5 + $0x44] ss:$16 sps:$4 sm:$0xff] (!%p271_p10)  }
  0x2f   : > { %552 = vmatprep.subr.bf16.mxu0 (!%p271_p10), %v973_v37  ;;  %595 = vmatprep.subr.bf16.mxu1 (!%p271_p10), %v975_v38  ;;  %v981_v42 = vld [vmem:[%s1198_s5 + $0x4c] ss:$16 sps:$4 sm:$0xff] (!%p271_p10)   ;;  %v983_v43 = vld [vmem:[%s1198_s5 + $0x40] ss:$16 sps:$4 sm:$0xff] (!%p271_p10)   ;;  %v984_v44 = vld [vmem:[%s1198_s5 + $0x48] ss:$16 sps:$4 sm:$0xff] (!%p271_p10)  }
  0x30   : > { %v985_v45 = vld [vmem:[%s1198_s5 + $0x64] ss:$16 sps:$4 sm:$0xff] (!%p271_p10)   ;;  %v987_v46 = vld [vmem:[%s1198_s5 + $0x6c] ss:$16 sps:$4 sm:$0xff] (!%p271_p10)   ;;  %v989_v47 = vld [vmem:[%s1198_s5 + $0x60] ss:$16 sps:$4 sm:$0xff] (!%p271_p10)  }
  0x31   : > { %v990_v48 = vld [vmem:[%s1198_s5 + $0x68] ss:$16 sps:$4 sm:$0xff]   ;;  %v991_v49 = vld [vmem:[%s1198_s5 + $0x84] ss:$16 sps:$4 sm:$0xff]   ;;  %v993_v50 = vld [vmem:[%s1198_s5 + $0x8c] ss:$16 sps:$4 sm:$0xff]  }
  0x32   : > { %553 = vmatpush1.bf16.msra.mxu0 %v977_v39  ;;  %596 = vmatpush1.bf16.msra.mxu1 %v978_v40  ;;  %v995_v51 = vld [vmem:[%s1198_s5 + $0x80] ss:$16 sps:$4 sm:$0xff]   ;;  %v996_v52 = vld [vmem:[%s1198_s5 + $0x88] ss:$16 sps:$4 sm:$0xff]   ;;  %v997_v53 = vld [vmem:[%s1198_s5 + $0xa4] ss:$16 sps:$4 sm:$0xff]  }
  0x33   : > { %554 = vmatprep.subr.bf16.mxu0 %v979_v41  ;;  %597 = vmatprep.subr.bf16.mxu1 %v981_v42  ;;  %v999_v54 = vld [vmem:[%s1198_s5 + $0xac] ss:$16 sps:$4 sm:$0xff]   ;;  %v1001_v55 = vld [vmem:[%s1198_s5 + $0xa0] ss:$16 sps:$4 sm:$0xff]   ;;  %v1002_v56 = vld [vmem:[%s1198_s5 + $0xa8] ss:$16 sps:$4 sm:$0xff]  }
  0x34   : > { %v1003_v57 = vld [vmem:[%s1198_s5 + $0xc4] ss:$16 sps:$4 sm:$0xff]   ;;  %v1005_v58 = vld [vmem:[%s1198_s5 + $0xcc] ss:$16 sps:$4 sm:$0xff]   ;;  %v1007_v59 = vld [vmem:[%s1198_s5 + $0xc0] ss:$16 sps:$4 sm:$0xff]  }
  0x35   : > { %v1008_v60 = vld [vmem:[%s1198_s5 + $0xc8] ss:$16 sps:$4 sm:$0xff]   ;;  %v1009_v61 = vld [vmem:[%s1198_s5 + $0xe4] ss:$16 sps:$4 sm:$0xff]   ;;  %v1011_v62 = vld [vmem:[%s1198_s5 + $0xec] ss:$16 sps:$4 sm:$0xff]  }
  0x36   : > { %555 = vmatpush1.bf16.msra.mxu0 %v983_v43  ;;  %598 = vmatpush1.bf16.msra.mxu1 %v984_v44  ;;  %v1013_v63 = vld [vmem:[%s1198_s5 + $0xe0] ss:$16 sps:$4 sm:$0xff]   ;;  %v1014_v0 = vld [vmem:[%s1198_s5 + $0xe8] ss:$16 sps:$4 sm:$0xff]   ;;  %s1274_s8 = smov (!%p323_p11, %s877_s8), 7  ;;  %v667_v4 = vsub.s32 0, %v666_v3 }
  0x37   : > { %556 = vmatprep.subr.bf16.mxu0 %v985_v45  ;;  %599 = vmatprep.subr.bf16.mxu1 %v987_v46  ;;  %s325_s11 = scalar_lea.vmem %s1264_s2, %s1274_s8  ;;  %v675_v5 = vsub.s32 2, %v666_v3  ;;  %v671_v7 = vsub.s32 1, %v666_v3  ;;  %v679_v8 = vsub.s32 3, %v666_v3  ;;  %s876_s18 = sshll.u32 %s277_s30, 5 }
  0x38   : > { %v663_v6 = vld [vmem:[%s325_s11] sm:$0xf]  ;;  %s310_s12 = scalar_lea.vmem [#allocation4], %s876_s18  ;;  %s925_s19 = sshll.u32 (%p1112_p6), %s1046_s14, 4 }
  0x39   : > { %v668_v9 = vrot.slane %v663_v6, %v667_v4  ;;  %v676_v10 = vrot.slane %v663_v6, %v675_v5  ;;  %v672_v11 = vrot.slane %v663_v6, %v671_v7  ;;  %v680_v12 = vrot.slane %v663_v6, %v679_v8  ;;  %s741_s24 = scalar_lea.vmem (%p1112_p6), %s1265_s3, %s925_s19 }
  0x3a   : > { %557 = vmatpush1.bf16.msra.mxu0 %v989_v47  ;;  %600 = vmatpush1.bf16.msra.mxu1 %v990_v48 }
  0x3b   : > { %558 = vmatprep.subr.bf16.mxu0 %v991_v49  ;;  %601 = vmatprep.subr.bf16.mxu1 %v993_v50 }
  0x3e   : > { %559 = vmatpush1.bf16.msra.mxu0 %v995_v51  ;;  %602 = vmatpush1.bf16.msra.mxu1 %v996_v52 }
  0x3f   : > { %560 = vmatprep.subr.bf16.mxu0 %v997_v53  ;;  %603 = vmatprep.subr.bf16.mxu1 %v999_v54 }
  0x42   : > { %561 = vmatpush1.bf16.msra.mxu0 %v1001_v55  ;;  %604 = vmatpush1.bf16.msra.mxu1 %v1002_v56 }
  0x43   : > { %562 = vmatprep.subr.bf16.mxu0 %v1003_v57  ;;  %605 = vmatprep.subr.bf16.mxu1 %v1005_v58 }
  0x46   : > { %563 = vmatpush1.bf16.msra.mxu0 %v1007_v59  ;;  %606 = vmatpush1.bf16.msra.mxu1 %v1008_v60 }
  0x47   : > { %564 = vmatprep.subr.bf16.mxu0 %v1009_v61  ;;  %607 = vmatprep.subr.bf16.mxu1 %v1011_v62 }
  0x4a   : > { %565 = vmatpush1.bf16.msra.mxu0 %v1013_v63  ;;  %608 = vmatpush1.bf16.msra.mxu1 %v1014_v0 }
  0x4d   : > { %583 = vmatmul.mubr.bf16.vlgmr.msra.gmra.mrb[0].mxu0 %v1015_v1  ;;  %626 = vmatmul.mubr.bf16.vlgmr.msra.gmra.mrb[0].mxu1 %v1015_v1 }
 0x120   : > { %v584_v13 = vpop.f32.mrb[0].mxu0  ;;  %v627_v14 = vpop.f32.mrb[0].mxu1 }
 0x121   : > { %v685_v15 = vadd.f32 %v668_v9, %v584_v13  ;;  %v687_v16 = vadd.f32 %v676_v10, %v627_v14  ;;  %v586_v17 = vpop.f32.mrb[1].mxu0  ;;  %v629_v18 = vpop.f32.mrb[1].mxu1 }
 0x122   : > { %v686_v19 = vadd.f32 %v672_v11, %v586_v17  ;;  %v688_v20 = vadd.f32 %v680_v12, %v629_v18  ;;  %v588_v21 = vpop.f32.mrb[2].mxu0  ;;  %v631_v22 = vpop.f32.mrb[2].mxu1 }
 0x123   : > { %v693_v23 = vmax.f32 %v685_v15, 0.0  ;;  %v695_v24 = vmax.f32 %v687_v16, 0.0  ;;  %v689_v25 = vadd.f32 %v668_v9, %v588_v21  ;;  %v691_v26 = vadd.f32 %v676_v10, %v631_v22  ;;  %v590_v27 = vpop.f32.mrb[3].mxu0  ;;  %v633_v28 = vpop.f32.mrb[3].mxu1 }
 0x124   : > { %v694_v29 = vmax.f32 %v686_v19, 0.0  ;;  %v696_v30 = vmax.f32 %v688_v20, 0.0  ;;  %v690_v31 = vadd.f32 %v672_v11, %v590_v27  ;;  %v692_v32 = vadd.f32 %v680_v12, %v633_v28  ;;  %735 = sbr.rel (!%p1112_p6) target bundleno = 307 (0x133), region = 67 }
 0x125   : > { %v697_v33 = vmax.f32 %v689_v25, 0.0  ;;  %v699_v34 = vmax.f32 %v691_v26, 0.0 }
 0x126   : > { %v921_v35 = vpack.c.bf16 %v694_v29, %v693_v23  ;;  %v922_v36 = vpack.c.bf16 %v696_v30, %v695_v24  ;;  %v698_v37 = vmax.f32 %v690_v31, 0.0  ;;  %v700_v38 = vmax.f32 %v692_v32, 0.0 }
 0x128   : > { %725 = vst [vmem:[%s310_s12] sm:$0xff] %v921_v35  ;;  %726 = vst [vmem:[%s310_s12 + $0x8] sm:$0xff] %v922_v36  ;;  %v923_v39 = vpack.c.bf16 %v698_v37, %v697_v33  ;;  %v924_v40 = vpack.c.bf16 %v700_v38, %v699_v34 }
 0x12a   : > { %727 = vst [vmem:[%s310_s12 + $0x10] sm:$0xff] %v923_v39  ;;  %728 = vst [vmem:[%s310_s12 + $0x18] sm:$0xff] %v924_v40 }
 0x12f   : > { %v754_v41 = vld [vmem:[%s310_s12] sm:$0xff]  ;;  %v756_v42 = vld [vmem:[%s310_s12 + $0x8] sm:$0xff] }
 0x130   : > { %755 = vst [vmem:[%s741_s24] sm:$0xff] %v754_v41  ;;  %757 = vst [vmem:[%s741_s24 + $0x8] sm:$0xff] %v756_v42 }
 0x131   : > { %v758_v43 = vld [vmem:[%s310_s12 + $0x10] sm:$0xff]  ;;  %v760_v44 = vld [vmem:[%s310_s12 + $0x18] sm:$0xff] }
 0x132   : > { %759 = vst [vmem:[%s741_s24 + $0x20] sm:$0xff] %v758_v43  ;;  %761 = vst [vmem:[%s741_s24 + $0x28] sm:$0xff] %v760_v44 }
 0x133 PF: > { %s13_s16 = sadd.s32 1, %s1054_s16   ;;  %s1267_s12 = smov %s1042_s13 }
 0x134   : > { %p10_p12 = scmp.ge.s32.totalorder %s13_s16, 4   ;;  %s1268_s13 = smov %s1117_s22 }
 0x135   : > { %s1269_s14 = smov %s1050_s15  ;;  %s1270_s15 = smov %s1272_s17 }
 0x136   :  { %12 = sbr.rel (!%p10_p12) target bundleno = 3 (0x3), region = 127 }

</bundles_post_ra>
